<compile_context>
chip_gen: v5e
topology: v5e:2x2
jax: 0.10.0
libtpu: 0.0.40
codegen_flags: <defaults>
</compile_context>

<pallas_src>
import functools
import math

import jax
import jax.numpy as jnp
from jax.experimental import pallas as pl
from jax.experimental.pallas import tpu as pltpu


_PARAM_ORDER = ("wq", "bq", "wk", "bk", "wv", "bv", "wo", "bo",
                "g1", "be1", "w1", "b1", "w2", "b2", "g2", "be2")
_MATMUL_PARAMS = {"wq", "wk", "wv", "wo", "w1", "w2"}


# ---------------------------------------------------------------------------
# helpers
# ---------------------------------------------------------------------------

if hasattr(pltpu, "einshape"):
    def _bshd_to_bhsd(t):          # (Bb, S, H, dh) -> (Bb, H, S, dh)
        return pltpu.einshape("bshd->bhsd", t)

    def _bhsd_to_bshd(t):          # (Bb, H, S, dh) -> (Bb, S, H, dh)
        return pltpu.einshape("bhsd->bshd", t)
else:  # pragma: no cover - older jax
    def _bshd_to_bhsd(t):
        return jnp.transpose(t, (0, 2, 1, 3))

    def _bhsd_to_bshd(t):
        return jnp.transpose(t, (0, 2, 1, 3))


def _layernorm(x, gamma, beta, eps=1e-5):
    mu = jnp.mean(x, axis=-1, keepdims=True)
    var = jnp.mean((x - mu) ** 2, axis=-1, keepdims=True)
    return (x - mu) * jax.lax.rsqrt(var + eps) * gamma + beta


def _vmem_budget_bytes():
    """~75% of the device VMEM capacity (generation-aware: v5e/v6e 128 MiB, v7x 64 MiB)."""
    try:
        cap = pltpu.get_tpu_info().vmem_capacity_bytes
    except Exception:
        cap = 64 * 1024 * 1024
    return int(cap) * 3 // 4


def _step_vmem_bytes(bb, S, D, H, DFF, scores_bytes, has_mask):
    """Rough per-grid-step VMEM footprint estimate for a batch block of bb rows."""
    M = bb * S
    pipelined = 2 * M * D * 4 + bb * H * S * S * scores_bytes      # x in + y out + scores out
    if has_mask:
        pipelined += bb * S * S * 4
    pipelined *= 2                                                  # double-buffered blocks
    weights = 2 * (4 * D * D + 2 * D * DFF) + 4 * (7 * D + DFF)     # resident (single buffer)
    interm = 6 * M * D * 4 + 3 * bb * H * S * S * 4 + 6 * M * DFF   # q/k/v, probs, ffa, ...
    return pipelined + weights + interm


def _pick_block_b(B, S, D, H, DFF, scores_bytes, has_mask, budget):
    """Largest divisor of B whose estimated per-step footprint fits the VMEM budget."""
    best = 1
    for d in range(1, B + 1):
        if B % d == 0 and _step_vmem_bytes(d, S, D, H, DFF, scores_bytes, has_mask) <= budget:
            best = d
    return best


def _const_spec(arr, single_buffer):
    """Weight / bias block: constant index_map (resident, no re-DMA); single-buffered
    when supported to halve resident weight VMEM."""
    nd = arr.ndim
    idx = lambda i, _nd=nd: (0,) * _nd
    if single_buffer:
        try:
            return pl.BlockSpec(arr.shape, idx, pipeline_mode=pl.Buffered(1))
        except Exception:
            pass
    return pl.BlockSpec(arr.shape, idx)


# ---------------------------------------------------------------------------
# kernel
# ---------------------------------------------------------------------------

def encoder_layer_kernel(*refs, n_heads, has_mask):
    if has_mask:
        x_ref, mask_ref = refs[0], refs[1]
        p_refs = refs[2:18]
    else:
        x_ref, mask_ref = refs[0], None
        p_refs = refs[1:17]
    (wq_ref, bq_ref, wk_ref, bk_ref, wv_ref, bv_ref, wo_ref, bo_ref,
     g1_ref, be1_ref, w1_ref, b1_ref, w2_ref, b2_ref, g2_ref, be2_ref) = p_refs
    y_ref, sc_ref = refs[-2], refs[-1]

    Bb, S, D = x_ref.shape
    H = n_heads
    dh = D // H
    scale = 1.0 / math.sqrt(dh)

    # Fold batch rows into the matmul M dimension.
    x = x_ref[...].reshape(Bb * S, D)                       # (Bb*S, D) f32
    xb = x.astype(jnp.bfloat16)

    # QKV projections: bf16 MXU matmuls, f32 accumulation + f32 bias.
    q = jnp.dot(xb, wq_ref[...], preferred_element_type=jnp.float32) + bq_ref[...]
    k = jnp.dot(xb, wk_ref[...], preferred_element_type=jnp.float32) + bk_ref[...]
    v = jnp.dot(xb, wv_ref[...], preferred_element_type=jnp.float32) + bv_ref[...]
    # Scale q once on (Bb*S, D) instead of scaling the (H,S,S) scores.
    q = q * scale

    def _split_heads(t):
        # (Bb*S, D) -> (Bb*H, S, dh): heads moved to the leading (batch) axis.
        t4 = _bshd_to_bhsd(t.reshape(Bb, S, H, dh))
        return t4.reshape(Bb * H, S, dh).astype(jnp.bfloat16)

    qh = _split_heads(q)
    kh = _split_heads(k)
    vh = _split_heads(v)

    # One head/batch-batched score matmul for the whole block.
    s = jnp.einsum('bqd,bkd->bqk', qh, kh,
                   preferred_element_type=jnp.float32)       # (Bb*H, S, S)
    s = s.reshape(Bb, H, S, S)
    if has_mask:
        s = s + mask_ref[...]                                # (Bb,1,S,S) broadcast over heads
    s = s - jnp.max(s, axis=-1, keepdims=True)
    e = jnp.exp(s)
    # Exact reciprocal on the small (.., S, 1) denominator (scores are an exposed output).
    p = e * (1.0 / jnp.sum(e, axis=-1, keepdims=True))
    sc_ref[...] = p.astype(sc_ref.dtype)                     # single lane-dense store

    # One batched PV matmul for the whole block.
    o = jnp.einsum('bqk,bkd->bqd',
                   p.reshape(Bb * H, S, S).astype(jnp.bfloat16), vh,
                   preferred_element_type=jnp.float32)       # (Bb*H, S, dh)
    # Merge heads with a single permute (no per-head lane concats); output projection
    # then keeps a full K=D contraction for the MXU.
    attn = _bhsd_to_bshd(o.reshape(Bb, H, S, dh)).reshape(Bb * S, D)

    out = jnp.dot(attn.astype(jnp.bfloat16), wo_ref[...],
                  preferred_element_type=jnp.float32) + bo_ref[...]
    h1 = _layernorm(x + out, g1_ref[...], be1_ref[...])

    # Feed-forward (ReLU) + residual + LayerNorm 2.
    ffa = jnp.maximum(
        jnp.dot(h1.astype(jnp.bfloat16), w1_ref[...],
                preferred_element_type=jnp.float32) + b1_ref[...], 0.0)
    ff = jnp.dot(ffa.astype(jnp.bfloat16), w2_ref[...],
                 preferred_element_type=jnp.float32) + b2_ref[...]
    y = _layernorm(h1 + ff, g2_ref[...], be2_ref[...])

    y_ref[...] = y.reshape(Bb, S, D)


# ---------------------------------------------------------------------------
# wrappers
# ---------------------------------------------------------------------------

def encoder_layer_apply(x, mask, params, n_heads, scores_dtype=jnp.float32):
    """One encoder layer.
    x:(B,S,D) f32, mask: None or (B,1,S,S) additive f32 mask (pad+attn pre-combined).
    Returns (y:(B,S,D) f32, scores:(B,H,S,S) scores_dtype)."""
    B, S, D = x.shape
    H = n_heads
    assert D % H == 0
    DFF = params["w1"].shape[1]
    has_mask = mask is not None
    scores_bytes = jnp.dtype(scores_dtype).itemsize

    budget = _vmem_budget_bytes()
    block_b = _pick_block_b(B, S, D, H, DFF, scores_bytes, has_mask, budget)
    grid = (B // block_b,)

    # Cast matmul weights to bf16 once (MXU-native); biases / LN params stay f32.
    args = [params[n].astype(jnp.bfloat16) if n in _MATMUL_PARAMS else params[n]
            for n in _PARAM_ORDER]

    kernel = functools.partial(encoder_layer_kernel, n_heads=n_heads, has_mask=has_mask)

    out_shape = (jax.ShapeDtypeStruct((B, S, D), jnp.float32),
                 jax.ShapeDtypeStruct((B, H, S, S), scores_dtype))
    out_specs = (pl.BlockSpec((block_b, S, D), lambda i: (i, 0, 0)),
                 pl.BlockSpec((block_b, H, S, S), lambda i: (i, 0, 0, 0)))

    flops = 2 * B * S * D * (4 * D + 2 * DFF) + 4 * B * S * S * D
    bytes_accessed = (2 * 4 * B * S * D
                      + scores_bytes * B * H * S * S
                      + (4 * B * S * S if has_mask else 0)
                      + 2 * (4 * D * D + 2 * D * DFF)
                      + 4 * (7 * D + DFF))
    cost = pl.CostEstimate(flops=int(flops),
                           transcendentals=int(B * H * S * S),
                           bytes_accessed=int(bytes_accessed))

    def _call(single_buffer):
        in_specs = [pl.BlockSpec((block_b, S, D), lambda i: (i, 0, 0))]
        call_args = [x]
        if has_mask:
            in_specs.append(pl.BlockSpec((block_b, 1, S, S), lambda i: (i, 0, 0, 0)))
            call_args.append(mask)
        in_specs += [_const_spec(a, single_buffer) for a in args]
        call_args += args
        return pl.pallas_call(
            kernel,
            grid=grid,
            in_specs=in_specs,
            out_specs=out_specs,
            out_shape=out_shape,
            compiler_params=pltpu.CompilerParams(
                dimension_semantics=("parallel",),
                vmem_limit_bytes=int(budget)),
            cost_estimate=cost,
        )(*call_args)

    try:
        return _call(single_buffer=True)
    except Exception:
        # Fallback if single-buffered (pl.Buffered(1)) weight blocks are unsupported.
        return _call(single_buffer=False)


def encoder_forward(x, layer_params_list, n_heads,
                    key_padding_mask=None, atten_mask=None, scores_dtype=jnp.float32):
    """Mirrors Encoder.forward: returns (x, [scores_per_layer])."""
    B, S, _ = x.shape
    # Pre-combine both masks into ONE additive mask so only one add (and one DMA) hits
    # the (H,S,S) tensor; skip entirely when no masks are given.
    mask = None
    if key_padding_mask is not None or atten_mask is not None:
        mask = jnp.zeros((B, 1, S, S), jnp.float32)
        if key_padding_mask is not None:      # (B, S) bool, True = pad position
            mask = mask + jnp.where(key_padding_mask, -1e9, 0.0
                                    ).astype(jnp.float32)[:, None, None, :]
        if atten_mask is not None:            # (S, S) bool, True = masked
            mask = mask + jnp.where(atten_mask, -1e9, 0.0
                                    ).astype(jnp.float32)[None, None, :, :]

    scores = []
    for params in layer_params_list:
        x, score = encoder_layer_apply(x, mask, params, n_heads, scores_dtype=scores_dtype)
        scores.append(score)
    return x, scores


def init_layer_params(key, d_model, d_ff):
    """Deterministic xavier-uniform init. Biases stored as (1, dim) for TPU 2D layout."""
    def xavier(k, shape):
        fan_in, fan_out = shape
        limit = (6.0 / (fan_in + fan_out)) ** 0.5
        return jax.random.uniform(k, shape, jnp.float32, -limit, limit)

    ks = jax.random.split(key, 6)
    return {
        "wq": xavier(ks[0], (d_model, d_model)), "bq": jnp.zeros((1, d_model), jnp.float32),
        "wk": xavier(ks[1], (d_model, d_model)), "bk": jnp.zeros((1, d_model), jnp.float32),
        "wv": xavier(ks[2], (d_model, d_model)), "bv": jnp.zeros((1, d_model), jnp.float32),
        "wo": xavier(ks[3], (d_model, d_model)), "bo": jnp.zeros((1, d_model), jnp.float32),
        "g1": jnp.ones((1, d_model), jnp.float32), "be1": jnp.zeros((1, d_model), jnp.float32),
        "w1": xavier(ks[4], (d_model, d_ff)),    "b1": jnp.zeros((1, d_ff), jnp.float32),
        "w2": xavier(ks[5], (d_ff, d_model)),    "b2": jnp.zeros((1, d_model), jnp.float32),
        "g2": jnp.ones((1, d_model), jnp.float32), "be2": jnp.zeros((1, d_model), jnp.float32),
    }


if __name__ == "__main__":
    B, S, D, H, DFF = 2, 8, 32, 4, 64
    N_LAYERS = 2

    key = jax.random.PRNGKey(0)
    k_x, k_p = jax.random.split(key)
    x = jax.random.normal(k_x, (B, S, D), dtype=jnp.float32)

    # copy.deepcopy(encoder_layer) in the reference -> all layers share identical init values.
    base_params = init_layer_params(k_p, D, DFF)
    layer_params_list = [base_params for _ in range(N_LAYERS)]

    # Unmasked path (masks == None -> mask add + mask DMA are skipped entirely).
    y, scores = encoder_forward(x, layer_params_list, n_heads=H,
                                key_padding_mask=None, atten_mask=None)
    jax.block_until_ready(y)
    jax.block_until_ready(scores)
    assert y.shape == (B, S, D)
    assert len(scores) == N_LAYERS and scores[0].shape == (B, H, S, S)
    assert bool(jnp.all(jnp.isfinite(y)))
    assert bool(jnp.all(jnp.isfinite(scores[0])))

    # Masked path (causal attention mask + key padding on the last 2 keys of row 1).
    kpm = jnp.zeros((B, S), dtype=bool).at[1, -2:].set(True)
    causal = jnp.triu(jnp.ones((S, S), dtype=bool), k=1)
    y_m, scores_m = encoder_forward(x, layer_params_list, n_heads=H,
                                    key_padding_mask=kpm, atten_mask=causal)
    jax.block_until_ready(y_m)
    jax.block_until_ready(scores_m)
    assert y_m.shape == (B, S, D)
    assert bool(jnp.all(jnp.isfinite(y_m)))
    assert bool(jnp.all(jnp.isfinite(scores_m[0])))

    print("KERNEL_OK")
</pallas_src>

<mosaic_0001>
module attributes {stable_mosaic.version = 11 : i64} {
  func.func @encoder_layer_kernel(%arg0: i32, %arg1: memref<2x8x32xf32, #tpu.memory_space<vmem>>, %arg2: memref<32x32xbf16, #tpu.memory_space<vmem>>, %arg3: memref<1x32xf32, #tpu.memory_space<vmem>>, %arg4: memref<32x32xbf16, #tpu.memory_space<vmem>>, %arg5: memref<1x32xf32, #tpu.memory_space<vmem>>, %arg6: memref<32x32xbf16, #tpu.memory_space<vmem>>, %arg7: memref<1x32xf32, #tpu.memory_space<vmem>>, %arg8: memref<32x32xbf16, #tpu.memory_space<vmem>>, %arg9: memref<1x32xf32, #tpu.memory_space<vmem>>, %arg10: memref<1x32xf32, #tpu.memory_space<vmem>>, %arg11: memref<1x32xf32, #tpu.memory_space<vmem>>, %arg12: memref<32x64xbf16, #tpu.memory_space<vmem>>, %arg13: memref<1x64xf32, #tpu.memory_space<vmem>>, %arg14: memref<64x32xbf16, #tpu.memory_space<vmem>>, %arg15: memref<1x32xf32, #tpu.memory_space<vmem>>, %arg16: memref<1x32xf32, #tpu.memory_space<vmem>>, %arg17: memref<1x32xf32, #tpu.memory_space<vmem>>, %arg18: memref<2x8x32xf32, #tpu.memory_space<vmem>>, %arg19: memref<2x4x8x8xf32, #tpu.memory_space<vmem>>) attributes {dimension_semantics = [#tpu.dimension_semantics<parallel>], iteration_bounds = array<i64: 1>, scalar_prefetch = 0 : i64, scratch_operands = 0 : i64, tpu.core_type = #tpu.core_type<tc>, window_params = [{transform_indices = @transform_0, window_bounds = array<i64: 2, 8, 32>}, {pipeline_mode = #tpu.pipeline_mode<synchronous>, transform_indices = @transform_1, window_bounds = array<i64: 32, 32>}, {pipeline_mode = #tpu.pipeline_mode<synchronous>, transform_indices = @transform_2, window_bounds = array<i64: 1, 32>}, {pipeline_mode = #tpu.pipeline_mode<synchronous>, transform_indices = @transform_3, window_bounds = array<i64: 32, 32>}, {pipeline_mode = #tpu.pipeline_mode<synchronous>, transform_indices = @transform_4, window_bounds = array<i64: 1, 32>}, {pipeline_mode = #tpu.pipeline_mode<synchronous>, transform_indices = @transform_5, window_bounds = array<i64: 32, 32>}, {pipeline_mode = #tpu.pipeline_mode<synchronous>, transform_indices = @transform_6, window_bounds = array<i64: 1, 32>}, {pipeline_mode = #tpu.pipeline_mode<synchronous>, transform_indices = @transform_7, window_bounds = array<i64: 32, 32>}, {pipeline_mode = #tpu.pipeline_mode<synchronous>, transform_indices = @transform_8, window_bounds = array<i64: 1, 32>}, {pipeline_mode = #tpu.pipeline_mode<synchronous>, transform_indices = @transform_9, window_bounds = array<i64: 1, 32>}, {pipeline_mode = #tpu.pipeline_mode<synchronous>, transform_indices = @transform_10, window_bounds = array<i64: 1, 32>}, {pipeline_mode = #tpu.pipeline_mode<synchronous>, transform_indices = @transform_11, window_bounds = array<i64: 32, 64>}, {pipeline_mode = #tpu.pipeline_mode<synchronous>, transform_indices = @transform_12, window_bounds = array<i64: 1, 64>}, {pipeline_mode = #tpu.pipeline_mode<synchronous>, transform_indices = @transform_13, window_bounds = array<i64: 64, 32>}, {pipeline_mode = #tpu.pipeline_mode<synchronous>, transform_indices = @transform_14, window_bounds = array<i64: 1, 32>}, {pipeline_mode = #tpu.pipeline_mode<synchronous>, transform_indices = @transform_15, window_bounds = array<i64: 1, 32>}, {pipeline_mode = #tpu.pipeline_mode<synchronous>, transform_indices = @transform_16, window_bounds = array<i64: 1, 32>}, {transform_indices = @transform_17, window_bounds = array<i64: 2, 8, 32>}, {transform_indices = @transform_18, window_bounds = array<i64: 2, 4, 8, 8>}]} {
    %c0 = arith.constant 0 : index
    %c0_0 = arith.constant 0 : index
    %c0_1 = arith.constant 0 : index
    %0 = vector.load %arg1[%c0, %c0_0, %c0_1] : memref<2x8x32xf32, #tpu.memory_space<vmem>>, vector<2x8x32xf32>
    %1 = vector.shape_cast %0 : vector<2x8x32xf32> to vector<16x32xf32>
    %2 = arith.truncf %1 : vector<16x32xf32> to vector<16x32xbf16>
    %c0_2 = arith.constant 0 : index
    %c0_3 = arith.constant 0 : index
    %3 = vector.load %arg2[%c0_2, %c0_3] : memref<32x32xbf16, #tpu.memory_space<vmem>>, vector<32x32xbf16>
    %cst = arith.constant dense<0.000000e+00> : vector<16x32xf32>
    %4 = tpu.matmul %2, %3, %cst {dimension_numbers = #tpu.dot_dimension_numbers<[1], [0], [0], [1], [0, 0, 1, 1], [], []>} : vector<16x32xbf16>, vector<32x32xbf16>, vector<16x32xf32> -> vector<16x32xf32>
    %c0_4 = arith.constant 0 : index
    %c0_5 = arith.constant 0 : index
    %5 = vector.load %arg3[%c0_4, %c0_5] : memref<1x32xf32, #tpu.memory_space<vmem>>, vector<1x32xf32>
    %6 = vector.broadcast %5 : vector<1x32xf32> to vector<16x32xf32>
    %7 = arith.addf %4, %6 : vector<16x32xf32>
    %c0_6 = arith.constant 0 : index
    %c0_7 = arith.constant 0 : index
    %8 = vector.load %arg4[%c0_6, %c0_7] : memref<32x32xbf16, #tpu.memory_space<vmem>>, vector<32x32xbf16>
    %cst_8 = arith.constant dense<0.000000e+00> : vector<16x32xf32>
    %9 = tpu.matmul %2, %8, %cst_8 {dimension_numbers = #tpu.dot_dimension_numbers<[1], [0], [0], [1], [0, 0, 1, 1], [], []>} : vector<16x32xbf16>, vector<32x32xbf16>, vector<16x32xf32> -> vector<16x32xf32>
    %c0_9 = arith.constant 0 : index
    %c0_10 = arith.constant 0 : index
    %10 = vector.load %arg5[%c0_9, %c0_10] : memref<1x32xf32, #tpu.memory_space<vmem>>, vector<1x32xf32>
    %11 = vector.broadcast %10 : vector<1x32xf32> to vector<16x32xf32>
    %12 = arith.addf %9, %11 : vector<16x32xf32>
    %c0_11 = arith.constant 0 : index
    %c0_12 = arith.constant 0 : index
    %13 = vector.load %arg6[%c0_11, %c0_12] : memref<32x32xbf16, #tpu.memory_space<vmem>>, vector<32x32xbf16>
    %cst_13 = arith.constant dense<0.000000e+00> : vector<16x32xf32>
    %14 = tpu.matmul %2, %13, %cst_13 {dimension_numbers = #tpu.dot_dimension_numbers<[1], [0], [0], [1], [0, 0, 1, 1], [], []>} : vector<16x32xbf16>, vector<32x32xbf16>, vector<16x32xf32> -> vector<16x32xf32>
    %c0_14 = arith.constant 0 : index
    %c0_15 = arith.constant 0 : index
    %15 = vector.load %arg7[%c0_14, %c0_15] : memref<1x32xf32, #tpu.memory_space<vmem>>, vector<1x32xf32>
    %16 = vector.broadcast %15 : vector<1x32xf32> to vector<16x32xf32>
    %17 = arith.addf %14, %16 : vector<16x32xf32>
    %cst_16 = arith.constant 0.353553385 : f32
    %18 = vector.broadcast %cst_16 : f32 to vector<16x32xf32>
    %19 = arith.mulf %7, %18 : vector<16x32xf32>
    %20 = vector.shape_cast %19 : vector<16x32xf32> to vector<2x8x4x8xf32>
    %21 = tpu.transpose %20, [0, 2, 1, 3] : vector<2x8x4x8xf32> -> vector<2x4x8x8xf32>
    %22 = vector.shape_cast %21 : vector<2x4x8x8xf32> to vector<8x8x8xf32>
    %23 = arith.truncf %22 : vector<8x8x8xf32> to vector<8x8x8xbf16>
    %24 = vector.shape_cast %12 : vector<16x32xf32> to vector<2x8x4x8xf32>
    %25 = tpu.transpose %24, [0, 2, 1, 3] : vector<2x8x4x8xf32> -> vector<2x4x8x8xf32>
    %26 = vector.shape_cast %25 : vector<2x4x8x8xf32> to vector<8x8x8xf32>
    %27 = arith.truncf %26 : vector<8x8x8xf32> to vector<8x8x8xbf16>
    %28 = vector.shape_cast %17 : vector<16x32xf32> to vector<2x8x4x8xf32>
    %29 = tpu.transpose %28, [0, 2, 1, 3] : vector<2x8x4x8xf32> -> vector<2x4x8x8xf32>
    %30 = vector.shape_cast %29 : vector<2x4x8x8xf32> to vector<8x8x8xf32>
    %31 = arith.truncf %30 : vector<8x8x8xf32> to vector<8x8x8xbf16>
    "tpu.trace_start"() <{level = 10 : i32, message = "bqd,bkd->bqk"}> : () -> ()
    %cst_17 = arith.constant dense<0.000000e+00> : vector<8x8x8xf32>
    %32 = tpu.matmul %23, %27, %cst_17 {dimension_numbers = #tpu.dot_dimension_numbers<[2], [2], [1], [1], [0, 0, 0, 1, 1, 1], [0], [0]>} : vector<8x8x8xbf16>, vector<8x8x8xbf16>, vector<8x8x8xf32> -> vector<8x8x8xf32>
    "tpu.trace_stop"() : () -> ()
    %33 = vector.shape_cast %32 : vector<8x8x8xf32> to vector<2x4x8x8xf32>
    %cst_18 = arith.constant dense<0xFF800000> : vector<2x4x8xf32>
    %34 = vector.multi_reduction <maximumf>, %33, %cst_18 [3] : vector<2x4x8x8xf32> to vector<2x4x8xf32>
    %35 = vector.shape_cast %34 : vector<2x4x8xf32> to vector<2x4x8x1xf32>
    %36 = vector.broadcast %35 : vector<2x4x8x1xf32> to vector<2x4x8x8xf32>
    %37 = arith.subf %33, %36 : vector<2x4x8x8xf32>
    %38 = math.exp %37 : vector<2x4x8x8xf32>
    %cst_19 = arith.constant dense<0.000000e+00> : vector<2x4x8xf32>
    %39 = vector.multi_reduction <add>, %38, %cst_19 [3] : vector<2x4x8x8xf32> to vector<2x4x8xf32>
    %40 = vector.shape_cast %39 : vector<2x4x8xf32> to vector<2x4x8x1xf32>
    %cst_20 = arith.constant 1.000000e+00 : f32
    %41 = vector.broadcast %cst_20 : f32 to vector<2x4x8x1xf32>
    %42 = arith.divf %41, %40 : vector<2x4x8x1xf32>
    %43 = vector.broadcast %42 : vector<2x4x8x1xf32> to vector<2x4x8x8xf32>
    %44 = arith.mulf %38, %43 : vector<2x4x8x8xf32>
    %c0_21 = arith.constant 0 : index
    %c0_22 = arith.constant 0 : index
    %c0_23 = arith.constant 0 : index
    %c0_24 = arith.constant 0 : index
    %45 = vector.load %arg19[%c0_21, %c0_22, %c0_23, %c0_24] : memref<2x4x8x8xf32, #tpu.memory_space<vmem>>, vector<2x4x8x8xf32>
    tpu.vector_store %arg19[%c0_21, %c0_22, %c0_23, %c0_24], %44 {strides = array<i32>} : memref<2x4x8x8xf32, #tpu.memory_space<vmem>>, vector<2x4x8x8xf32>,
    %46 = vector.shape_cast %44 : vector<2x4x8x8xf32> to vector<8x8x8xf32>
    %47 = arith.truncf %46 : vector<8x8x8xf32> to vector<8x8x8xbf16>
    "tpu.trace_start"() <{level = 10 : i32, message = "bqk,bkd->bqd"}> : () -> ()
    %cst_25 = arith.constant dense<0.000000e+00> : vector<8x8x8xf32>
    %48 = tpu.matmul %47, %31, %cst_25 {dimension_numbers = #tpu.dot_dimension_numbers<[2], [1], [1], [2], [0, 0, 0, 1, 1, 2], [0], [0]>} : vector<8x8x8xbf16>, vector<8x8x8xbf16>, vector<8x8x8xf32> -> vector<8x8x8xf32>
    "tpu.trace_stop"() : () -> ()
    %49 = vector.shape_cast %48 : vector<8x8x8xf32> to vector<2x4x8x8xf32>
    %50 = tpu.transpose %49, [0, 2, 1, 3] : vector<2x4x8x8xf32> -> vector<2x8x4x8xf32>
    %51 = vector.shape_cast %50 : vector<2x8x4x8xf32> to vector<16x32xf32>
    %52 = arith.truncf %51 : vector<16x32xf32> to vector<16x32xbf16>
    %c0_26 = arith.constant 0 : index
    %c0_27 = arith.constant 0 : index
    %53 = vector.load %arg8[%c0_26, %c0_27] : memref<32x32xbf16, #tpu.memory_space<vmem>>, vector<32x32xbf16>
    %cst_28 = arith.constant dense<0.000000e+00> : vector<16x32xf32>
    %54 = tpu.matmul %52, %53, %cst_28 {dimension_numbers = #tpu.dot_dimension_numbers<[1], [0], [0], [1], [0, 0, 1, 1], [], []>} : vector<16x32xbf16>, vector<32x32xbf16>, vector<16x32xf32> -> vector<16x32xf32>
    %c0_29 = arith.constant 0 : index
    %c0_30 = arith.constant 0 : index
    %55 = vector.load %arg9[%c0_29, %c0_30] : memref<1x32xf32, #tpu.memory_space<vmem>>, vector<1x32xf32>
    %56 = vector.broadcast %55 : vector<1x32xf32> to vector<16x32xf32>
    %57 = arith.addf %54, %56 : vector<16x32xf32>
    %58 = arith.addf %1, %57 : vector<16x32xf32>
    %c0_31 = arith.constant 0 : index
    %c0_32 = arith.constant 0 : index
    %59 = vector.load %arg10[%c0_31, %c0_32] : memref<1x32xf32, #tpu.memory_space<vmem>>, vector<1x32xf32>
    %c0_33 = arith.constant 0 : index
    %c0_34 = arith.constant 0 : index
    %60 = vector.load %arg11[%c0_33, %c0_34] : memref<1x32xf32, #tpu.memory_space<vmem>>, vector<1x32xf32>
    %cst_35 = arith.constant dense<0.000000e+00> : vector<16xf32>
    %61 = vector.multi_reduction <add>, %58, %cst_35 [1] : vector<16x32xf32> to vector<16xf32>
    %62 = vector.shape_cast %61 : vector<16xf32> to vector<16x1xf32>
    %cst_36 = arith.constant 3.200000e+01 : f32
    %63 = vector.broadcast %cst_36 : f32 to vector<16x1xf32>
    %64 = arith.divf %62, %63 : vector<16x1xf32>
    %65 = vector.broadcast %64 : vector<16x1xf32> to vector<16x32xf32>
    %66 = arith.subf %58, %65 : vector<16x32xf32>
    %67 = arith.mulf %66, %66 : vector<16x32xf32>
    %cst_37 = arith.constant dense<0.000000e+00> : vector<16xf32>
    %68 = vector.multi_reduction <add>, %67, %cst_37 [1] : vector<16x32xf32> to vector<16xf32>
    %69 = vector.shape_cast %68 : vector<16xf32> to vector<16x1xf32>
    %cst_38 = arith.constant 3.200000e+01 : f32
    %70 = vector.broadcast %cst_38 : f32 to vector<16x1xf32>
    %71 = arith.divf %69, %70 : vector<16x1xf32>
    %72 = vector.broadcast %64 : vector<16x1xf32> to vector<16x32xf32>
    %73 = arith.subf %58, %72 : vector<16x32xf32>
    %cst_39 = arith.constant 9.99999974E-6 : f32
    %74 = vector.broadcast %cst_39 : f32 to vector<16x1xf32>
    %75 = arith.addf %71, %74 : vector<16x1xf32>
    %76 = math.rsqrt %75 : vector<16x1xf32>
    %77 = vector.broadcast %76 : vector<16x1xf32> to vector<16x32xf32>
    %78 = arith.mulf %73, %77 : vector<16x32xf32>
    %79 = vector.broadcast %59 : vector<1x32xf32> to vector<16x32xf32>
    %80 = arith.mulf %78, %79 : vector<16x32xf32>
    %81 = vector.broadcast %60 : vector<1x32xf32> to vector<16x32xf32>
    %82 = arith.addf %80, %81 : vector<16x32xf32>
    %83 = arith.truncf %82 : vector<16x32xf32> to vector<16x32xbf16>
    %c0_40 = arith.constant 0 : index
    %c0_41 = arith.constant 0 : index
    %84 = vector.load %arg12[%c0_40, %c0_41] : memref<32x64xbf16, #tpu.memory_space<vmem>>, vector<32x64xbf16>
    %cst_42 = arith.constant dense<0.000000e+00> : vector<16x64xf32>
    %85 = tpu.matmul %83, %84, %cst_42 {dimension_numbers = #tpu.dot_dimension_numbers<[1], [0], [0], [1], [0, 0, 1, 1], [], []>} : vector<16x32xbf16>, vector<32x64xbf16>, vector<16x64xf32> -> vector<16x64xf32>
    %c0_43 = arith.constant 0 : index
    %c0_44 = arith.constant 0 : index
    %86 = vector.load %arg13[%c0_43, %c0_44] : memref<1x64xf32, #tpu.memory_space<vmem>>, vector<1x64xf32>
    %87 = vector.broadcast %86 : vector<1x64xf32> to vector<16x64xf32>
    %88 = arith.addf %85, %87 : vector<16x64xf32>
    %cst_45 = arith.constant 0.000000e+00 : f32
    %89 = vector.broadcast %cst_45 : f32 to vector<16x64xf32>
    %90 = arith.maximumf %88, %89 : vector<16x64xf32>
    %91 = arith.truncf %90 : vector<16x64xf32> to vector<16x64xbf16>
    %c0_46 = arith.constant 0 : index
    %c0_47 = arith.constant 0 : index
    %92 = vector.load %arg14[%c0_46, %c0_47] : memref<64x32xbf16, #tpu.memory_space<vmem>>, vector<64x32xbf16>
    %cst_48 = arith.constant dense<0.000000e+00> : vector<16x32xf32>
    %93 = tpu.matmul %91, %92, %cst_48 {dimension_numbers = #tpu.dot_dimension_numbers<[1], [0], [0], [1], [0, 0, 1, 1], [], []>} : vector<16x64xbf16>, vector<64x32xbf16>, vector<16x32xf32> -> vector<16x32xf32>
    %c0_49 = arith.constant 0 : index
    %c0_50 = arith.constant 0 : index
    %94 = vector.load %arg15[%c0_49, %c0_50] : memref<1x32xf32, #tpu.memory_space<vmem>>, vector<1x32xf32>
    %95 = vector.broadcast %94 : vector<1x32xf32> to vector<16x32xf32>
    %96 = arith.addf %93, %95 : vector<16x32xf32>
    %97 = arith.addf %82, %96 : vector<16x32xf32>
    %c0_51 = arith.constant 0 : index
    %c0_52 = arith.constant 0 : index
    %98 = vector.load %arg16[%c0_51, %c0_52] : memref<1x32xf32, #tpu.memory_space<vmem>>, vector<1x32xf32>
    %c0_53 = arith.constant 0 : index
    %c0_54 = arith.constant 0 : index
    %99 = vector.load %arg17[%c0_53, %c0_54] : memref<1x32xf32, #tpu.memory_space<vmem>>, vector<1x32xf32>
    %cst_55 = arith.constant dense<0.000000e+00> : vector<16xf32>
    %100 = vector.multi_reduction <add>, %97, %cst_55 [1] : vector<16x32xf32> to vector<16xf32>
    %101 = vector.shape_cast %100 : vector<16xf32> to vector<16x1xf32>
    %cst_56 = arith.constant 3.200000e+01 : f32
    %102 = vector.broadcast %cst_56 : f32 to vector<16x1xf32>
    %103 = arith.divf %101, %102 : vector<16x1xf32>
    %104 = vector.broadcast %103 : vector<16x1xf32> to vector<16x32xf32>
    %105 = arith.subf %97, %104 : vector<16x32xf32>
    %106 = arith.mulf %105, %105 : vector<16x32xf32>
    %cst_57 = arith.constant dense<0.000000e+00> : vector<16xf32>
    %107 = vector.multi_reduction <add>, %106, %cst_57 [1] : vector<16x32xf32> to vector<16xf32>
    %108 = vector.shape_cast %107 : vector<16xf32> to vector<16x1xf32>
    %cst_58 = arith.constant 3.200000e+01 : f32
    %109 = vector.broadcast %cst_58 : f32 to vector<16x1xf32>
    %110 = arith.divf %108, %109 : vector<16x1xf32>
    %111 = vector.broadcast %103 : vector<16x1xf32> to vector<16x32xf32>
    %112 = arith.subf %97, %111 : vector<16x32xf32>
    %cst_59 = arith.constant 9.99999974E-6 : f32
    %113 = vector.broadcast %cst_59 : f32 to vector<16x1xf32>
    %114 = arith.addf %110, %113 : vector<16x1xf32>
    %115 = math.rsqrt %114 : vector<16x1xf32>
    %116 = vector.broadcast %115 : vector<16x1xf32> to vector<16x32xf32>
    %117 = arith.mulf %112, %116 : vector<16x32xf32>
    %118 = vector.broadcast %98 : vector<1x32xf32> to vector<16x32xf32>
    %119 = arith.mulf %117, %118 : vector<16x32xf32>
    %120 = vector.broadcast %99 : vector<1x32xf32> to vector<16x32xf32>
    %121 = arith.addf %119, %120 : vector<16x32xf32>
    %122 = vector.shape_cast %121 : vector<16x32xf32> to vector<2x8x32xf32>
    %c0_60 = arith.constant 0 : index
    %c0_61 = arith.constant 0 : index
    %c0_62 = arith.constant 0 : index
    %123 = vector.load %arg18[%c0_60, %c0_61, %c0_62] : memref<2x8x32xf32, #tpu.memory_space<vmem>>, vector<2x8x32xf32>
    tpu.vector_store %arg18[%c0_60, %c0_61, %c0_62], %122 {strides = array<i32>} : memref<2x8x32xf32, #tpu.memory_space<vmem>>, vector<2x8x32xf32>,
    return
  }
  func.func @transform_0(%arg0: i32) -> (i32, i32, i32) {
    %c0_i32 = arith.constant 0 : i32
    %c0_i32_0 = arith.constant 0 : i32
    %c0_i32_1 = arith.constant 0 : i32
    return %arg0, %c0_i32, %c0_i32_0 : i32, i32, i32
  }
  func.func @transform_1(%arg0: i32) -> (i32, i32) {
    %c0_i32 = arith.constant 0 : i32
    %c0_i32_0 = arith.constant 0 : i32
    %c0_i32_1 = arith.constant 0 : i32
    return %c0_i32, %c0_i32_0 : i32, i32
  }
  func.func @transform_2(%arg0: i32) -> (i32, i32) {
    %c0_i32 = arith.constant 0 : i32
    %c0_i32_0 = arith.constant 0 : i32
    %c0_i32_1 = arith.constant 0 : i32
    return %c0_i32, %c0_i32_0 : i32, i32
  }
  func.func @transform_3(%arg0: i32) -> (i32, i32) {
    %c0_i32 = arith.constant 0 : i32
    %c0_i32_0 = arith.constant 0 : i32
    %c0_i32_1 = arith.constant 0 : i32
    return %c0_i32, %c0_i32_0 : i32, i32
  }
  func.func @transform_4(%arg0: i32) -> (i32, i32) {
    %c0_i32 = arith.constant 0 : i32
    %c0_i32_0 = arith.constant 0 : i32
    %c0_i32_1 = arith.constant 0 : i32
    return %c0_i32, %c0_i32_0 : i32, i32
  }
  func.func @transform_5(%arg0: i32) -> (i32, i32) {
    %c0_i32 = arith.constant 0 : i32
    %c0_i32_0 = arith.constant 0 : i32
    %c0_i32_1 = arith.constant 0 : i32
    return %c0_i32, %c0_i32_0 : i32, i32
  }
  func.func @transform_6(%arg0: i32) -> (i32, i32) {
    %c0_i32 = arith.constant 0 : i32
    %c0_i32_0 = arith.constant 0 : i32
    %c0_i32_1 = arith.constant 0 : i32
    return %c0_i32, %c0_i32_0 : i32, i32
  }
  func.func @transform_7(%arg0: i32) -> (i32, i32) {
    %c0_i32 = arith.constant 0 : i32
    %c0_i32_0 = arith.constant 0 : i32
    %c0_i32_1 = arith.constant 0 : i32
    return %c0_i32, %c0_i32_0 : i32, i32
  }
  func.func @transform_8(%arg0: i32) -> (i32, i32) {
    %c0_i32 = arith.constant 0 : i32
    %c0_i32_0 = arith.constant 0 : i32
    %c0_i32_1 = arith.constant 0 : i32
    return %c0_i32, %c0_i32_0 : i32, i32
  }
  func.func @transform_9(%arg0: i32) -> (i32, i32) {
    %c0_i32 = arith.constant 0 : i32
    %c0_i32_0 = arith.constant 0 : i32
    %c0_i32_1 = arith.constant 0 : i32
    return %c0_i32, %c0_i32_0 : i32, i32
  }
  func.func @transform_10(%arg0: i32) -> (i32, i32) {
    %c0_i32 = arith.constant 0 : i32
    %c0_i32_0 = arith.constant 0 : i32
    %c0_i32_1 = arith.constant 0 : i32
    return %c0_i32, %c0_i32_0 : i32, i32
  }
  func.func @transform_11(%arg0: i32) -> (i32, i32) {
    %c0_i32 = arith.constant 0 : i32
    %c0_i32_0 = arith.constant 0 : i32
    %c0_i32_1 = arith.constant 0 : i32
    return %c0_i32, %c0_i32_0 : i32, i32
  }
  func.func @transform_12(%arg0: i32) -> (i32, i32) {
    %c0_i32 = arith.constant 0 : i32
    %c0_i32_0 = arith.constant 0 : i32
    %c0_i32_1 = arith.constant 0 : i32
    return %c0_i32, %c0_i32_0 : i32, i32
  }
  func.func @transform_13(%arg0: i32) -> (i32, i32) {
    %c0_i32 = arith.constant 0 : i32
    %c0_i32_0 = arith.constant 0 : i32
    %c0_i32_1 = arith.constant 0 : i32
    return %c0_i32, %c0_i32_0 : i32, i32
  }
  func.func @transform_14(%arg0: i32) -> (i32, i32) {
    %c0_i32 = arith.constant 0 : i32
    %c0_i32_0 = arith.constant 0 : i32
    %c0_i32_1 = arith.constant 0 : i32
    return %c0_i32, %c0_i32_0 : i32, i32
  }
  func.func @transform_15(%arg0: i32) -> (i32, i32) {
    %c0_i32 = arith.constant 0 : i32
    %c0_i32_0 = arith.constant 0 : i32
    %c0_i32_1 = arith.constant 0 : i32
    return %c0_i32, %c0_i32_0 : i32, i32
  }
  func.func @transform_16(%arg0: i32) -> (i32, i32) {
    %c0_i32 = arith.constant 0 : i32
    %c0_i32_0 = arith.constant 0 : i32
    %c0_i32_1 = arith.constant 0 : i32
    return %c0_i32, %c0_i32_0 : i32, i32
  }
  func.func @transform_17(%arg0: i32) -> (i32, i32, i32) {
    %c0_i32 = arith.constant 0 : i32
    %c0_i32_0 = arith.constant 0 : i32
    %c0_i32_1 = arith.constant 0 : i32
    return %arg0, %c0_i32, %c0_i32_0 : i32, i32, i32
  }
  func.func @transform_18(%arg0: i32) -> (i32, i32, i32, i32) {
    %c0_i32 = arith.constant 0 : i32
    %c0_i32_0 = arith.constant 0 : i32
    %c0_i32_1 = arith.constant 0 : i32
    %c0_i32_2 = arith.constant 0 : i32
    return %arg0, %c0_i32, %c0_i32_0, %c0_i32_1 : i32, i32, i32, i32
  }
}

module attributes {stable_mosaic.version = 11 : i64} {
  func.func @encoder_layer_kernel(%arg0: i32, %arg1: memref<2x8x32xf32, #tpu.memory_space<vmem>>, %arg2: memref<32x32xbf16, #tpu.memory_space<vmem>>, %arg3: memref<1x32xf32, #tpu.memory_space<vmem>>, %arg4: memref<32x32xbf16, #tpu.memory_space<vmem>>, %arg5: memref<1x32xf32, #tpu.memory_space<vmem>>, %arg6: memref<32x32xbf16, #tpu.memory_space<vmem>>, %arg7: memref<1x32xf32, #tpu.memory_space<vmem>>, %arg8: memref<32x32xbf16, #tpu.memory_space<vmem>>, %arg9: memref<1x32xf32, #tpu.memory_space<vmem>>, %arg10: memref<1x32xf32, #tpu.memory_space<vmem>>, %arg11: memref<1x32xf32, #tpu.memory_space<vmem>>, %arg12: memref<32x64xbf16, #tpu.memory_space<vmem>>, %arg13: memref<1x64xf32, #tpu.memory_space<vmem>>, %arg14: memref<64x32xbf16, #tpu.memory_space<vmem>>, %arg15: memref<1x32xf32, #tpu.memory_space<vmem>>, %arg16: memref<1x32xf32, #tpu.memory_space<vmem>>, %arg17: memref<1x32xf32, #tpu.memory_space<vmem>>, %arg18: memref<2x8x32xf32, #tpu.memory_space<vmem>>, %arg19: memref<2x4x8x8xf32, #tpu.memory_space<vmem>>) attributes {dimension_semantics = [#tpu.dimension_semantics<parallel>], iteration_bounds = array<i64: 1>, scalar_prefetch = 0 : i64, scratch_operands = 0 : i64, tpu.core_type = #tpu.core_type<tc>, window_params = [{transform_indices = @transform_0, window_bounds = array<i64: 2, 8, 32>}, {pipeline_mode = #tpu.pipeline_mode<synchronous>, transform_indices = @transform_1, window_bounds = array<i64: 32, 32>}, {pipeline_mode = #tpu.pipeline_mode<synchronous>, transform_indices = @transform_2, window_bounds = array<i64: 1, 32>}, {pipeline_mode = #tpu.pipeline_mode<synchronous>, transform_indices = @transform_3, window_bounds = array<i64: 32, 32>}, {pipeline_mode = #tpu.pipeline_mode<synchronous>, transform_indices = @transform_4, window_bounds = array<i64: 1, 32>}, {pipeline_mode = #tpu.pipeline_mode<synchronous>, transform_indices = @transform_5, window_bounds = array<i64: 32, 32>}, {pipeline_mode = #tpu.pipeline_mode<synchronous>, transform_indices = @transform_6, window_bounds = array<i64: 1, 32>}, {pipeline_mode = #tpu.pipeline_mode<synchronous>, transform_indices = @transform_7, window_bounds = array<i64: 32, 32>}, {pipeline_mode = #tpu.pipeline_mode<synchronous>, transform_indices = @transform_8, window_bounds = array<i64: 1, 32>}, {pipeline_mode = #tpu.pipeline_mode<synchronous>, transform_indices = @transform_9, window_bounds = array<i64: 1, 32>}, {pipeline_mode = #tpu.pipeline_mode<synchronous>, transform_indices = @transform_10, window_bounds = array<i64: 1, 32>}, {pipeline_mode = #tpu.pipeline_mode<synchronous>, transform_indices = @transform_11, window_bounds = array<i64: 32, 64>}, {pipeline_mode = #tpu.pipeline_mode<synchronous>, transform_indices = @transform_12, window_bounds = array<i64: 1, 64>}, {pipeline_mode = #tpu.pipeline_mode<synchronous>, transform_indices = @transform_13, window_bounds = array<i64: 64, 32>}, {pipeline_mode = #tpu.pipeline_mode<synchronous>, transform_indices = @transform_14, window_bounds = array<i64: 1, 32>}, {pipeline_mode = #tpu.pipeline_mode<synchronous>, transform_indices = @transform_15, window_bounds = array<i64: 1, 32>}, {pipeline_mode = #tpu.pipeline_mode<synchronous>, transform_indices = @transform_16, window_bounds = array<i64: 1, 32>}, {transform_indices = @transform_17, window_bounds = array<i64: 2, 8, 32>}, {transform_indices = @transform_18, window_bounds = array<i64: 2, 4, 8, 8>}]} {
    %c0 = arith.constant 0 : index
    %c0_0 = arith.constant 0 : index
    %c0_1 = arith.constant 0 : index
    %0 = vector.load %arg1[%c0, %c0_0, %c0_1] : memref<2x8x32xf32, #tpu.memory_space<vmem>>, vector<2x8x32xf32>
    %1 = vector.shape_cast %0 : vector<2x8x32xf32> to vector<16x32xf32>
    %2 = arith.truncf %1 : vector<16x32xf32> to vector<16x32xbf16>
    %c0_2 = arith.constant 0 : index
    %c0_3 = arith.constant 0 : index
    %3 = vector.load %arg2[%c0_2, %c0_3] : memref<32x32xbf16, #tpu.memory_space<vmem>>, vector<32x32xbf16>
    %cst = arith.constant dense<0.000000e+00> : vector<16x32xf32>
    %4 = tpu.matmul %2, %3, %cst {dimension_numbers = #tpu.dot_dimension_numbers<[1], [0], [0], [1], [0, 0, 1, 1], [], []>} : vector<16x32xbf16>, vector<32x32xbf16>, vector<16x32xf32> -> vector<16x32xf32>
    %c0_4 = arith.constant 0 : index
    %c0_5 = arith.constant 0 : index
    %5 = vector.load %arg3[%c0_4, %c0_5] : memref<1x32xf32, #tpu.memory_space<vmem>>, vector<1x32xf32>
    %6 = vector.broadcast %5 : vector<1x32xf32> to vector<16x32xf32>
    %7 = arith.addf %4, %6 : vector<16x32xf32>
    %c0_6 = arith.constant 0 : index
    %c0_7 = arith.constant 0 : index
    %8 = vector.load %arg4[%c0_6, %c0_7] : memref<32x32xbf16, #tpu.memory_space<vmem>>, vector<32x32xbf16>
    %cst_8 = arith.constant dense<0.000000e+00> : vector<16x32xf32>
    %9 = tpu.matmul %2, %8, %cst_8 {dimension_numbers = #tpu.dot_dimension_numbers<[1], [0], [0], [1], [0, 0, 1, 1], [], []>} : vector<16x32xbf16>, vector<32x32xbf16>, vector<16x32xf32> -> vector<16x32xf32>
    %c0_9 = arith.constant 0 : index
    %c0_10 = arith.constant 0 : index
    %10 = vector.load %arg5[%c0_9, %c0_10] : memref<1x32xf32, #tpu.memory_space<vmem>>, vector<1x32xf32>
    %11 = vector.broadcast %10 : vector<1x32xf32> to vector<16x32xf32>
    %12 = arith.addf %9, %11 : vector<16x32xf32>
    %c0_11 = arith.constant 0 : index
    %c0_12 = arith.constant 0 : index
    %13 = vector.load %arg6[%c0_11, %c0_12] : memref<32x32xbf16, #tpu.memory_space<vmem>>, vector<32x32xbf16>
    %cst_13 = arith.constant dense<0.000000e+00> : vector<16x32xf32>
    %14 = tpu.matmul %2, %13, %cst_13 {dimension_numbers = #tpu.dot_dimension_numbers<[1], [0], [0], [1], [0, 0, 1, 1], [], []>} : vector<16x32xbf16>, vector<32x32xbf16>, vector<16x32xf32> -> vector<16x32xf32>
    %c0_14 = arith.constant 0 : index
    %c0_15 = arith.constant 0 : index
    %15 = vector.load %arg7[%c0_14, %c0_15] : memref<1x32xf32, #tpu.memory_space<vmem>>, vector<1x32xf32>
    %16 = vector.broadcast %15 : vector<1x32xf32> to vector<16x32xf32>
    %17 = arith.addf %14, %16 : vector<16x32xf32>
    %cst_16 = arith.constant 0.353553385 : f32
    %18 = vector.broadcast %cst_16 : f32 to vector<16x32xf32>
    %19 = arith.mulf %7, %18 : vector<16x32xf32>
    %20 = vector.shape_cast %19 : vector<16x32xf32> to vector<2x8x4x8xf32>
    %21 = tpu.transpose %20, [0, 2, 1, 3] : vector<2x8x4x8xf32> -> vector<2x4x8x8xf32>
    %22 = vector.shape_cast %21 : vector<2x4x8x8xf32> to vector<8x8x8xf32>
    %23 = arith.truncf %22 : vector<8x8x8xf32> to vector<8x8x8xbf16>
    %24 = vector.shape_cast %12 : vector<16x32xf32> to vector<2x8x4x8xf32>
    %25 = tpu.transpose %24, [0, 2, 1, 3] : vector<2x8x4x8xf32> -> vector<2x4x8x8xf32>
    %26 = vector.shape_cast %25 : vector<2x4x8x8xf32> to vector<8x8x8xf32>
    %27 = arith.truncf %26 : vector<8x8x8xf32> to vector<8x8x8xbf16>
    %28 = vector.shape_cast %17 : vector<16x32xf32> to vector<2x8x4x8xf32>
    %29 = tpu.transpose %28, [0, 2, 1, 3] : vector<2x8x4x8xf32> -> vector<2x4x8x8xf32>
    %30 = vector.shape_cast %29 : vector<2x4x8x8xf32> to vector<8x8x8xf32>
    %31 = arith.truncf %30 : vector<8x8x8xf32> to vector<8x8x8xbf16>
    "tpu.trace_start"() <{level = 10 : i32, message = "bqd,bkd->bqk"}> : () -> ()
    %cst_17 = arith.constant dense<0.000000e+00> : vector<8x8x8xf32>
    %32 = tpu.matmul %23, %27, %cst_17 {dimension_numbers = #tpu.dot_dimension_numbers<[2], [2], [1], [1], [0, 0, 0, 1, 1, 1], [0], [0]>} : vector<8x8x8xbf16>, vector<8x8x8xbf16>, vector<8x8x8xf32> -> vector<8x8x8xf32>
    "tpu.trace_stop"() : () -> ()
    %33 = vector.shape_cast %32 : vector<8x8x8xf32> to vector<2x4x8x8xf32>
    %cst_18 = arith.constant dense<0xFF800000> : vector<2x4x8xf32>
    %34 = vector.multi_reduction <maximumf>, %33, %cst_18 [3] : vector<2x4x8x8xf32> to vector<2x4x8xf32>
    %35 = vector.shape_cast %34 : vector<2x4x8xf32> to vector<2x4x8x1xf32>
    %36 = vector.broadcast %35 : vector<2x4x8x1xf32> to vector<2x4x8x8xf32>
    %37 = arith.subf %33, %36 : vector<2x4x8x8xf32>
    %38 = math.exp %37 : vector<2x4x8x8xf32>
    %cst_19 = arith.constant dense<0.000000e+00> : vector<2x4x8xf32>
    %39 = vector.multi_reduction <add>, %38, %cst_19 [3] : vector<2x4x8x8xf32> to vector<2x4x8xf32>
    %40 = vector.shape_cast %39 : vector<2x4x8xf32> to vector<2x4x8x1xf32>
    %cst_20 = arith.constant 1.000000e+00 : f32
    %41 = vector.broadcast %cst_20 : f32 to vector<2x4x8x1xf32>
    %42 = arith.divf %41, %40 : vector<2x4x8x1xf32>
    %43 = vector.broadcast %42 : vector<2x4x8x1xf32> to vector<2x4x8x8xf32>
    %44 = arith.mulf %38, %43 : vector<2x4x8x8xf32>
    %c0_21 = arith.constant 0 : index
    %c0_22 = arith.constant 0 : index
    %c0_23 = arith.constant 0 : index
    %c0_24 = arith.constant 0 : index
    %45 = vector.load %arg19[%c0_21, %c0_22, %c0_23, %c0_24] : memref<2x4x8x8xf32, #tpu.memory_space<vmem>>, vector<2x4x8x8xf32>
    tpu.vector_store %arg19[%c0_21, %c0_22, %c0_23, %c0_24], %44 {strides = array<i32>} : memref<2x4x8x8xf32, #tpu.memory_space<vmem>>, vector<2x4x8x8xf32>,
    %46 = vector.shape_cast %44 : vector<2x4x8x8xf32> to vector<8x8x8xf32>
    %47 = arith.truncf %46 : vector<8x8x8xf32> to vector<8x8x8xbf16>
    "tpu.trace_start"() <{level = 10 : i32, message = "bqk,bkd->bqd"}> : () -> ()
    %cst_25 = arith.constant dense<0.000000e+00> : vector<8x8x8xf32>
    %48 = tpu.matmul %47, %31, %cst_25 {dimension_numbers = #tpu.dot_dimension_numbers<[2], [1], [1], [2], [0, 0, 0, 1, 1, 2], [0], [0]>} : vector<8x8x8xbf16>, vector<8x8x8xbf16>, vector<8x8x8xf32> -> vector<8x8x8xf32>
    "tpu.trace_stop"() : () -> ()
    %49 = vector.shape_cast %48 : vector<8x8x8xf32> to vector<2x4x8x8xf32>
    %50 = tpu.transpose %49, [0, 2, 1, 3] : vector<2x4x8x8xf32> -> vector<2x8x4x8xf32>
    %51 = vector.shape_cast %50 : vector<2x8x4x8xf32> to vector<16x32xf32>
    %52 = arith.truncf %51 : vector<16x32xf32> to vector<16x32xbf16>
    %c0_26 = arith.constant 0 : index
    %c0_27 = arith.constant 0 : index
    %53 = vector.load %arg8[%c0_26, %c0_27] : memref<32x32xbf16, #tpu.memory_space<vmem>>, vector<32x32xbf16>
    %cst_28 = arith.constant dense<0.000000e+00> : vector<16x32xf32>
    %54 = tpu.matmul %52, %53, %cst_28 {dimension_numbers = #tpu.dot_dimension_numbers<[1], [0], [0], [1], [0, 0, 1, 1], [], []>} : vector<16x32xbf16>, vector<32x32xbf16>, vector<16x32xf32> -> vector<16x32xf32>
    %c0_29 = arith.constant 0 : index
    %c0_30 = arith.constant 0 : index
    %55 = vector.load %arg9[%c0_29, %c0_30] : memref<1x32xf32, #tpu.memory_space<vmem>>, vector<1x32xf32>
    %56 = vector.broadcast %55 : vector<1x32xf32> to vector<16x32xf32>
    %57 = arith.addf %54, %56 : vector<16x32xf32>
    %58 = arith.addf %1, %57 : vector<16x32xf32>
    %c0_31 = arith.constant 0 : index
    %c0_32 = arith.constant 0 : index
    %59 = vector.load %arg10[%c0_31, %c0_32] : memref<1x32xf32, #tpu.memory_space<vmem>>, vector<1x32xf32>
    %c0_33 = arith.constant 0 : index
    %c0_34 = arith.constant 0 : index
    %60 = vector.load %arg11[%c0_33, %c0_34] : memref<1x32xf32, #tpu.memory_space<vmem>>, vector<1x32xf32>
    %cst_35 = arith.constant dense<0.000000e+00> : vector<16xf32>
    %61 = vector.multi_reduction <add>, %58, %cst_35 [1] : vector<16x32xf32> to vector<16xf32>
    %62 = vector.shape_cast %61 : vector<16xf32> to vector<16x1xf32>
    %cst_36 = arith.constant 3.200000e+01 : f32
    %63 = vector.broadcast %cst_36 : f32 to vector<16x1xf32>
    %64 = arith.divf %62, %63 : vector<16x1xf32>
    %65 = vector.broadcast %64 : vector<16x1xf32> to vector<16x32xf32>
    %66 = arith.subf %58, %65 : vector<16x32xf32>
    %67 = arith.mulf %66, %66 : vector<16x32xf32>
    %cst_37 = arith.constant dense<0.000000e+00> : vector<16xf32>
    %68 = vector.multi_reduction <add>, %67, %cst_37 [1] : vector<16x32xf32> to vector<16xf32>
    %69 = vector.shape_cast %68 : vector<16xf32> to vector<16x1xf32>
    %cst_38 = arith.constant 3.200000e+01 : f32
    %70 = vector.broadcast %cst_38 : f32 to vector<16x1xf32>
    %71 = arith.divf %69, %70 : vector<16x1xf32>
    %72 = vector.broadcast %64 : vector<16x1xf32> to vector<16x32xf32>
    %73 = arith.subf %58, %72 : vector<16x32xf32>
    %cst_39 = arith.constant 9.99999974E-6 : f32
    %74 = vector.broadcast %cst_39 : f32 to vector<16x1xf32>
    %75 = arith.addf %71, %74 : vector<16x1xf32>
    %76 = math.rsqrt %75 : vector<16x1xf32>
    %77 = vector.broadcast %76 : vector<16x1xf32> to vector<16x32xf32>
    %78 = arith.mulf %73, %77 : vector<16x32xf32>
    %79 = vector.broadcast %59 : vector<1x32xf32> to vector<16x32xf32>
    %80 = arith.mulf %78, %79 : vector<16x32xf32>
    %81 = vector.broadcast %60 : vector<1x32xf32> to vector<16x32xf32>
    %82 = arith.addf %80, %81 : vector<16x32xf32>
    %83 = arith.truncf %82 : vector<16x32xf32> to vector<16x32xbf16>
    %c0_40 = arith.constant 0 : index
    %c0_41 = arith.constant 0 : index
    %84 = vector.load %arg12[%c0_40, %c0_41] : memref<32x64xbf16, #tpu.memory_space<vmem>>, vector<32x64xbf16>
    %cst_42 = arith.constant dense<0.000000e+00> : vector<16x64xf32>
    %85 = tpu.matmul %83, %84, %cst_42 {dimension_numbers = #tpu.dot_dimension_numbers<[1], [0], [0], [1], [0, 0, 1, 1], [], []>} : vector<16x32xbf16>, vector<32x64xbf16>, vector<16x64xf32> -> vector<16x64xf32>
    %c0_43 = arith.constant 0 : index
    %c0_44 = arith.constant 0 : index
    %86 = vector.load %arg13[%c0_43, %c0_44] : memref<1x64xf32, #tpu.memory_space<vmem>>, vector<1x64xf32>
    %87 = vector.broadcast %86 : vector<1x64xf32> to vector<16x64xf32>
    %88 = arith.addf %85, %87 : vector<16x64xf32>
    %cst_45 = arith.constant 0.000000e+00 : f32
    %89 = vector.broadcast %cst_45 : f32 to vector<16x64xf32>
    %90 = arith.maximumf %88, %89 : vector<16x64xf32>
    %91 = arith.truncf %90 : vector<16x64xf32> to vector<16x64xbf16>
    %c0_46 = arith.constant 0 : index
    %c0_47 = arith.constant 0 : index
    %92 = vector.load %arg14[%c0_46, %c0_47] : memref<64x32xbf16, #tpu.memory_space<vmem>>, vector<64x32xbf16>
    %cst_48 = arith.constant dense<0.000000e+00> : vector<16x32xf32>
    %93 = tpu.matmul %91, %92, %cst_48 {dimension_numbers = #tpu.dot_dimension_numbers<[1], [0], [0], [1], [0, 0, 1, 1], [], []>} : vector<16x64xbf16>, vector<64x32xbf16>, vector<16x32xf32> -> vector<16x32xf32>
    %c0_49 = arith.constant 0 : index
    %c0_50 = arith.constant 0 : index
    %94 = vector.load %arg15[%c0_49, %c0_50] : memref<1x32xf32, #tpu.memory_space<vmem>>, vector<1x32xf32>
    %95 = vector.broadcast %94 : vector<1x32xf32> to vector<16x32xf32>
    %96 = arith.addf %93, %95 : vector<16x32xf32>
    %97 = arith.addf %82, %96 : vector<16x32xf32>
    %c0_51 = arith.constant 0 : index
    %c0_52 = arith.constant 0 : index
    %98 = vector.load %arg16[%c0_51, %c0_52] : memref<1x32xf32, #tpu.memory_space<vmem>>, vector<1x32xf32>
    %c0_53 = arith.constant 0 : index
    %c0_54 = arith.constant 0 : index
    %99 = vector.load %arg17[%c0_53, %c0_54] : memref<1x32xf32, #tpu.memory_space<vmem>>, vector<1x32xf32>
    %cst_55 = arith.constant dense<0.000000e+00> : vector<16xf32>
    %100 = vector.multi_reduction <add>, %97, %cst_55 [1] : vector<16x32xf32> to vector<16xf32>
    %101 = vector.shape_cast %100 : vector<16xf32> to vector<16x1xf32>
    %cst_56 = arith.constant 3.200000e+01 : f32
    %102 = vector.broadcast %cst_56 : f32 to vector<16x1xf32>
    %103 = arith.divf %101, %102 : vector<16x1xf32>
    %104 = vector.broadcast %103 : vector<16x1xf32> to vector<16x32xf32>
    %105 = arith.subf %97, %104 : vector<16x32xf32>
    %106 = arith.mulf %105, %105 : vector<16x32xf32>
    %cst_57 = arith.constant dense<0.000000e+00> : vector<16xf32>
    %107 = vector.multi_reduction <add>, %106, %cst_57 [1] : vector<16x32xf32> to vector<16xf32>
    %108 = vector.shape_cast %107 : vector<16xf32> to vector<16x1xf32>
    %cst_58 = arith.constant 3.200000e+01 : f32
    %109 = vector.broadcast %cst_58 : f32 to vector<16x1xf32>
    %110 = arith.divf %108, %109 : vector<16x1xf32>
    %111 = vector.broadcast %103 : vector<16x1xf32> to vector<16x32xf32>
    %112 = arith.subf %97, %111 : vector<16x32xf32>
    %cst_59 = arith.constant 9.99999974E-6 : f32
    %113 = vector.broadcast %cst_59 : f32 to vector<16x1xf32>
    %114 = arith.addf %110, %113 : vector<16x1xf32>
    %115 = math.rsqrt %114 : vector<16x1xf32>
    %116 = vector.broadcast %115 : vector<16x1xf32> to vector<16x32xf32>
    %117 = arith.mulf %112, %116 : vector<16x32xf32>
    %118 = vector.broadcast %98 : vector<1x32xf32> to vector<16x32xf32>
    %119 = arith.mulf %117, %118 : vector<16x32xf32>
    %120 = vector.broadcast %99 : vector<1x32xf32> to vector<16x32xf32>
    %121 = arith.addf %119, %120 : vector<16x32xf32>
    %122 = vector.shape_cast %121 : vector<16x32xf32> to vector<2x8x32xf32>
    %c0_60 = arith.constant 0 : index
    %c0_61 = arith.constant 0 : index
    %c0_62 = arith.constant 0 : index
    %123 = vector.load %arg18[%c0_60, %c0_61, %c0_62] : memref<2x8x32xf32, #tpu.memory_space<vmem>>, vector<2x8x32xf32>
    tpu.vector_store %arg18[%c0_60, %c0_61, %c0_62], %122 {strides = array<i32>} : memref<2x8x32xf32, #tpu.memory_space<vmem>>, vector<2x8x32xf32>,
    return
  }
  func.func @transform_0(%arg0: i32) -> (i32, i32, i32) {
    %c0_i32 = arith.constant 0 : i32
    %c0_i32_0 = arith.constant 0 : i32
    %c0_i32_1 = arith.constant 0 : i32
    return %arg0, %c0_i32, %c0_i32_0 : i32, i32, i32
  }
  func.func @transform_1(%arg0: i32) -> (i32, i32) {
    %c0_i32 = arith.constant 0 : i32
    %c0_i32_0 = arith.constant 0 : i32
    %c0_i32_1 = arith.constant 0 : i32
    return %c0_i32, %c0_i32_0 : i32, i32
  }
  func.func @transform_2(%arg0: i32) -> (i32, i32) {
    %c0_i32 = arith.constant 0 : i32
    %c0_i32_0 = arith.constant 0 : i32
    %c0_i32_1 = arith.constant 0 : i32
    return %c0_i32, %c0_i32_0 : i32, i32
  }
  func.func @transform_3(%arg0: i32) -> (i32, i32) {
    %c0_i32 = arith.constant 0 : i32
    %c0_i32_0 = arith.constant 0 : i32
    %c0_i32_1 = arith.constant 0 : i32
    return %c0_i32, %c0_i32_0 : i32, i32
  }
  func.func @transform_4(%arg0: i32) -> (i32, i32) {
    %c0_i32 = arith.constant 0 : i32
    %c0_i32_0 = arith.constant 0 : i32
    %c0_i32_1 = arith.constant 0 : i32
    return %c0_i32, %c0_i32_0 : i32, i32
  }
  func.func @transform_5(%arg0: i32) -> (i32, i32) {
    %c0_i32 = arith.constant 0 : i32
    %c0_i32_0 = arith.constant 0 : i32
    %c0_i32_1 = arith.constant 0 : i32
    return %c0_i32, %c0_i32_0 : i32, i32
  }
  func.func @transform_6(%arg0: i32) -> (i32, i32) {
    %c0_i32 = arith.constant 0 : i32
    %c0_i32_0 = arith.constant 0 : i32
    %c0_i32_1 = arith.constant 0 : i32
    return %c0_i32, %c0_i32_0 : i32, i32
  }
  func.func @transform_7(%arg0: i32) -> (i32, i32) {
    %c0_i32 = arith.constant 0 : i32
    %c0_i32_0 = arith.constant 0 : i32
    %c0_i32_1 = arith.constant 0 : i32
    return %c0_i32, %c0_i32_0 : i32, i32
  }
  func.func @transform_8(%arg0: i32) -> (i32, i32) {
    %c0_i32 = arith.constant 0 : i32
    %c0_i32_0 = arith.constant 0 : i32
    %c0_i32_1 = arith.constant 0 : i32
    return %c0_i32, %c0_i32_0 : i32, i32
  }
  func.func @transform_9(%arg0: i32) -> (i32, i32) {
    %c0_i32 = arith.constant 0 : i32
    %c0_i32_0 = arith.constant 0 : i32
    %c0_i32_1 = arith.constant 0 : i32
    return %c0_i32, %c0_i32_0 : i32, i32
  }
  func.func @transform_10(%arg0: i32) -> (i32, i32) {
    %c0_i32 = arith.constant 0 : i32
    %c0_i32_0 = arith.constant 0 : i32
    %c0_i32_1 = arith.constant 0 : i32
    return %c0_i32, %c0_i32_0 : i32, i32
  }
  func.func @transform_11(%arg0: i32) -> (i32, i32) {
    %c0_i32 = arith.constant 0 : i32
    %c0_i32_0 = arith.constant 0 : i32
    %c0_i32_1 = arith.constant 0 : i32
    return %c0_i32, %c0_i32_0 : i32, i32
  }
  func.func @transform_12(%arg0: i32) -> (i32, i32) {
    %c0_i32 = arith.constant 0 : i32
    %c0_i32_0 = arith.constant 0 : i32
    %c0_i32_1 = arith.constant 0 : i32
    return %c0_i32, %c0_i32_0 : i32, i32
  }
  func.func @transform_13(%arg0: i32) -> (i32, i32) {
    %c0_i32 = arith.constant 0 : i32
    %c0_i32_0 = arith.constant 0 : i32
    %c0_i32_1 = arith.constant 0 : i32
    return %c0_i32, %c0_i32_0 : i32, i32
  }
  func.func @transform_14(%arg0: i32) -> (i32, i32) {
    %c0_i32 = arith.constant 0 : i32
    %c0_i32_0 = arith.constant 0 : i32
    %c0_i32_1 = arith.constant 0 : i32
    return %c0_i32, %c0_i32_0 : i32, i32
  }
  func.func @transform_15(%arg0: i32) -> (i32, i32) {
    %c0_i32 = arith.constant 0 : i32
    %c0_i32_0 = arith.constant 0 : i32
    %c0_i32_1 = arith.constant 0 : i32
    return %c0_i32, %c0_i32_0 : i32, i32
  }
  func.func @transform_16(%arg0: i32) -> (i32, i32) {
    %c0_i32 = arith.constant 0 : i32
    %c0_i32_0 = arith.constant 0 : i32
    %c0_i32_1 = arith.constant 0 : i32
    return %c0_i32, %c0_i32_0 : i32, i32
  }
  func.func @transform_17(%arg0: i32) -> (i32, i32, i32) {
    %c0_i32 = arith.constant 0 : i32
    %c0_i32_0 = arith.constant 0 : i32
    %c0_i32_1 = arith.constant 0 : i32
    return %arg0, %c0_i32, %c0_i32_0 : i32, i32, i32
  }
  func.func @transform_18(%arg0: i32) -> (i32, i32, i32, i32) {
    %c0_i32 = arith.constant 0 : i32
    %c0_i32_0 = arith.constant 0 : i32
    %c0_i32_1 = arith.constant 0 : i32
    %c0_i32_2 = arith.constant 0 : i32
    return %arg0, %c0_i32, %c0_i32_0, %c0_i32_1 : i32, i32, i32, i32
  }
}

</mosaic_0001>

<bundles_post_ra>
// kernel: tpu_custom_call.1
= control target key start
LH: loop header
LB: loop body
LE: loop exit
PB: predicated region body
PF: predicated region fallthrough
CT: control target
= control target key end

     0   :  { %s3154_s0 = inlined_call_operand.vmem [shape: f32[2,8,32], index: 0, kind: input, shape index: {}]   ;;  %s3155_s1 = inlined_call_operand.vmem [shape: bf16[32,32], index: 1, kind: input, shape index: {}]   ;;  %s3156_s2 = inlined_call_operand.vmem [shape: f32[1,32], index: 2, kind: input, shape index: {}]   ;;  %s3157_s3 = inlined_call_operand.vmem [shape: bf16[32,32], index: 3, kind: input, shape index: {}]   ;;  %s3158_s4 = inlined_call_operand.vmem [shape: f32[1,32], index: 4, kind: input, shape index: {}]   ;;  %s3159_s5 = inlined_call_operand.hbm [shape: bf16[32,32], index: 5, kind: input, shape index: {}]   ;;  %s3160_s6 = inlined_call_operand.vmem [shape: f32[1,32], index: 6, kind: input, shape index: {}]   ;;  %s3161_s7 = inlined_call_operand.hbm [shape: bf16[32,32], index: 7, kind: input, shape index: {}]   ;;  %s3162_s8 = inlined_call_operand.vmem [shape: f32[1,32], index: 8, kind: input, shape index: {}]   ;;  %s3163_s9 = inlined_call_operand.vmem [shape: f32[1,32], index: 9, kind: input, shape index: {}]   ;;  %s3164_s10 = inlined_call_operand.vmem [shape: f32[1,32], index: 10, kind: input, shape index: {}]   ;;  %s3165_s11 = inlined_call_operand.hbm [shape: bf16[32,64], index: 11, kind: input, shape index: {}]   ;;  %s3166_s12 = inlined_call_operand.vmem [shape: f32[1,64], index: 12, kind: input, shape index: {}]   ;;  %s3167_s13 = inlined_call_operand.vmem [shape: bf16[64,32], index: 13, kind: input, shape index: {}]   ;;  %s3168_s14 = inlined_call_operand.vmem [shape: f32[1,32], index: 14, kind: input, shape index: {}]   ;;  %s3169_s15 = inlined_call_operand.vmem [shape: f32[1,32], index: 15, kind: input, shape index: {}]   ;;  %s3170_s16 = inlined_call_operand.vmem [shape: f32[1,32], index: 16, kind: input, shape index: {}]   ;;  %s3171_s17 = inlined_call_operand.hbm [shape: f32[2,8,32], index: 17, kind: output, shape index: {0}]   ;;  %s3172_s18 = inlined_call_operand.hbm [shape: f32[2,4,8,8], index: 18, kind: output, shape index: {1}]  }
   0x1   :  { %3175 = sst [smem:[#allocation15_spill]] %s3154_s0 }
   0x2   :  { %3176 = sst [smem:[#allocation16_spill]] %s3155_s1 }
   0x3   :  { %3177 = sst [smem:[#allocation17_spill]] %s3156_s2 }
   0x4   :  { %24 = vsyncpa [#allocation3], 0 }
   0x5   :  { %25 = vsyncpa [#allocation6], 0 }
   0x6   :  { %26 = vsyncpa [#allocation4], 0 }
   0x7   :  { %27 = vsyncpa [#allocation10], 0  ;;  %s57_s29 = sshll.u32 %s3161_s7, 4  ;;  %s2360_s30 = smov [#allocation5]   ;;  %s58_s29 = int_to_ptr.hbm [resolvable:$true] %s57_s29 }
   0x8   :  { %s59_s0 = sshll.u32 %s2360_s30, 4  ;;  %s42_s20 = sshll.u32 %s3159_s5, 4  ;;  %s60_s0 = int_to_ptr.vmem [resolvable:$true] %s59_s0  ;;  %s43_s20 = int_to_ptr.hbm [resolvable:$true] %s42_s20 }
   0x9   :  { %s2361_s21 = smov 64   ;;  %s2362_s22 = smov 4  }
   0xa   :  { %65 = dma.hbm_to_vmem [thread:$0]  %s58_s29, 256, %s60_s0, [#allocation6], %s2361_s21, %s2361_s21, %s2362_s22  }
   0xb   :  { %s2363_s2 = smov [#allocation2]   ;;  %s76_s26 = sshll.u32 %s3165_s11, 4  ;;  %s77_s26 = int_to_ptr.hbm [resolvable:$true] %s76_s26 }
   0xc   :  { %s44_s23 = sshll.u32 %s2363_s2, 4  ;;  %s2364_s7 = smov [#allocation7]   ;;  %s45_s23 = int_to_ptr.vmem [resolvable:$true] %s44_s23 }
   0xd   :  { %50 = dma.hbm_to_vmem [thread:$0]  %s43_s20, 256, %s45_s23, [#allocation3], %s2361_s21, %s2361_s21, %s2362_s22  }
   0xe   :  { %s78_s27 = sshll.u32 %s2364_s7, 4  ;;  %s79_s27 = int_to_ptr.vmem [resolvable:$true] %s78_s27 }
   0xf   :  { %84 = dma.hbm_to_vmem [thread:$0]  %s77_s26, 256, %s79_s27, [#allocation6], %s2361_s21, %s2361_s21, %s2362_s22  }
  0x10   :  { %2352 = dma.done.wait [#allocation3], 256  }
  0x11   :  { %2353 = vsyncadd [#allocation3], 4294967040 }
  0x12   :  { %2354 = dma.done.wait [#allocation6], 512  }
  0x13   :  { %2355 = vsyncadd [#allocation6], 4294966784  ;;  %s3178_s29 = sld [smem:[#allocation16_spill]]  ;;  %v2115_v1 = vld [vmem:[%s3157_s3 + $0x8] sm:$0xff]  ;;  %v2114_v3 = vld [vmem:[%s3157_s3] sm:$0xff]  ;;  %vm131_vm0 = vcmask 261120  }
  0x14   :  { %s3179_s2 = sld [smem:[#allocation15_spill]]  ;;  %175 = vmatpush.bf16.msra.mxu1 %v2115_v1  ;;  %v2179_v8 = vld [vmem:[%s3158_s4] ss:$0 sm:$0xff]  ;;  %s2365_s5 = smov 104   ;;  %v2117_v21 = vld [vmem:[#allocation2 + $0x8] sm:$0xff]  ;;  %vm240_vm1 = vcmask 1047556  }
  0x15   :  { %s3180_s26 = sld [smem:[#allocation17_spill]]  ;;  %s2366_s28 = smov 120   ;;  %209 = vmatpush.bf16.msra.mxu2 %v2117_v21  ;;  %v2368_v24 = vmov 1983009808   ;;  %v2116_v26 = vld [vmem:[#allocation2] sm:$0xff]  ;;  %vm964_vm2 = vcmask 64512  }
  0x16   :  { %s2367_s4 = smov 112   ;;  %v245_v25 = vunpack.c.l.s4 %v2368_v24  ;;  %v2369_v33 = vmov 1934713408   ;;  %vm1336_vm3 = vcmask 1043456   ;;  %s2371_s0 = smov 16  }
  0x17   :  { %v269_v34 = vunpack.c.l.s4 %v2369_v33  ;;  %s2372_s11 = smov 8   ;;  %s2375_s1 = smov 128  }
  0x18   :  { %176 = vmatpush.bf16.msra.mxu1 %v2114_v3  ;;  %v2535_v27 = vunpack.c.0.s8 %v245_v25  ;;  %s2002_s24 = sshll.u32 %s3171_s17, 4  ;;  %s2003_s24 = int_to_ptr.hbm [resolvable:$true] %s2002_s24 }
  0x19   :  { %v2113_v0 = vld [vmem:[%s3178_s29 + $0x8] sm:$0xff]  ;;  %v2112_v2 = vld [vmem:[%s3178_s29] sm:$0xff]  ;;  %210 = vmatpush.bf16.msra.mxu2 %v2116_v26  ;;  %v2551_v52 = vunpack.c.0.s8 %v269_v34 }
  0x1a   :  { %v108_v4 = vld [vmem:[%s3179_s2] sm:$0xff]  ;;  %141 = vmatpush.bf16.msra.mxu0 %v2113_v0  ;;  %v109_v5 = vld [vmem:[%s3179_s2 + $0x8] sm:$0xff] }
  0x1b   :  { %v110_v6 = vpack.c.bf16 %v109_v5, %v108_v4  ;;  %v2178_v7 = vld [vmem:[%s3180_s26] ss:$0 sm:$0xff] }
  0x1d   :  { %2051 = vmatmul.msk.bf16.vlgmr.msra.gmra.mxu1 %vm131_vm0, %v110_v6  ;;  %2060 = vmatmul.msk.bf16.vlgmr.msra.gmra.mxu2 %vm131_vm0, %v110_v6 }
  0x1e   :  { %142 = vmatpush.bf16.msra.mxu0 %v2112_v2 }
  0x21   :  { %2042 = vmatmul.msk.bf16.vlgmr.msra.gmra.mxu0 %vm131_vm0, %v110_v6 }
  0x9a   :  { %v178_v10 = vpop.f32.mrf.mxu1 }
  0x9b   :  { %v2507_v12 = vadd.f32 %v2179_v8, %v178_v10 }
  0x9d   :  { %482 = vrot.lane.b32.xlu1 %v2507_v12, %s2365_s5  ;;  %v490_v44 = vrot.slane %v2507_v12, 4 }
  0x9e   :  { %v144_v9 = vpop.f32.mrf.mxu0 }
  0x9f   :  { %v145_v11 = vadd.f32 %v2178_v7, %v144_v9 }
  0xa1   :  { %v217_v13 = vmul.f32 0.35355338, %v145_v11 }
  0xa2   :  { %v180_v15 = vpop.f32.mrf.mxu1 }
  0xa3   :  { %233 = vrot.lane.b32.xlu2 %v217_v13, %s2365_s5  ;;  %v2143_v14 = vpack.i.bf16 %v217_v13, %v2507_v12  ;;  %v2514_v16 = vadd.f32 %v2179_v8, %v180_v15  ;;  %v242_v35 = vrot.slane %v217_v13, 4 }
  0xa5   :  { %2144 = vrot.lane.b32.xlu0 %v2143_v14, %s2366_s28  ;;  %227 = vrot.lane.b32.xlu1 %v217_v13, %s2367_s4  ;;  %v546_v45 = vrot.slane %v2514_v16, 4 }
  0xa6   :  { %v146_v17 = vpop.f32.mrf.mxu0 }
  0xa7   :  { %v147_v18 = vadd.f32 %v2178_v7, %v146_v17 }
  0xa9   :  { %v2521_v19 = vmul.f32 0.35355338, %v147_v18 }
  0xab   :  { %472 = vrot.lane.b32.xlu2 %v2514_v16, %s2366_s28  ;;  %v298_v53 = vrot.slane %v2521_v19, 4 }
  0xad   :  { %476 = vrot.lane.b32.xlu0 %v2507_v12, %s2367_s4  ;;  %484 = vrot.lane.b32.xlu1 %v2514_v16, %s2365_s5 }
  0xb3   :  { %223 = vrot.lane.b32.xlu2 %v2521_v19, %s2366_s28 }
  0xb5   :  { %478 = vrot.lane.b32.xlu0 %v2514_v16, %s2367_s4  ;;  %235 = vrot.lane.b32.xlu1 %v2521_v19, %s2365_s5 }
  0xbd   :  { %229 = vrot.lane.b32.xlu0 %v2521_v19, %s2367_s4 }
  0xfd   :  { %v234_v20 = vpop.permute.xlu2 %233 }
  0xfe   :  { %v252_v29 = vrot.slane %v234_v20, 4 }
 0x105   :  { %v2533_v22 = vpop.permute.xlu2 %472 }
 0x106   :  { %v558_v54 = vrot.slane %v2533_v22, 4 }
 0x10d   :  { %v2540_v40 = vpop.permute.xlu2 %223 }
 0x10e   :  { %v310_v55 = vrot.slane %v2540_v40, 4 }
 0x10f   :  { %v483_v23 = vpop.permute.xlu1 %482 }
 0x110   :  { %v500_v30 = vrot.slane %v483_v23, 4 }
 0x117   :  { %v2145_v28 = vpop.permute.xlu0 %2144  ;;  %v228_v43 = vpop.permute.xlu1 %227 }
 0x118   :  { %v2147_v31 = vunpack.i.h.bf16 %v2145_v28  ;;  %v2146_v32 = vunpack.i.l.bf16 %v2145_v28  ;;  %v239_v48 = vrot.slane %v228_v43, 4  ;;  %v243_v49 = vsel %vm240_vm1, %v228_v43, %v242_v35 }
 0x119   :  { %v251_v57 = vperm.slane %v243_v49, %v2535_v27 }
 0x11a   :  { %v253_v36 = vsel %vm240_vm1, %v252_v29, %v2147_v31  ;;  %v254_v37 = vrot.slane %v2147_v31, 4  ;;  %v501_v38 = vsel %vm240_vm1, %v500_v30, %v2146_v32  ;;  %v502_v39 = vrot.slane %v2146_v32, 4 }
 0x11b   :  { %v259_v41 = vperm.slane %v253_v36, %v2535_v27  ;;  %v507_v42 = vperm.slane %v501_v38, %v2535_v27  ;;  %v241_v56 = vsel %vm240_vm1, %v239_v48, %v217_v13  ;;  %v278_v0 = vrot.slane %v251_v57, 4 }
 0x11c   :  { %v255_v46 = vsel %vm240_vm1, %v234_v20, %v254_v37  ;;  %v503_v47 = vsel %vm240_vm1, %v483_v23, %v502_v39  ;;  %v247_v61 = vperm.slane %v241_v56, %v2535_v27 }
 0x11d   :  { %v263_v50 = vperm.slane %v255_v46, %v2535_v27  ;;  %v511_v51 = vperm.slane %v503_v47, %v2535_v27  ;;  %v264_v58 = vrot.slane %v259_v41, 4  ;;  %v512_v60 = vrot.slane %v507_v42, 4 }
 0x11e   :  { %v266_v4 = vrot.slane %v247_v61, 4 }
 0x11f   :  { %v276_v59 = vrot.slane %v263_v50, 4  ;;  %v477_v62 = vpop.permute.xlu0 %476  ;;  %v524_v63 = vrot.slane %v511_v51, 4  ;;  %v265_v3 = vsel %vm240_vm1, %v264_v58, %v247_v61  ;;  %v279_v8 = vsel %vm240_vm1, %v263_v50, %v278_v0  ;;  %v485_v17 = vpop.permute.xlu1 %484 }
 0x120   :  { %v488_v1 = vrot.slane %v477_v62, 4  ;;  %v491_v2 = vsel %vm240_vm1, %v477_v62, %v490_v44  ;;  %v271_v7 = vperm.slane %v265_v3, %v2551_v52  ;;  %v267_v11 = vsel %vm240_vm1, %v259_v41, %v266_v4 }
 0x121   :  { %v277_v5 = vsel %vm240_vm1, %v276_v59, %v251_v57  ;;  %v499_v6 = vperm.slane %v491_v2, %v2535_v27  ;;  %v287_v13 = vperm.slane %v279_v8, %v2551_v52  ;;  %v275_v18 = vperm.slane %v267_v11, %v2551_v52 }
 0x122   :  { %v283_v9 = vperm.slane %v277_v5, %v2551_v52  ;;  %v489_v10 = vsel %vm240_vm1, %v488_v1, %v2507_v12  ;;  %v288_v20 = vrot.slane %v271_v7, 4  ;;  %v556_v58 = vrot.slane %v485_v17, 4 }
 0x123   :  { %v495_v14 = vperm.slane %v489_v10, %v2535_v27  ;;  %v525_v15 = vsel %vm240_vm1, %v524_v63, %v499_v6  ;;  %v526_v23 = vrot.slane %v499_v6, 4  ;;  %v294_v24 = vrot.slane %v287_v13, 4 }
 0x124   :  { %v292_v21 = vrot.slane %v283_v9, 4  ;;  %v531_v12 = vperm.slane %v525_v15, %v2551_v52  ;;  %v2576_v28 = vsel %vm240_vm1, 0.0, %v288_v20  ;;  %v290_v29 = vrot.slane %v275_v18, 4 }
 0x125   :  { %v513_v25 = vsel %vm240_vm1, %v512_v60, %v495_v14  ;;  %v514_v26 = vrot.slane %v495_v14, 4  ;;  %v295_v32 = vsel %vm240_vm1, 0.0, %v294_v24  ;;  %v363_v33 = vsel %vm240_vm1, %v294_v24, %v283_v9 }
 0x126   :  { %v293_v30 = vsel %vm240_vm1, 0.0, %v292_v21  ;;  %v2580_v31 = vperm.slane %v513_v25, %v2551_v52  ;;  %v527_v35 = vsel %vm240_vm1, %v511_v51, %v526_v23  ;;  %v2587_v37 = vsel %vm240_vm1, 0.0, %v290_v29 }
 0x127   :  { %v515_v34 = vsel %vm240_vm1, %v507_v42, %v514_v26  ;;  %v479_v36 = vpop.permute.xlu0 %478  ;;  %v352_v38 = vsel %vm240_vm1, %v290_v29, %v271_v7  ;;  %v2591_v39 = vperm.slane %v363_v33, %v2535_v27  ;;  %v368_v41 = vrot.slane %v295_v32, 4  ;;  %v236_v63 = vpop.permute.xlu1 %235 }
 0x128   :  { %v2594_v43 = vperm.slane %v352_v38, %v2535_v27  ;;  %v357_v44 = vrot.slane %v2587_v37, 4  ;;  %v523_v46 = vperm.slane %v515_v34, %v2551_v52  ;;  %v535_v42 = vperm.slane %v527_v35, %v2551_v52 }
 0x129   :  { %v369_v47 = vsel %vm240_vm1, %v368_v41, %v293_v30  ;;  %v388_v48 = vrot.slane %v2591_v39, 4  ;;  %v536_v49 = vrot.slane %v2580_v31, 4  ;;  %v540_v50 = vrot.slane %v531_v12, 4 }
 0x12a   :  { %v2603_v51 = vperm.slane %v369_v47, %v2535_v27  ;;  %v538_v56 = vrot.slane %v523_v46, 4  ;;  %v542_v57 = vrot.slane %v535_v42, 4  ;;  %v559_v60 = vsel %vm240_vm1, %v485_v17, %v558_v54 }
 0x12b   :  { %v541_v59 = vsel %vm240_vm1, 0.0, %v540_v50  ;;  %v544_v61 = vrot.slane %v479_v36, 4  ;;  %v547_v62 = vsel %vm240_vm1, %v479_v36, %v546_v45  ;;  %v557_v3 = vsel %vm240_vm1, %v556_v58, %v2533_v22 }
 0x12c   :  { %v2611_v0 = vsel %vm240_vm1, 0.0, %v538_v56  ;;  %v543_v1 = vsel %vm240_vm1, 0.0, %v542_v57  ;;  %v611_v2 = vsel %vm240_vm1, %v542_v57, %v531_v12  ;;  %v563_v6 = vperm.slane %v557_v3, %v2535_v27 }
 0x12d   :  { %v605_v4 = vrot.slane %v2611_v0, 4  ;;  %v2619_v54 = vperm.slane %v611_v2, %v2535_v27  ;;  %v616_v5 = vrot.slane %v543_v1, 4  ;;  %v567_v45 = vperm.slane %v559_v60, %v2535_v27 }
 0x12e   :  { %v545_v7 = vsel %vm240_vm1, %v544_v61, %v2514_v16  ;;  %v555_v8 = vperm.slane %v547_v62, %v2535_v27  ;;  %v308_v9 = vrot.slane %v236_v63, 4  ;;  %v568_v22 = vrot.slane %v563_v6, 4 }
 0x12f   :  { %v230_v10 = vpop.permute.xlu0 %229  ;;  %v617_v11 = vsel %vm240_vm1, %v616_v5, %v541_v59  ;;  %v551_v13 = vperm.slane %v545_v7, %v2535_v27  ;;  %v311_v14 = vsel %vm240_vm1, %v236_v63, %v310_v55  ;;  %v580_v15 = vrot.slane %v567_v45, 4 }
 0x130   :  { %v582_v17 = vrot.slane %v555_v8, 4  ;;  %v309_v18 = vsel %vm240_vm1, %v308_v9, %v2540_v40  ;;  %v319_v16 = vperm.slane %v311_v14, %v2535_v27  ;;  %v296_v24 = vrot.slane %v230_v10, 4 }
 0x131   :  { %v569_v20 = vsel %vm240_vm1, %v568_v22, %v551_v13  ;;  %v570_v21 = vrot.slane %v551_v13, 4  ;;  %v315_v23 = vperm.slane %v309_v18, %v2535_v27  ;;  %v581_v26 = vsel %vm240_vm1, %v580_v15, %v555_v8 }
 0x132   :  { %v575_v25 = vperm.slane %v569_v20, %v2551_v52  ;;  %v583_v12 = vsel %vm240_vm1, %v567_v45, %v582_v17  ;;  %v332_v55 = vrot.slane %v319_v16, 4  ;;  %v587_v30 = vperm.slane %v581_v26, %v2551_v52 }
 0x133   :  { %v571_v29 = vsel %vm240_vm1, %v563_v6, %v570_v21  ;;  %v591_v40 = vperm.slane %v583_v12, %v2551_v52  ;;  %v320_v32 = vrot.slane %v315_v23, 4  ;;  %v297_v35 = vsel %vm240_vm1, %v296_v24, %v2521_v19 }
 0x134   :  { %v579_v33 = vperm.slane %v571_v29, %v2551_v52  ;;  %v592_v34 = vrot.slane %v575_v25, 4  ;;  %v299_v36 = vsel %vm240_vm1, %v230_v10, %v298_v53  ;;  %v596_v38 = vrot.slane %v587_v30, 4 }
 0x135   :  { %v598_v41 = vrot.slane %v591_v40, 4  ;;  %v303_v46 = vperm.slane %v297_v35, %v2535_v27  ;;  %v307_v42 = vperm.slane %v299_v36, %v2535_v27  ;;  %v537_v57 = vsel %vm240_vm1, 0.0, %v536_v49 }
 0x136   :  { %v2651_v47 = vsel %vm240_vm1, 0.0, %v592_v34  ;;  %v594_v50 = vrot.slane %v579_v33, 4  ;;  %v600_v58 = vsel %vm240_vm1, %v538_v56, %v2580_v31  ;;  %v597_v59 = vsel %vm240_vm1, 0.0, %v596_v38 }
 0x137   :  { %v599_v19 = vsel %vm240_vm1, 0.0, %v598_v41  ;;  %v665_v53 = vsel %vm240_vm1, %v598_v41, %v587_v30  ;;  %v321_v60 = vsel %vm240_vm1, %v320_v32, %v303_v46  ;;  %v322_v56 = vrot.slane %v303_v46, 4 }
 0x138   :  { %v2661_v61 = vsel %vm240_vm1, 0.0, %v594_v50  ;;  %v2664_v62 = vsel %vm240_vm1, %v594_v50, %v575_v25  ;;  %v2667_v63 = vperm.slane %v665_v53, %v2535_v27  ;;  %v670_v49 = vrot.slane %v599_v19, 4 }
 0x139   :  { %v659_v31 = vrot.slane %v2661_v61, 4  ;;  %v327_v1 = vperm.slane %v321_v60, %v2551_v52  ;;  %v333_v2 = vsel %vm240_vm1, %v332_v55, %v307_v42  ;;  %v334_v6 = vrot.slane %v307_v42, 4 }
 0x13a   :  { %v671_v3 = vsel %vm240_vm1, %v670_v49, %v597_v59  ;;  %v690_v5 = vrot.slane %v2667_v63, 4  ;;  %v339_v45 = vperm.slane %v333_v2, %v2551_v52  ;;  %v323_v8 = vsel %vm240_vm1, %v315_v23, %v322_v56 }
 0x13b   :  { %v2676_v7 = vperm.slane %v671_v3, %v2535_v27  ;;  %v344_v9 = vrot.slane %v327_v1, 4  ;;  %v604_v10 = vperm.slane %v600_v58, %v2535_v27  ;;  %v331_v22 = vperm.slane %v323_v8, %v2551_v52 }
 0x13c   :  { %v335_v13 = vsel %vm240_vm1, %v319_v16, %v334_v6  ;;  %v348_v14 = vrot.slane %v339_v45, 4  ;;  %v606_v15 = vsel %vm240_vm1, %v605_v4, %v537_v57  ;;  %v621_v21 = vperm.slane %v617_v11, %v2535_v27 }
 0x13d   :  { %v343_v17 = vperm.slane %v335_v13, %v2551_v52  ;;  %v345_v18 = vsel %vm240_vm1, 0.0, %v344_v9  ;;  %v610_v20 = vperm.slane %v606_v15, %v2535_v27  ;;  %v346_v23 = vrot.slane %v331_v22, 4 }
 0x13e   :  { %v349_v24 = vsel %vm240_vm1, 0.0, %v348_v14  ;;  %v624_v25 = vrot.slane %v604_v10, 4  ;;  %v636_v26 = vrot.slane %v2619_v54, 4  ;;  %v634_v0 = vrot.slane %v621_v21, 4 }
 0x13f   :  { %v350_v16 = vrot.slane %v343_v17, 4  ;;  %v622_v12 = vrot.slane %v610_v20, 4  ;;  %v347_v4 = vsel %vm240_vm1, 0.0, %v346_v23  ;;  %v406_v55 = vsel %vm240_vm1, %v346_v23, %v327_v1 }
 0x140   :  { %v625_v29 = vsel %vm240_vm1, %v610_v20, %v624_v25  ;;  %v637_v30 = vsel %vm240_vm1, %v621_v21, %v636_v26  ;;  %v2697_v40 = vperm.slane %v406_v55, %v2535_v27  ;;  %v411_v32 = vrot.slane %v347_v4, 4 }
 0x141   :  { %v351_v11 = vsel %vm240_vm1, 0.0, %v350_v16  ;;  %v417_v33 = vsel %vm240_vm1, %v350_v16, %v339_v45  ;;  %v633_v36 = vperm.slane %v625_v29, %v2551_v52  ;;  %v645_v38 = vperm.slane %v637_v30, %v2551_v52 }
 0x142   :  { %v2701_v34 = vperm.slane %v417_v33, %v2535_v27  ;;  %v422_v35 = vrot.slane %v351_v11, 4  ;;  %v412_v41 = vsel %vm240_vm1, %v411_v32, %v345_v18  ;;  %v430_v46 = vrot.slane %v2697_v40, 4 }
 0x143   :  { %v623_v42 = vsel %vm240_vm1, %v622_v12, %v604_v10  ;;  %v635_v50 = vsel %vm240_vm1, %v634_v0, %v2619_v54  ;;  %v2711_v57 = vperm.slane %v412_v41, %v2535_v27  ;;  %v650_v19 = vrot.slane %v645_v38, 4 }
 0x144   :  { %v423_v58 = vsel %vm240_vm1, %v422_v35, %v349_v24  ;;  %v442_v59 = vrot.slane %v2701_v34, 4  ;;  %v629_v60 = vperm.slane %v623_v42, %v2551_v52  ;;  %v641_v49 = vperm.slane %v635_v50, %v2551_v52 }
 0x145   :  { %v2716_v53 = vperm.slane %v423_v58, %v2535_v27  ;;  %v652_v56 = vrot.slane %v633_v36, 4  ;;  %v651_v1 = vsel %vm240_vm1, %v650_v19, %v633_v36  ;;  %v358_v54 = vsel %vm240_vm1, %v357_v44, %v2576_v28 }
 0x146   :  { %v376_v2 = vrot.slane %v2594_v43, 4  ;;  %v389_v3 = vsel %vm240_vm1, %v2603_v51, %v388_v48  ;;  %v710_v45 = vpack.c.bf16 %v651_v1, %v651_v1  ;;  %v646_v8 = vrot.slane %v641_v49, 4 }
 0x147   :  { %v440_v6 = vrot.slane %v2716_v53, 4  ;;  %v653_v9 = vsel %vm240_vm1, %v645_v38, %v652_v56  ;;  %v648_v22 = vrot.slane %v629_v60, 4  ;;  %v362_v13 = vperm.slane %v358_v54, %v2535_v27 }
 0x148   :  { %v711_v10 = vpack.c.bf16 %v653_v9, %v653_v9  ;;  %v397_v37 = vperm.slane %v389_v3, %v2551_v52  ;;  %v1007_v28 = vsel %vm964_vm2, %v710_v45, 0  ;;  %v647_v44 = vsel %vm240_vm1, %v646_v8, %v629_v60 }
 0x149   :  { %v658_v14 = vperm.slane %v2664_v62, %v2535_v27  ;;  %v660_v48 = vsel %vm240_vm1, %v659_v31, %v2651_v47  ;;  %1016 = vmatpush.bf16.xpose.msrb.mxu1 %v1007_v28  ;;  %v708_v15 = vpack.c.bf16 %v647_v44, %v647_v44  ;;  %v649_v18 = vsel %vm240_vm1, %v641_v49, %v648_v22 }
 0x14a   :  { %v1026_v17 = vsel %vm964_vm2, %v711_v10, 0  ;;  %v377_v20 = vsel %vm240_vm1, %v362_v13, %v376_v2  ;;  %v709_v21 = vpack.c.bf16 %v649_v18, %v649_v18  ;;  %v402_v24 = vrot.slane %v397_v37, 4 }
 0x14b   :  { %1035 = vmatpush.bf16.xpose.msrb.mxu2 %v1026_v17  ;;  %v385_v23 = vperm.slane %v377_v20, %v2551_v52  ;;  %v664_v62 = vperm.slane %v660_v48, %v2535_v27  ;;  %v969_v25 = vsel %vm964_vm2, %v708_v15, 0  ;;  %v678_v61 = vrot.slane %v658_v14, 4 }
 0x14c   :  { %v691_v47 = vsel %vm240_vm1, %v2676_v7, %v690_v5  ;;  %v374_v31 = vrot.slane %v362_v13, 4  ;;  %978 = vmatpush.bf16.xpose.msra.mxu3 %v969_v25  ;;  %v988_v26 = vsel %vm964_vm2, %v709_v21, 0  ;;  %v386_v0 = vrot.slane %v2603_v51, 4 }
 0x14d   :  { %v403_v16 = vsel %vm240_vm1, %v402_v24, %v385_v23  ;;  %v699_v12 = vperm.slane %v691_v47, %v2551_v52  ;;  %997 = vmatpush.bf16.xpose.msrb.mxu0 %v988_v26  ;;  %v679_v55 = vsel %vm240_vm1, %v664_v62, %v678_v61  ;;  %v404_v30 = vrot.slane %v385_v23, 4 }
 0x14e   :  { %v462_v4 = vpack.c.bf16 %v403_v16, %v403_v16  ;;  %v375_v29 = vsel %vm240_vm1, %v374_v31, %v2594_v43  ;;  %v687_v5 = vperm.slane %v679_v55, %v2551_v52  ;;  %v387_v33 = vsel %vm240_vm1, %v386_v0, %v2591_v39  ;;  %v212_v16 = vpop.f32.mrf.mxu2 }
 0x14f   :  { %v704_v11 = vrot.slane %v699_v12, 4  ;;  %v381_v32 = vperm.slane %v375_v29, %v2551_v52  ;;  %v393_v35 = vperm.slane %v387_v33, %v2551_v52  ;;  %v405_v51 = vsel %vm240_vm1, %v397_v37, %v404_v30 }
 0x150   :  { %v676_v36 = vrot.slane %v664_v62, 4  ;;  %v688_v38 = vrot.slane %v2676_v7, 4  ;;  %2063 = vmatmul.msk.bf16.vlgmr.msrb.gmra.mxu1 %vm964_vm2, %v462_v4  ;;  %v463_v42 = vpack.c.bf16 %v405_v51, %v405_v51  ;;  %v706_v50 = vrot.slane %v687_v5, 4 }
 0x151   :  { %v705_v43 = vsel %vm240_vm1, %v704_v11, %v687_v5  ;;  %v400_v41 = vrot.slane %v381_v32, 4  ;;  %v398_v19 = vrot.slane %v393_v35, 4  ;;  %v431_v10 = vsel %vm240_vm1, %v2711_v57, %v430_v46 }
 0x152   :  { %v714_v58 = vpack.c.bf16 %v705_v43, %v705_v43  ;;  %v677_v60 = vsel %vm240_vm1, %v676_v36, %v658_v14  ;;  %v689_v39 = vsel %vm240_vm1, %v688_v38, %v2667_v63  ;;  %2064 = vmatmul.msk.bf16.vlgmr.msrb.gmra.mxu2 %vm964_vm2, %v463_v42  ;;  %v707_v56 = vsel %vm240_vm1, %v699_v12, %v706_v50 }
 0x153   :  { %v683_v49 = vperm.slane %v677_v60, %v2551_v52  ;;  %v695_v7 = vperm.slane %v689_v39, %v2551_v52  ;;  %v401_v1 = vsel %vm240_vm1, %v393_v35, %v400_v41  ;;  %v399_v2 = vsel %vm240_vm1, %v398_v19, %v381_v32 }
 0x154   :  { %v1083_v54 = vsel %vm964_vm2, %v714_v58, 0  ;;  %v715_v3 = vpack.c.bf16 %v707_v56, %v707_v56  ;;  %v461_v45 = vpack.c.bf16 %v401_v1, %v401_v1  ;;  %v460_v8 = vpack.c.bf16 %v399_v2, %v399_v2  ;;  %v2180_v56 = vld [vmem:[%s3160_s6] ss:$0 sm:$0xff]  ;;  %s2370_s6 = smov 24  }
 0x155   :  { %1092 = vmatpush.bf16.xpose.msra.mxu1 %v1083_v54  ;;  %v700_v9 = vrot.slane %v695_v7, 4  ;;  %v702_v63 = vrot.slane %v683_v49, 4  ;;  %v439_v13 = vperm.slane %v431_v10, %v2551_v52  ;;  %v443_v37 = vsel %vm240_vm1, %v2716_v53, %v442_v59 }
 0x156   :  { %v1102_v22 = vsel %vm964_vm2, %v715_v3, 0  ;;  %2062 = vmatmul.msk.bf16.vlgmr.msrb.gmra.mxu0 %vm964_vm2, %v461_v45  ;;  %v428_v28 = vrot.slane %v2711_v57, 4  ;;  %2061 = vmatmul.msk.bf16.vlgmr.msra.gmra.mxu3 %vm964_vm2, %v460_v8  ;;  %v451_v14 = vperm.slane %v443_v37, %v2551_v52  ;;  %v441_v59 = vsel %vm240_vm1, %v440_v6, %v2701_v34  ;;  %v214_v12 = vpop.f32.mrf.mxu2 }
 0x157   :  { %v701_v44 = vsel %vm240_vm1, %v700_v9, %v683_v49  ;;  %1111 = vmatpush.bf16.xpose.msra.mxu2 %v1102_v22  ;;  %v703_v46 = vsel %vm240_vm1, %v695_v7, %v702_v63  ;;  %v447_v23 = vperm.slane %v441_v59, %v2551_v52  ;;  %v458_v24 = vrot.slane %v439_v13, 4 }
 0x158   :  { %v712_v48 = vpack.c.bf16 %v701_v44, %v701_v44  ;;  %v713_v15 = vpack.c.bf16 %v703_v46, %v703_v46  ;;  %v429_v17 = vsel %vm240_vm1, %v428_v28, %v2697_v40  ;;  %v456_v57 = vrot.slane %v451_v14, 4 }
 0x159   :  { %v435_v18 = vperm.slane %v429_v17, %v2551_v52  ;;  %v452_v25 = vrot.slane %v447_v23, 4  ;;  %v459_v53 = vsel %vm240_vm1, %v451_v14, %v458_v24  ;;  %v2826_v54 = vadd.f32 %v2180_v56, %v212_v16 }
 0x15a   :  { %v1045_v20 = vsel %vm964_vm2, %v712_v48, 0  ;;  %v1064_v21 = vsel %vm964_vm2, %v713_v15, 0  ;;  %v457_v62 = vsel %vm240_vm1, %v456_v57, %v439_v13  ;;  %v467_v34 = vpack.c.bf16 %v459_v53, %v459_v53 }
 0x15b   :  { %1054 = vmatpush.bf16.xpose.msrb.mxu3 %v1045_v20  ;;  %1073 = vmatpush.bf16.xpose.msra.mxu0 %v1064_v21  ;;  %v454_v40 = vrot.slane %v435_v18, 4  ;;  %v466_v61 = vpack.c.bf16 %v457_v62, %v457_v62  ;;  %v453_v47 = vsel %vm240_vm1, %v452_v25, %v435_v18  ;;  %v2828_v2 = vadd.f32 %v2180_v56, %v214_v12 }
 0x15c   :  { %v464_v26 = vpack.c.bf16 %v453_v47, %v453_v47 }
 0x15d   :  { %v455_v6 = vsel %vm240_vm1, %v447_v23, %v454_v40  ;;  %v2153_v3 = vpack.i.bf16 %v2828_v2, %v2826_v54 }
 0x15e   :  { %v465_v31 = vpack.c.bf16 %v455_v6, %v455_v6 }
 0x160   :  { %2067 = vmatmul.msk.bf16.vlgmr.msra.gmra.mxu1 %vm964_vm2, %v466_v61 }
 0x162   :  { %2068 = vmatmul.msk.bf16.vlgmr.msra.gmra.mxu2 %vm964_vm2, %v467_v34 }
 0x166   :  { %2066 = vmatmul.msk.bf16.vlgmr.msra.gmra.mxu0 %vm964_vm2, %v465_v31  ;;  %2065 = vmatmul.msk.bf16.vlgmr.msrb.gmra.mxu3 %vm964_vm2, %v464_v26 }
 0x1cd   :  { %v1018_v0 = vpop.f32.mrf.mxu1 }
 0x1ce   :  { %v1123_v4 = vsel %vm964_vm2, %v1018_v0, -inf }
 0x1cf   :  { %1124 = vmax.xlane.f32.xlu1 %v1123_v4 }
 0x1d3   :  { %v999_v55 = vpop.f32.mrf.mxu0 }
 0x1d4   :  { %v1120_v29 = vsel %vm964_vm2, %v999_v55, -inf }
 0x1d5   :  { %1121 = vmax.xlane.f32.xlu2 %v1120_v29  ;;  %v1020_v30 = vpop.f32.mrf.mxu1  ;;  %v1037_v5 = vpop.f32.mrf.mxu2 }
 0x1d6   :  { %v1126_v11 = vsel %vm964_vm2, %v1037_v5, -inf }
 0x1d7   :  { %1127 = vmax.xlane.f32.xlu0 %v1126_v11 }
 0x1d9   :  { %v980_v32 = vpop.f32.mrf.mxu3 }
 0x1da   :  { %v1117_v35 = vsel %vm964_vm2, %v980_v32, -inf }
 0x1db   :  { %v1001_v33 = vpop.f32.mrf.mxu0 }
 0x1dd   :  { %1118 = vmax.xlane.f32.xlu2 %v1117_v35  ;;  %v1039_v51 = vpop.f32.mrf.mxu2  ;;  %v1094_v36 = vpop.f32.mrf.mxu1 }
 0x1de   :  { %v1135_v38 = vsel %vm964_vm2, %v1094_v36, -inf }
 0x1df   :  { %1136 = vmax.xlane.f32.xlu1 %v1135_v38 }
 0x1e1   :  { %v982_v43 = vpop.f32.mrf.mxu3 }
 0x1e3   :  { %v2817_v41 = vpop.f32.mrf.mxu0 }
 0x1e4   :  { %v1132_v42 = vsel %vm964_vm2, %v2817_v41, -inf }
 0x1e5   :  { %1133 = vmax.xlane.f32.xlu2 %v1132_v42  ;;  %v1096_v50 = vpop.f32.mrf.mxu1  ;;  %v1113_v58 = vpop.f32.mrf.mxu2 }
 0x1e6   :  { %v1138_v19 = vsel %vm964_vm2, %v1113_v58, -inf }
 0x1e7   :  { %1139 = vmax.xlane.f32.xlu0 %v1138_v19 }
 0x1e9   :  { %v1056_v60 = vpop.f32.mrf.mxu3 }
 0x1ea   :  { %v1129_v49 = vsel %vm964_vm2, %v1056_v60, -inf }
 0x1eb   :  { %v1077_v39 = vpop.f32.mrf.mxu0 }
 0x1ed   :  { %1130 = vmax.xlane.f32.xlu2 %v1129_v49  ;;  %v1115_v7 = vpop.f32.mrf.mxu2 }
 0x1f1   :  { %v1058_v1 = vpop.f32.mrf.mxu3 }
 0x1f8   :  { %2154 = vrot.lane.b32.xlu1 %v2153_v3, %s2367_s4 }
 0x1fb   :  { %2149 = vrot.lane.b32.xlu0 %v2153_v3, %s2366_s28 }
 0x205   :  { %2159 = vrot.lane.b32.xlu2 %v2153_v3, %s2365_s5 }
 0x242   :  { %v1125_v45 = vpop.xlane.xlu1 %1124 }
 0x243   :  { %v1143_v8 = vsub.f32 %v1018_v0, %v1125_v45 }
 0x245   :  { %v1153_v9 = vmul.f32 1.442695, %v1143_v8 }
 0x247   :  { %2188 = vpow2.f32 %v1153_v9 }
 0x248   :  { %v1122_v63 = vpop.xlane.xlu2 %1121 }
 0x249   :  { %v1142_v14 = vsub.f32 %v999_v55, %v1122_v63  ;;  %v738_v55 = vrot.slane %v2826_v54, 4 }
 0x24a   :  { %v1128_v10 = vpop.xlane.xlu0 %1127 }
 0x24b   :  { %v1144_v22 = vsub.f32 %v1037_v5, %v1128_v10  ;;  %v1151_v18 = vmul.f32 1.442695, %v1142_v14  ;;  %v794_v5 = vrot.slane %v2828_v2, 4 }
 0x24d   :  { %v2835_v13 = vpop.eup %2188  ;;  %v1155_v37 = vmul.f32 1.442695, %v1144_v22 }
 0x24e   :  { %v1171_v28 = vsel %vm964_vm2, %v2835_v13, 0.0 }
 0x24f   :  { %2190 = vpow2.f32 %v1155_v37  ;;  %1172 = vadd.xlane.f32.xlu2 %v1171_v28 }
 0x250   :  { %v1119_v44 = vpop.xlane.xlu2 %1118 }
 0x251   :  { %v1141_v46 = vsub.f32 %v980_v32, %v1119_v44 }
 0x252   :  { %v1137_v15 = vpop.xlane.xlu1 %1136 }
 0x253   :  { %v1149_v48 = vmul.f32 1.442695, %v1141_v46  ;;  %v1147_v17 = vsub.f32 %v1094_v36, %v1137_v15 }
 0x255   :  { %2192 = vpow2.f32 %v1149_v48  ;;  %v2839_v59 = vpop.eup %2190  ;;  %v1161_v57 = vmul.f32 1.442695, %v1147_v17 }
 0x256   :  { %v1174_v20 = vsel %vm964_vm2, %v2839_v59, 0.0 }
 0x257   :  { %2194 = vpow2.f32 %v1161_v57  ;;  %1175 = vadd.xlane.f32.xlu1 %v1174_v20 }
 0x258   :  { %v1134_v21 = vpop.xlane.xlu2 %1133  ;;  %2196 = vpow2.f32 %v1151_v18 }
 0x259   :  { %v1146_v31 = vsub.f32 %v2817_v41, %v1134_v21 }
 0x25a   :  { %v1140_v24 = vpop.xlane.xlu0 %1139 }
 0x25b   :  { %v2843_v23 = vpop.eup %2192  ;;  %v1148_v62 = vsub.f32 %v1113_v58, %v1140_v24  ;;  %v1159_v12 = vmul.f32 1.442695, %v1146_v31 }
 0x25c   :  { %v1165_v40 = vsel %vm964_vm2, %v2843_v23, 0.0 }
 0x25d   :  { %1166 = vadd.xlane.f32.xlu0 %v1165_v40  ;;  %v2847_v25 = vpop.eup %2194  ;;  %v1163_v53 = vmul.f32 1.442695, %v1148_v62 }
 0x25e   :  { %v1183_v61 = vsel %vm964_vm2, %v2847_v25, 0.0  ;;  %v2851_v6 = vpop.eup %2196 }
 0x25f   :  { %1184 = vadd.xlane.f32.xlu2 %v1183_v61  ;;  %2198 = vpow2.f32 %v1163_v53  ;;  %v1168_v16 = vsel %vm964_vm2, %v2851_v6, 0.0 }
 0x260   :  { %v1131_v34 = vpop.xlane.xlu2 %1130 }
 0x261   :  { %v1145_v47 = vsub.f32 %v1056_v60, %v1131_v34 }
 0x263   :  { %v1157_v26 = vmul.f32 1.442695, %v1145_v47 }
 0x265   :  { %2200 = vpow2.f32 %v1157_v26  ;;  %1169 = vadd.xlane.f32.xlu0 %v1168_v16  ;;  %v2856_v0 = vpop.eup %2198 }
 0x266   :  { %2202 = vpow2.f32 %v1159_v12  ;;  %v1186_v32 = vsel %vm964_vm2, %v2856_v0, 0.0 }
 0x268   :  { %v2160_v4 = vpop.permute.xlu2 %2159 }
 0x269   :  { %v2162_v30 = vunpack.i.h.bf16 %v2160_v4  ;;  %v2161_v33 = vunpack.i.l.bf16 %v2160_v4 }
 0x26a   :  { %v2155_v11 = vpop.permute.xlu1 %2154 }
 0x26b   :  { %v2859_v29 = vpop.eup %2200  ;;  %v2157_v35 = vunpack.i.h.bf16 %v2155_v11  ;;  %v2156_v51 = vunpack.i.l.bf16 %v2155_v11  ;;  %v804_v58 = vrot.slane %v2162_v30, 4  ;;  %v748_v39 = vrot.slane %v2161_v33, 4 }
 0x26c   :  { %v1177_v36 = vsel %vm964_vm2, %v2859_v29, 0.0  ;;  %v2873_v1 = vpop.eup %2202 }
 0x26d   :  { %1187 = vadd.xlane.f32.xlu0 %v1186_v32  ;;  %1178 = vadd.xlane.f32.xlu1 %v1177_v36  ;;  %v792_v38 = vrot.slane %v2157_v35, 4  ;;  %v795_v43 = vsel %vm240_vm1, %v2157_v35, %v794_v5  ;;  %v736_v41 = vrot.slane %v2156_v51, 4  ;;  %v739_v42 = vsel %vm240_vm1, %v2156_v51, %v738_v55  ;;  %v2150_v50 = vpop.permute.xlu0 %2149 }
 0x26e   :  { %v2152_v19 = vunpack.i.h.bf16 %v2150_v50  ;;  %v2151_v60 = vunpack.i.l.bf16 %v2150_v50  ;;  %v747_v56 = vperm.slane %v739_v42, %v2535_v27  ;;  %v803_v45 = vperm.slane %v795_v43, %v2535_v27 }
 0x26f   :  { %v793_v49 = vsel %vm240_vm1, %v792_v38, %v2828_v2  ;;  %v737_v7 = vsel %vm240_vm1, %v736_v41, %v2826_v54  ;;  %v1180_v48 = vsel %vm964_vm2, %v2873_v1, 0.0 }
 0x270   :  { %v799_v3 = vperm.slane %v793_v49, %v2535_v27  ;;  %v743_v8 = vperm.slane %v737_v7, %v2535_v27  ;;  %v806_v9 = vrot.slane %v2152_v19, 4  ;;  %v749_v63 = vsel %vm240_vm1, %v748_v39, %v2151_v60 }
 0x271   :  { %v750_v10 = vrot.slane %v2151_v60, 4  ;;  %v805_v22 = vsel %vm240_vm1, %v804_v58, %v2152_v19  ;;  %v755_v54 = vperm.slane %v749_v63, %v2535_v27  ;;  %v774_v44 = vrot.slane %v747_v56, 4 }
 0x272   :  { %v818_v2 = vrot.slane %v799_v3, 4  ;;  %v762_v37 = vrot.slane %v743_v8, 4  ;;  %v811_v28 = vperm.slane %v805_v22, %v2535_v27  ;;  %v807_v14 = vsel %vm240_vm1, %v2162_v30, %v806_v9 }
 0x273   :  { %v751_v46 = vsel %vm240_vm1, %v2161_v33, %v750_v10  ;;  %v760_v17 = vrot.slane %v755_v54, 4  ;;  %v815_v18 = vperm.slane %v807_v14, %v2535_v27  ;;  %v830_v20 = vrot.slane %v803_v45, 4 }
 0x274   :  { %v759_v15 = vperm.slane %v751_v46, %v2535_v27  ;;  %v763_v57 = vsel %vm240_vm1, %v755_v54, %v762_v37  ;;  %v816_v24 = vrot.slane %v811_v28, 4  ;;  %v819_v62 = vsel %vm240_vm1, %v811_v28, %v818_v2 }
 0x275   :  { %1181 = vadd.xlane.f32.xlu1 %v1180_v48  ;;  %v771_v21 = vperm.slane %v763_v57, %v2551_v52  ;;  %v761_v40 = vsel %vm240_vm1, %v760_v17, %v743_v8  ;;  %v827_v34 = vperm.slane %v819_v62, %v2551_v52  ;;  %v828_v55 = vrot.slane %v815_v18, 4 }
 0x276   :  { %v772_v53 = vrot.slane %v759_v15, 4  ;;  %v775_v61 = vsel %vm240_vm1, %v759_v15, %v774_v44  ;;  %v767_v47 = vperm.slane %v761_v40, %v2551_v52  ;;  %v817_v16 = vsel %vm240_vm1, %v816_v24, %v799_v3 }
 0x277   :  { %v783_v31 = vperm.slane %v775_v61, %v2551_v52  ;;  %v786_v26 = vrot.slane %v771_v21, 4  ;;  %v823_v4 = vperm.slane %v817_v16, %v2551_v52  ;;  %v831_v30 = vsel %vm240_vm1, %v815_v18, %v830_v20 }
 0x278   :  { %v773_v12 = vsel %vm240_vm1, %v772_v53, %v747_v56  ;;  %v784_v11 = vrot.slane %v767_v47, 4  ;;  %v829_v35 = vsel %vm240_vm1, %v828_v55, %v803_v45  ;;  %v839_v51 = vperm.slane %v831_v30, %v2551_v52 }
 0x279   :  { %v779_v5 = vperm.slane %v773_v12, %v2551_v52  ;;  %v787_v32 = vsel %vm240_vm1, 0.0, %v786_v26  ;;  %v790_v33 = vrot.slane %v783_v31, 4  ;;  %v840_v36 = vrot.slane %v823_v4, 4 }
 0x27a   :  { %v842_v38 = vrot.slane %v827_v34, 4  ;;  %v785_v43 = vsel %vm240_vm1, 0.0, %v784_v11  ;;  %v835_v50 = vperm.slane %v829_v35, %v2551_v52  ;;  %v846_v60 = vrot.slane %v839_v51, 4 }
 0x27b   :  { %v788_v41 = vrot.slane %v779_v5, 4  ;;  %v791_v42 = vsel %vm240_vm1, 0.0, %v790_v33  ;;  %v841_v58 = vsel %vm240_vm1, 0.0, %v840_v36  ;;  %v848_v39 = vsel %vm240_vm1, %v786_v26, %v767_v47 }
 0x27c   :  { %v843_v19 = vsel %vm240_vm1, 0.0, %v842_v38  ;;  %v844_v49 = vrot.slane %v835_v50, 4  ;;  %v852_v7 = vperm.slane %v848_v39, %v2535_v27  ;;  %v853_v56 = vrot.slane %v787_v32, 4 }
 0x27d   :  { %v864_v3 = vrot.slane %v791_v42, 4  ;;  %v847_v45 = vsel %vm240_vm1, 0.0, %v846_v60  ;;  %v902_v8 = vsel %vm240_vm1, %v842_v38, %v823_v4  ;;  %v907_v9 = vrot.slane %v843_v19, 4 }
 0x27e   :  { %v789_v63 = vsel %vm240_vm1, 0.0, %v788_v41  ;;  %v906_v10 = vperm.slane %v902_v8, %v2535_v27  ;;  %v918_v22 = vrot.slane %v847_v45, 4  ;;  %v854_v2 = vsel %vm240_vm1, %v853_v56, %v785_v43 }
 0x27f   :  { %v859_v37 = vsel %vm240_vm1, %v790_v33, %v779_v5  ;;  %v858_v54 = vperm.slane %v854_v2, %v2535_v27  ;;  %v865_v44 = vsel %vm240_vm1, %v864_v3, %v789_v63  ;;  %v872_v46 = vrot.slane %v852_v7, 4 }
 0x280   :  { %v863_v28 = vperm.slane %v859_v37, %v2535_v27  ;;  %v869_v14 = vperm.slane %v865_v44, %v2535_v27  ;;  %v845_v48 = vsel %vm240_vm1, 0.0, %v844_v49  ;;  %v908_v15 = vsel %vm240_vm1, %v907_v9, %v841_v58 }
 0x281   :  { %v913_v17 = vsel %vm240_vm1, %v846_v60, %v835_v50  ;;  %v873_v57 = vsel %vm240_vm1, %v858_v54, %v872_v46  ;;  %v912_v20 = vperm.slane %v908_v15, %v2535_v27  ;;  %v919_v62 = vsel %vm240_vm1, %v918_v22, %v845_v48 }
 0x282   :  { %v884_v18 = vrot.slane %v863_v28, 4  ;;  %v917_v21 = vperm.slane %v913_v17, %v2535_v27  ;;  %v881_v24 = vperm.slane %v873_v57, %v2551_v52  ;;  %v926_v40 = vrot.slane %v906_v10, 4 }
 0x283   :  { %v870_v53 = vrot.slane %v858_v54, 4  ;;  %v923_v34 = vperm.slane %v919_v62, %v2535_v27  ;;  %v882_v31 = vrot.slane %v869_v14, 4  ;;  %v924_v41 = vrot.slane %v912_v20, 4 }
 0x284   :  { %v885_v61 = vsel %vm240_vm1, %v869_v14, %v884_v18  ;;  %v938_v47 = vrot.slane %v917_v21, 4  ;;  %v900_v16 = vrot.slane %v881_v24, 4  ;;  %v927_v12 = vsel %vm240_vm1, %v912_v20, %v926_v40 }
 0x285   :  { %v893_v26 = vperm.slane %v885_v61, %v2551_v52  ;;  %v871_v4 = vsel %vm240_vm1, %v870_v53, %v852_v7  ;;  %v935_v55 = vperm.slane %v927_v12, %v2551_v52  ;;  %v883_v11 = vsel %vm240_vm1, %v882_v31, %v863_v28 }
 0x286   :  { %v939_v30 = vsel %vm240_vm1, %v923_v34, %v938_v47  ;;  %v877_v5 = vperm.slane %v871_v4, %v2551_v52  ;;  %v889_v51 = vperm.slane %v883_v11, %v2551_v52  ;;  %v936_v19 = vrot.slane %v923_v34, 4 }
 0x287   :  { %v901_v32 = vsel %vm240_vm1, %v893_v26, %v900_v16  ;;  %v898_v33 = vrot.slane %v893_v26, 4  ;;  %v947_v35 = vperm.slane %v939_v30, %v2551_v52  ;;  %v954_v38 = vrot.slane %v935_v55, 4 }
 0x288   :  { %v959_v36 = vpack.c.bf16 %v901_v32, %v901_v32  ;;  %v896_v43 = vrot.slane %v877_v5, 4  ;;  %v894_v58 = vrot.slane %v889_v51, 4  ;;  %v925_v2 = vsel %vm240_vm1, %v924_v41, %v906_v10 }
 0x289   :  { %v899_v42 = vsel %vm240_vm1, %v898_v33, %v881_v24  ;;  %v952_v50 = vrot.slane %v947_v35, 4  ;;  %v955_v49 = vsel %vm240_vm1, %v947_v35, %v954_v38  ;;  %v931_v28 = vperm.slane %v925_v2, %v2551_v52 }
 0x28a   :  { %v1395_v60 = vsel %vm1336_vm3, %v959_v36, 0  ;;  %v958_v39 = vpack.c.bf16 %v899_v42, %v899_v42  ;;  %v897_v7 = vsel %vm240_vm1, %v889_v51, %v896_v43  ;;  %v963_v56 = vpack.c.bf16 %v955_v49, %v955_v49 }
 0x28b   :  { %1404 = vmatpush.bf16.msrb.mxu2 %v1395_v60  ;;  %v957_v3 = vpack.c.bf16 %v897_v7, %v897_v7  ;;  %v953_v45 = vsel %vm240_vm1, %v952_v50, %v935_v55  ;;  %v895_v8 = vsel %vm240_vm1, %v894_v58, %v877_v5  ;;  %v937_v44 = vsel %vm240_vm1, %v936_v19, %v917_v21 }
 0x28c   :  { %v1376_v9 = vsel %vm1336_vm3, %v958_v39, 0  ;;  %v962_v63 = vpack.c.bf16 %v953_v45, %v953_v45  ;;  %v956_v22 = vpack.c.bf16 %v895_v8, %v895_v8  ;;  %v1471_v37 = vsel %vm1336_vm3, %v963_v56, 0 }
 0x28d   :  { %1385 = vmatpush.bf16.msrb.mxu1 %v1376_v9  ;;  %v1357_v54 = vsel %vm1336_vm3, %v957_v3, 0  ;;  %v943_v48 = vperm.slane %v937_v44, %v2551_v52  ;;  %v950_v10 = vrot.slane %v931_v28, 4 }
 0x28e   :  { %1366 = vmatpush.bf16.msrb.mxu0 %v1357_v54  ;;  %v1452_v46 = vsel %vm1336_vm3, %v962_v63, 0  ;;  %v1338_v14 = vsel %vm1336_vm3, %v956_v22, 0 }
 0x28f   :  { %1480 = vmatpush.bf16.msra.mxu2 %v1471_v37  ;;  %1347 = vmatpush.bf16.msra.mxu3 %v1338_v14  ;;  %v948_v15 = vrot.slane %v943_v48, 4  ;;  %v951_v17 = vsel %vm240_vm1, %v943_v48, %v950_v10 }
 0x290   :  { %v961_v57 = vpack.c.bf16 %v951_v17, %v951_v17 }
 0x291   :  { %1461 = vmatpush.bf16.msra.mxu1 %v1452_v46  ;;  %v949_v18 = vsel %vm240_vm1, %v948_v15, %v931_v28 }
 0x292   :  { %v960_v20 = vpack.c.bf16 %v949_v18, %v949_v18  ;;  %v1433_v21 = vsel %vm1336_vm3, %v961_v57, 0 }
 0x293   :  { %1442 = vmatpush.bf16.msra.mxu0 %v1433_v21 }
 0x294   :  { %v1414_v24 = vsel %vm1336_vm3, %v960_v20, 0 }
 0x295   :  { %1423 = vmatpush.bf16.msrb.mxu3 %v1414_v24 }
 0x2c2   :  { %v1173_v62 = vpop.xlane.xlu2 %1172 }
 0x2c3   :  { %2204 = vrcp.f32 %v1173_v62  ;;  %v1230_v47 = vand.u32 2147483648, %v1173_v62  ;;  %v1228_v26 = vand.u32 2147483647, %v1173_v62  ;;  %vm1224_vm5 = vweird.f32 %v1173_v62 }
 0x2c5   :  { %v1231_v55 = vor.u32 1.1754944e-38, %v1230_v47  ;;  %vm1229_vm7 = vcmp.eq.f32.partialorder %v1228_v26, 8.507059e+37 }
 0x2c9   :  { %v2205_v40 = vpop.eup %2204 }
 0x2ca   :  { %v1220_v53 = vmul.f32 %v2205_v40, %v1173_v62  ;;  %v1176_v61 = vpop.xlane.xlu1 %1175  ;;  %vm1225_vm4 = vweird.f32 %v2205_v40 }
 0x2cb   :  { %2206 = vrcp.f32 %v1176_v61  ;;  %vm1226_vm6 = vmor %vm1224_vm5, %vm1225_vm4  ;;  %v1245_v51 = vand.u32 2147483648, %v1176_v61  ;;  %v1243_v43 = vand.u32 2147483647, %v1176_v61  ;;  %vm1239_vm9 = vweird.f32 %v1176_v61 }
 0x2cc   :  { %v1221_v34 = vsub.f32 1.0, %v1220_v53 }
 0x2cd   :  { %vm1244_vm11 = vcmp.eq.f32.partialorder %v1243_v43, 8.507059e+37 }
 0x2ce   :  { %v1222_v31 = vmul.f32 %v2205_v40, %v1221_v34 }
 0x2d0   :  { %v1167_v16 = vpop.xlane.xlu0 %1166  ;;  %v1223_v12 = vadd.f32 %v2205_v40, %v1222_v31 }
 0x2d1   :  { %2208 = vrcp.f32 %v1167_v16  ;;  %v2207_v4 = vpop.eup %2206  ;;  %v1200_v39 = vand.u32 2147483648, %v1167_v16  ;;  %v1198_v45 = vand.u32 2147483647, %v1167_v16  ;;  %vm1194_vm13 = vweird.f32 %v1167_v16 }
 0x2d2   :  { %v1227_v30 = vsel %vm1226_vm6, %v2205_v40, %v1223_v12  ;;  %v1235_v5 = vmul.f32 %v2207_v4, %v1176_v61  ;;  %v1185_v11 = vpop.xlane.xlu2 %1184  ;;  %vm1240_vm8 = vweird.f32 %v2207_v4 }
 0x2d3   :  { %v1232_v32 = vsel %vm1229_vm7, %v1231_v55, %v1227_v30  ;;  %2210 = vrcp.f32 %v1185_v11  ;;  %vm1241_vm10 = vmor %vm1239_vm9, %vm1240_vm8  ;;  %v1201_v22 = vor.u32 1.1754944e-38, %v1200_v39  ;;  %v1290_v2 = vand.u32 2147483648, %v1185_v11 }
 0x2d4   :  { %v1311_v33 = vmul.f32 %v2835_v13, %v1232_v32  ;;  %v1236_v35 = vsub.f32 1.0, %v1235_v5  ;;  %v1246_v13 = vor.u32 1.1754944e-38, %v1245_v51  ;;  %v1288_v28 = vand.u32 2147483647, %v1185_v11 }
 0x2d5   :  { %vm1199_vm3 = vcmp.eq.f32.partialorder %v1198_v45, 8.507059e+37  ;;  %vm1284_vm4 = vweird.f32 %v1185_v11  ;;  %v1291_v57 = vor.u32 1.1754944e-38, %v1290_v2 }
 0x2d6   :  { %1319 = vst.msk [vmem:[#allocation9 + $0x10] sm:$0xff] %vm964_vm2, %v1311_v33  ;;  %v1237_v38 = vmul.f32 %v2207_v4, %v1236_v35  ;;  %v1327_v41 = vpack.c.bf16 %v1311_v33, %v1311_v33  ;;  %vm1289_vm6 = vcmp.eq.f32.partialorder %v1288_v28, 8.507059e+37 }
 0x2d7   :  { %v2209_v36 = vpop.eup %2208 }
 0x2d8   :  { %v1190_v42 = vmul.f32 %v2209_v36, %v1167_v16  ;;  %v2962_v50 = vpop.xlane.xlu0 %1169  ;;  %v1238_v58 = vadd.f32 %v2207_v4, %v1237_v38  ;;  %2071 = vmatmul.msk.bf16.vlgmr.msrb.gmra.mxu1 %vm964_vm2, %v1327_v41  ;;  %vm1195_vm12 = vweird.f32 %v2209_v36 }
 0x2d9   :  { %2212 = vrcp.f32 %v2962_v50  ;;  %v2211_v19 = vpop.eup %2210  ;;  %vm1196_vm14 = vmor %vm1194_vm13, %vm1195_vm12  ;;  %v1215_v21 = vand.u32 2147483648, %v2962_v50  ;;  %v1213_v40 = vand.u32 2147483647, %v2962_v50  ;;  %vm1209_vm8 = vweird.f32 %v2962_v50 }
 0x2da   :  { %v1191_v60 = vsub.f32 1.0, %v1190_v42  ;;  %v1242_v49 = vsel %vm1241_vm10, %v2207_v4, %v1238_v58  ;;  %v1280_v7 = vmul.f32 %v2211_v19, %v1185_v11  ;;  %vm1285_vm15 = vweird.f32 %v2211_v19 }
 0x2db   :  { %v1247_v56 = vsel %vm1244_vm11, %v1246_v13, %v1242_v49  ;;  %vm1286_vm5 = vmor %vm1284_vm4, %vm1285_vm15  ;;  %v1216_v47 = vor.u32 1.1754944e-38, %v1215_v21  ;;  %vm1214_vm10 = vcmp.eq.f32.partialorder %v1213_v40, 8.507059e+37 }
 0x2dc   :  { %v1192_v3 = vmul.f32 %v2209_v36, %v1191_v60  ;;  %v1312_v8 = vmul.f32 %v2839_v59, %v1247_v56  ;;  %v1281_v9 = vsub.f32 1.0, %v1280_v7 }
 0x2de   :  { %v1193_v63 = vadd.f32 %v2209_v36, %v1192_v3  ;;  %1320 = vst.msk [vmem:[#allocation9 + $0x18] sm:$0xff] %vm964_vm2, %v1312_v8  ;;  %v1282_v54 = vmul.f32 %v2211_v19, %v1281_v9  ;;  %v1328_v44 = vpack.c.bf16 %v1312_v8, %v1312_v8 }
 0x2df   :  { %v2213_v37 = vpop.eup %2212 }
 0x2e0   :  { %v1197_v46 = vsel %vm1196_vm14, %v2209_v36, %v1193_v63  ;;  %v1205_v14 = vmul.f32 %v2213_v37, %v2962_v50  ;;  %v1188_v48 = vpop.xlane.xlu0 %1187  ;;  %v2969_v10 = vpop.xlane.xlu1 %1178  ;;  %v1283_v15 = vadd.f32 %v2211_v19, %v1282_v54  ;;  %2072 = vmatmul.msk.bf16.vlgmr.msrb.gmra.mxu2 %vm964_vm2, %v1328_v44  ;;  %vm1210_vm7 = vweird.f32 %v2213_v37 }
 0x2e1   :  { %v1202_v59 = vsel %vm1199_vm3, %v1201_v22, %v1197_v46  ;;  %2214 = vrcp.f32 %v1188_v48  ;;  %vm1211_vm9 = vmor %vm1209_vm8, %vm1210_vm7  ;;  %v1303_v11 = vand.u32 2147483647, %v1188_v48  ;;  %v1305_v32 = vand.u32 2147483648, %v1188_v48 }
 0x2e2   :  { %v1309_v17 = vmul.f32 %v2843_v23, %v1202_v59  ;;  %v1206_v18 = vsub.f32 1.0, %v1205_v14  ;;  %v1287_v20 = vsel %vm1286_vm5, %v2211_v19, %v1283_v15  ;;  %2216 = vrcp.f32 %v2969_v10 }
 0x2e3   :  { %v1292_v24 = vsel %vm1289_vm6, %v1291_v57, %v1287_v20  ;;  %vm1299_vm12 = vweird.f32 %v1188_v48  ;;  %v1260_v36 = vand.u32 2147483648, %v2969_v10  ;;  %v1258_v41 = vand.u32 2147483647, %v2969_v10 }
 0x2e4   :  { %1317 = vst.msk [vmem:[#allocation9] sm:$0xff] %vm964_vm2, %v1309_v17  ;;  %v1207_v62 = vmul.f32 %v2213_v37, %v1206_v18  ;;  %v1315_v53 = vmul.f32 %v2847_v25, %v1292_v24  ;;  %v1325_v61 = vpack.c.bf16 %v1309_v17, %v1309_v17  ;;  %v1306_v42 = vor.u32 1.1754944e-38, %v1305_v32 }
 0x2e5   :  { %vm1254_vm15 = vweird.f32 %v2969_v10  ;;  %vm1304_vm3 = vcmp.eq.f32.partialorder %v1303_v11, 8.507059e+37  ;;  %v1261_v60 = vor.u32 1.1754944e-38, %v1260_v36  ;;  %vm1259_vm5 = vcmp.eq.f32.partialorder %v1258_v41, 8.507059e+37 }
 0x2e6   :  { %v1208_v23 = vadd.f32 %v2213_v37, %v1207_v62  ;;  %1323 = vst.msk [vmem:[#allocation9 + $0x30] sm:$0xff] %vm964_vm2, %v1315_v53  ;;  %2069 = vmatmul.msk.bf16.vlgmr.msra.gmra.mxu3 %vm964_vm2, %v1325_v61  ;;  %v1331_v31 = vpack.c.bf16 %v1315_v53, %v1315_v53 }
 0x2e7   :  { %v2215_v34 = vpop.eup %2214 }
 0x2e8   :  { %v1212_v26 = vsel %vm1211_vm9, %v2213_v37, %v1208_v23  ;;  %v1295_v16 = vmul.f32 %v2215_v34, %v1188_v48  ;;  %v1182_v12 = vpop.xlane.xlu1 %1181  ;;  %v2217_v4 = vpop.eup %2216  ;;  %2075 = vmatmul.msk.bf16.vlgmr.msra.gmra.mxu1 %vm964_vm2, %v1331_v31  ;;  %vm1300_vm11 = vweird.f32 %v2215_v34 }
 0x2e9   :  { %v1217_v55 = vsel %vm1214_vm10, %v1216_v47, %v1212_v26  ;;  %2218 = vrcp.f32 %v1182_v12  ;;  %v1250_v5 = vmul.f32 %v2217_v4, %v2969_v10  ;;  %vm1255_vm13 = vweird.f32 %v2217_v4  ;;  %vm1301_vm14 = vmor %vm1299_vm12, %vm1300_vm11 }
 0x2ea   :  { %v1310_v25 = vmul.f32 %v2851_v6, %v1217_v55  ;;  %v1296_v30 = vsub.f32 1.0, %v1295_v16  ;;  %vm1256_vm4 = vmor %vm1254_vm15, %vm1255_vm13  ;;  %v1273_v3 = vand.u32 2147483647, %v1182_v12  ;;  %v1275_v45 = vand.u32 2147483648, %v1182_v12 }
 0x2eb   :  { %v1251_v35 = vsub.f32 1.0, %v1250_v5  ;;  %vm1269_vm7 = vweird.f32 %v1182_v12  ;;  %vm1732_vm10 = vcmask 130048   ;;  %vm1735_vm11 = vcmask 195584  }
 0x2ec   :  { %1318 = vst.msk [vmem:[#allocation9 + $0x8] sm:$0xff] %vm964_vm2, %v1310_v25  ;;  %v1297_v33 = vmul.f32 %v2215_v34, %v1296_v30  ;;  %v1326_v51 = vpack.c.bf16 %v1310_v25, %v1310_v25  ;;  %vm1274_vm9 = vcmp.eq.f32.partialorder %v1273_v3, 8.507059e+37 }
 0x2ed   :  { %v1252_v43 = vmul.f32 %v2217_v4, %v1251_v35 }
 0x2ee   :  { %v1298_v38 = vadd.f32 %v2215_v34, %v1297_v33  ;;  %2070 = vmatmul.msk.bf16.vlgmr.msrb.gmra.mxu0 %vm964_vm2, %v1326_v51 }
 0x2ef   :  { %v2219_v6 = vpop.eup %2218  ;;  %v1253_v58 = vadd.f32 %v2217_v4, %v1252_v43 }
 0x2f0   :  { %v1302_v50 = vsel %vm1301_vm14, %v2215_v34, %v1298_v38  ;;  %v1265_v19 = vmul.f32 %v2219_v6, %v1182_v12  ;;  %vm1270_vm6 = vweird.f32 %v2219_v6 }
 0x2f1   :  { %v1307_v13 = vsel %vm1304_vm3, %v1306_v42, %v1302_v50  ;;  %v1257_v49 = vsel %vm1256_vm4, %v2217_v4, %v1253_v58  ;;  %vm1271_vm8 = vmor %vm1269_vm7, %vm1270_vm6  ;;  %vm1918_vm4 = vcmask 523264  }
 0x2f2   :  { %v1316_v39 = vmul.f32 %v2856_v0, %v1307_v13  ;;  %v1266_v7 = vsub.f32 1.0, %v1265_v19  ;;  %v1262_v56 = vsel %vm1259_vm5, %v1261_v60, %v1257_v49  ;;  %v1276_v0 = vor.u32 1.1754944e-38, %v1275_v45 }
 0x2f3   :  { %v1313_v8 = vmul.f32 %v2859_v29, %v1262_v56 }
 0x2f4   :  { %1324 = vst.msk [vmem:[#allocation9 + $0x38] sm:$0xff] %vm964_vm2, %v1316_v39  ;;  %v1267_v9 = vmul.f32 %v2219_v6, %v1266_v7  ;;  %v1332_v63 = vpack.c.bf16 %v1316_v39, %v1316_v39 }
 0x2f5   :  { %1321 = vst.msk [vmem:[#allocation9 + $0x20] sm:$0xff] %vm964_vm2, %v1313_v8  ;;  %v1329_v2 = vpack.c.bf16 %v1313_v8, %v1313_v8 }
 0x2f6   :  { %v1268_v22 = vadd.f32 %v2219_v6, %v1267_v9  ;;  %2076 = vmatmul.msk.bf16.vlgmr.msra.gmra.mxu2 %vm964_vm2, %v1332_v63 }
 0x2f7   :  { %2073 = vmatmul.msk.bf16.vlgmr.msrb.gmra.mxu3 %vm964_vm2, %v1329_v2 }
 0x2f8   :  { %v1272_v37 = vsel %vm1271_vm8, %v2219_v6, %v1268_v22 }
 0x2f9   :  { %v1277_v54 = vsel %vm1274_vm9, %v1276_v0, %v1272_v37 }
 0x2fa   :  { %v1314_v28 = vmul.f32 %v2873_v1, %v1277_v54 }
 0x2fc   :  { %1322 = vst.msk [vmem:[#allocation9 + $0x28] sm:$0xff] %vm964_vm2, %v1314_v28  ;;  %v1330_v29 = vpack.c.bf16 %v1314_v28, %v1314_v28 }
 0x2fe   :  { %2074 = vmatmul.msk.bf16.vlgmr.msra.gmra.mxu0 %vm964_vm2, %v1330_v29 }
 0x355   :  { %v1387_v44 = vpop.f32.mrf.mxu1 }
 0x356   :  { %v1486_v10 = vrot.slane %v1387_v44, 4 }
 0x35d   :  { %v1389_v46 = vpop.f32.mrf.mxu1 }
 0x363   :  { %v1406_v14 = vpop.f32.mrf.mxu2 }
 0x364   :  { %v1498_v59 = vrot.slane %v1406_v14, 4 }
 0x365   :  { %v1463_v48 = vpop.f32.mrf.mxu1 }
 0x366   :  { %v1542_v49 = vrot.slane %v1463_v48, 4 }
 0x369   :  { %v1349_v15 = vpop.f32.mrf.mxu3 }
 0x36a   :  { %v1487_v17 = vsel %vm240_vm1, %v1486_v10, %v1349_v15  ;;  %v1488_v57 = vrot.slane %v1349_v15, 4 }
 0x36b   :  { %v1368_v18 = vpop.f32.mrf.mxu0  ;;  %v1493_v20 = vperm.slane %v1487_v17, %v2535_v27  ;;  %v1408_v24 = vpop.f32.mrf.mxu2 }
 0x36c   :  { %v1499_v1 = vsel %vm240_vm1, %v1498_v59, %v1368_v18  ;;  %v1500_v21 = vrot.slane %v1368_v18, 4  ;;  %v1489_v62 = vsel %vm240_vm1, %v1387_v44, %v1488_v57 }
 0x36d   :  { %v1505_v40 = vperm.slane %v1499_v1, %v2535_v27  ;;  %v1497_v53 = vperm.slane %v1489_v62, %v2535_v27  ;;  %v1512_v61 = vrot.slane %v1493_v20, 4  ;;  %v1465_v34 = vpop.f32.mrf.mxu1 }
 0x36e   :  { %v1501_v23 = vsel %vm240_vm1, %v1406_v14, %v1500_v21 }
 0x36f   :  { %v1509_v47 = vperm.slane %v1501_v23, %v2535_v27  ;;  %v1510_v31 = vrot.slane %v1505_v40, 4  ;;  %v1524_v26 = vrot.slane %v1497_v53, 4  ;;  %v1513_v16 = vsel %vm240_vm1, %v1505_v40, %v1512_v61 }
 0x370   :  { %v1521_v4 = vperm.slane %v1513_v16, %v2551_v52 }
 0x371   :  { %v1511_v12 = vsel %vm240_vm1, %v1510_v31, %v1493_v20  ;;  %v1522_v55 = vrot.slane %v1509_v47, 4  ;;  %v1525_v30 = vsel %vm240_vm1, %v1509_v47, %v1524_v26  ;;  %v1351_v5 = vpop.f32.mrf.mxu3 }
 0x372   :  { %v1517_v25 = vperm.slane %v1511_v12, %v2551_v52  ;;  %v1533_v32 = vperm.slane %v1525_v30, %v2551_v52  ;;  %v1536_v33 = vrot.slane %v1521_v4, 4 }
 0x373   :  { %v1523_v11 = vsel %vm240_vm1, %v1522_v55, %v1497_v53  ;;  %v1370_v35 = vpop.f32.mrf.mxu0 }
 0x374   :  { %v1529_v51 = vperm.slane %v1523_v11, %v2551_v52  ;;  %v1534_v36 = vrot.slane %v1517_v25, 4  ;;  %v1537_v38 = vsel %vm240_vm1, 0.0, %v1536_v33  ;;  %v1540_v43 = vrot.slane %v1533_v32, 4 }
 0x375   :  { %v1603_v42 = vrot.slane %v1537_v38, 4  ;;  %v1598_v58 = vsel %vm240_vm1, %v1536_v33, %v1517_v25 }
 0x376   :  { %v1535_v41 = vsel %vm240_vm1, 0.0, %v1534_v36  ;;  %v1538_v6 = vrot.slane %v1529_v51, 4  ;;  %v1541_v50 = vsel %vm240_vm1, 0.0, %v1540_v43  ;;  %v1609_v13 = vsel %vm240_vm1, %v1540_v43, %v1529_v51 }
 0x377   :  { %v1604_v19 = vsel %vm240_vm1, %v1603_v42, %v1535_v41  ;;  %v1614_v60 = vrot.slane %v1541_v50, 4  ;;  %v1602_v56 = vperm.slane %v1598_v58, %v2535_v27  ;;  %v1613_v22 = vperm.slane %v1609_v13, %v2535_v27 }
 0x378   :  { %v1539_v39 = vsel %vm240_vm1, 0.0, %v1538_v6  ;;  %v1608_v3 = vperm.slane %v1604_v19, %v2535_v27 }
 0x379   :  { %v1482_v7 = vpop.f32.mrf.mxu2  ;;  %v1615_v8 = vsel %vm240_vm1, %v1614_v60, %v1539_v39  ;;  %v1622_v46 = vrot.slane %v1602_v56, 4  ;;  %v1634_v20 = vrot.slane %v1613_v22, 4 }
 0x37a   :  { %v1554_v45 = vrot.slane %v1482_v7, 4  ;;  %v1425_v9 = vpop.f32.mrf.mxu3  ;;  %v1619_v2 = vperm.slane %v1615_v8, %v2535_v27  ;;  %v1620_v59 = vrot.slane %v1608_v3, 4 }
 0x37b   :  { %v1444_v63 = vpop.f32.mrf.mxu0  ;;  %v1543_v0 = vsel %vm240_vm1, %v1542_v49, %v1425_v9  ;;  %v1544_v37 = vrot.slane %v1425_v9, 4  ;;  %v1623_v23 = vsel %vm240_vm1, %v1608_v3, %v1622_v46 }
 0x37c   :  { %v1555_v54 = vsel %vm240_vm1, %v1554_v45, %v1444_v63  ;;  %v1556_v28 = vrot.slane %v1444_v63, 4  ;;  %v1549_v29 = vperm.slane %v1543_v0, %v2535_v27  ;;  %v1632_v1 = vrot.slane %v1619_v2, 4 }
 0x37d   :  { %v1561_v44 = vperm.slane %v1555_v54, %v2535_v27  ;;  %v1545_v14 = vsel %vm240_vm1, %v1463_v48, %v1544_v37  ;;  %v1621_v16 = vsel %vm240_vm1, %v1620_v59, %v1602_v56  ;;  %v1631_v5 = vperm.slane %v1623_v23, %v2551_v52  ;;  %v2118_v23 = vld [vmem:[#allocation5] sm:$0xff] }
 0x37e   :  { %v1557_v10 = vsel %vm240_vm1, %v1482_v7, %v1556_v28  ;;  %v1553_v15 = vperm.slane %v1545_v14, %v2535_v27  ;;  %v1568_v17 = vrot.slane %v1549_v29, 4  ;;  %v1633_v12 = vsel %vm240_vm1, %v1632_v1, %v1613_v22 }
 0x37f   :  { %v1565_v57 = vperm.slane %v1557_v10, %v2535_v27  ;;  %v1566_v18 = vrot.slane %v1561_v44, 4  ;;  %v1635_v11 = vsel %vm240_vm1, %v1619_v2, %v1634_v20  ;;  %v1639_v32 = vperm.slane %v1633_v12, %v2551_v52 }
 0x380   :  { %v1580_v21 = vrot.slane %v1553_v15, 4  ;;  %v1569_v62 = vsel %vm240_vm1, %v1561_v44, %v1568_v17  ;;  %v1627_v41 = vperm.slane %v1621_v16, %v2551_v52  ;;  %v1643_v3 = vperm.slane %v1635_v11, %v2551_v52 }
 0x381   :  { %v1567_v24 = vsel %vm240_vm1, %v1566_v18, %v1549_v29  ;;  %v1578_v40 = vrot.slane %v1565_v57, 4  ;;  %v1484_v53 = vpop.f32.mrf.mxu2  ;;  %v1577_v61 = vperm.slane %v1569_v62, %v2551_v52  ;;  %v1644_v6 = vrot.slane %v1639_v32, 4 }
 0x382   :  { %v1573_v48 = vperm.slane %v1567_v24, %v2551_v52  ;;  %v1581_v47 = vsel %vm240_vm1, %v1565_v57, %v1580_v21  ;;  %v1427_v31 = vpop.f32.mrf.mxu3  ;;  %v1650_v9 = vrot.slane %v1631_v5, 4  ;;  %v1648_v54 = vrot.slane %v1643_v3, 4 }
 0x383   :  { %v1579_v34 = vsel %vm240_vm1, %v1578_v40, %v1553_v15  ;;  %v1446_v26 = vpop.f32.mrf.mxu0  ;;  %v1589_v55 = vperm.slane %v1581_v47, %v2551_v52  ;;  %v1592_v30 = vrot.slane %v1577_v61, 4  ;;  %v1645_v49 = vsel %vm240_vm1, %v1644_v6, %v1627_v41 }
 0x384   :  { %v1585_v4 = vperm.slane %v1579_v34, %v2551_v52  ;;  %v1590_v25 = vrot.slane %v1573_v48, 4  ;;  %v1646_v14 = vrot.slane %v1627_v41, 4  ;;  %v1651_v59 = vsel %vm240_vm1, %v1643_v3, %v1650_v9  ;;  %v2230_v41 = vld [vmem:[%s3179_s2] sm:$0xff] }
 0x385   :  { %v1593_v35 = vsel %vm240_vm1, 0.0, %v1592_v30  ;;  %v1596_v36 = vrot.slane %v1589_v55, 4  ;;  %v1652_v38 = vsel %vm240_vm1, %v1592_v30, %v1573_v48  ;;  %v1649_v1 = vsel %vm240_vm1, %v1648_v54, %v1631_v5 }
 0x386   :  { %v1591_v33 = vsel %vm240_vm1, 0.0, %v1590_v25  ;;  %v1594_v51 = vrot.slane %v1585_v4, 4  ;;  %v1657_v43 = vrot.slane %v1593_v35, 4  ;;  %v1656_v50 = vperm.slane %v1652_v38, %v2535_v27 }
 0x387   :  { %v1597_v42 = vsel %vm240_vm1, 0.0, %v1596_v36  ;;  %v1663_v58 = vsel %vm240_vm1, %v1596_v36, %v1585_v4  ;;  %v1647_v24 = vsel %vm240_vm1, %v1639_v32, %v1646_v14  ;;  %v2181_v36 = vld [vmem:[%s3162_s8] ss:$0 sm:$0xff] }
 0x388   :  { %v1595_v19 = vsel %vm240_vm1, 0.0, %v1594_v51  ;;  %v1658_v13 = vsel %vm240_vm1, %v1657_v43, %v1591_v33  ;;  %v1668_v60 = vrot.slane %v1597_v42, 4  ;;  %v1667_v39 = vperm.slane %v1663_v58, %v2535_v27 }
 0x389   :  { %v1662_v7 = vperm.slane %v1658_v13, %v2535_v27  ;;  %v1676_v56 = vrot.slane %v1656_v50, 4 }
 0x38a   :  { %v1669_v45 = vsel %vm240_vm1, %v1668_v60, %v1595_v19  ;;  %v1688_v8 = vrot.slane %v1667_v39, 4  ;;  %v2231_v19 = vld [vmem:[%s3179_s2 + $0x8] sm:$0xff] }
 0x38b   :  { %v1673_v63 = vperm.slane %v1669_v45, %v2535_v27  ;;  %v1677_v22 = vsel %vm240_vm1, %v1662_v7, %v1676_v56  ;;  %v1674_v2 = vrot.slane %v1662_v7, 4 }
 0x38c   :  { %v1685_v0 = vperm.slane %v1677_v22, %v2551_v52 }
 0x38d   :  { %v1689_v37 = vsel %vm240_vm1, %v1673_v63, %v1688_v8  ;;  %v1675_v28 = vsel %vm240_vm1, %v1674_v2, %v1656_v50  ;;  %v1686_v29 = vrot.slane %v1673_v63, 4 }
 0x38e   :  { %v1697_v44 = vperm.slane %v1689_v37, %v2551_v52  ;;  %v1704_v46 = vrot.slane %v1685_v0, 4  ;;  %v1681_v10 = vperm.slane %v1675_v28, %v2551_v52 }
 0x38f   :  { %v1687_v27 = vsel %vm240_vm1, %v1686_v29, %v1667_v39  ;;  %v2373_v39 = vmov 32.0  }
 0x390   :  { %v1705_v15 = vsel %vm240_vm1, %v1697_v44, %v1704_v46  ;;  %v1702_v17 = vrot.slane %v1697_v44, 4  ;;  %v1693_v57 = vperm.slane %v1687_v27, %v2551_v52  ;;  %v1700_v18 = vrot.slane %v1681_v10, 4  ;;  %v2119_v52 = vld [vmem:[#allocation5 + $0x8] sm:$0xff]  ;;  %v2120_v27 = vld [vmem:[#allocation7] sm:$0xff] }
 0x391   :  { %v2173_v20 = vpack.i.bf16 %v1705_v15, %v1651_v59  ;;  %1768 = vmatpush.bf16.msra.mxu3 %v2119_v52  ;;  %2220 = vrcp.f32 %v2373_v39  ;;  %v2121_v59 = vld [vmem:[#allocation7 + $0x8] sm:$0xff] }
 0x392   :  { %v1703_v21 = vsel %vm240_vm1, %v1702_v17, %v1685_v0  ;;  %v1698_v62 = vrot.slane %v1693_v57, 4  ;;  %v1701_v40 = vsel %vm240_vm1, %v1693_v57, %v1700_v18  ;;  %1871 = vmatpush.bf16.msrb.mxu0 %v2121_v59 }
 0x393   :  { %2174 = vrot.lane.b32.xlu1 %v2173_v20, %s2370_s6  ;;  %v2168_v53 = vpack.i.bf16 %v1703_v21, %v1649_v1  ;;  %v2163_v48 = vpack.i.bf16 %v1701_v40, %v1647_v24 }
 0x394   :  { %v1699_v61 = vsel %vm240_vm1, %v1698_v62, %v1681_v10 }
 0x395   :  { %2169 = vrot.lane.b32.xlu2 %v2168_v53, %s2371_s0  ;;  %2164 = vrot.lane.b32.xlu0 %v2163_v48, %s2372_s11  ;;  %s2374_s0 = smov [#allocation9]  }
 0x396   :  { %1769 = vmatpush.bf16.msra.mxu3 %v2118_v23  ;;  %1872 = vmatpush.bf16.msrb.mxu0 %v2120_v27  ;;  %s2013_s19 = sshll.u32 %s2374_s0, 4  ;;  %s2014_s19 = int_to_ptr.vmem [resolvable:$true] %s2013_s19 }
 0x3ef   :  { %v2170_v34 = vpop.permute.xlu2 %2169 }
 0x3f0   :  { %v2172_v12 = vunpack.i.h.bf16 %v2170_v34  ;;  %v2171_v4 = vunpack.i.l.bf16 %v2170_v34  ;;  %v2182_v34 = vld [vmem:[%s3163_s9] ss:$0 sm:$0xff] }
 0x405   :  { %v2175_v47 = vpop.permute.xlu1 %2174 }
 0x406   :  { %v2177_v55 = vunpack.i.h.bf16 %v2175_v47  ;;  %v2176_v25 = vunpack.i.l.bf16 %v2175_v47 }
 0x407   :  { %v2165_v31 = vpop.permute.xlu0 %2164 }
 0x408   :  { %v2167_v26 = vunpack.i.h.bf16 %v2165_v31  ;;  %v2166_v16 = vunpack.i.l.bf16 %v2165_v31 }
 0x40a   :  { %v1730_v30 = vsel %vm964_vm2, %v1645_v49, %v2166_v16  ;;  %v1731_v5 = vsel %vm964_vm2, %v1699_v61, %v2167_v26  ;;  %v2221_v49 = vpop.eup %2220  ;;  %v2183_v16 = vld [vmem:[%s3164_s10] ss:$0 sm:$0xff] }
 0x40b   :  { %v1733_v11 = vsel %vm1732_vm10, %v1730_v30, %v2171_v4  ;;  %v1734_v32 = vsel %vm1732_vm10, %v1731_v5, %v2172_v12  ;;  %v1787_v7 = vmul.f32 32.0, %v2221_v49  ;;  %vm1791_vm1 = vweird.f32 %v2221_v49 }
 0x40c   :  { %v1736_v33 = vsel %vm1735_vm11, %v1733_v11, %v2176_v25  ;;  %v1737_v35 = vsel %vm1735_vm11, %v1734_v32, %v2177_v55  ;;  %v2125_v11 = vld [vmem:[%s3167_s13 + $0x18] sm:$0xff]  ;;  %v2124_v32 = vld [vmem:[%s3167_s13 + $0x10] sm:$0xff] }
 0x40d   :  { %v1738_v51 = vpack.c.bf16 %v1737_v35, %v1736_v33  ;;  %v1788_v56 = vsub.f32 1.0, %v1787_v7  ;;  %1926 = vmatpush.bf16.msrb.mxu1 %v2125_v11  ;;  %v2123_v33 = vld [vmem:[%s3167_s13 + $0x8] sm:$0xff]  ;;  %v2122_v35 = vld [vmem:[%s3167_s13] sm:$0xff] }
 0x40f   :  { %2085 = vmatmul.msk.bf16.vlgmr.msra.gmra.mxu3 %vm131_vm0, %v1738_v51  ;;  %v1789_v3 = vmul.f32 %v2221_v49, %v1788_v56 }
 0x411   :  { %v1790_v45 = vadd.f32 %v2221_v49, %v1789_v3  ;;  %1927 = vmatpush.bf16.msrb.mxu1 %v2124_v32 }
 0x413   :  { %v3093_v8 = vsel %vm1791_vm1, %v2221_v49, %v1790_v45 }
 0x415   :  { %1928 = vmatpush.bf16.msrb.mxu1 %v2123_v33 }
 0x419   :  { %1929 = vmatpush.bf16.msrb.mxu1 %v2122_v35 }
 0x492   :  { %v1771_v38 = vpop.f32.mrf.mxu3 }
 0x493   :  { %v1772_v43 = vadd.f32 %v2181_v36, %v1771_v38 }
 0x495   :  { %v1776_v6 = vadd.f32 %v2230_v41, %v1772_v43 }
 0x497   :  { %v1780_v42 = vsel %vm131_vm0, %v1776_v6, 0.0 }
 0x498   :  { %1781 = vadd.xlane.f32.xlu0 %v1780_v42 }
 0x49a   :  { %v1773_v50 = vpop.f32.mrf.mxu3 }
 0x49b   :  { %v1774_v58 = vadd.f32 %v2181_v36, %v1773_v50  ;;  %v2184_v36 = vld [vmem:[%s3166_s12] ss:$0 sm:$0xff] }
 0x49d   :  { %v1777_v13 = vadd.f32 %v2231_v19, %v1774_v58  ;;  %v2185_v58 = vld [vmem:[%s3168_s14] ss:$0 sm:$0xff]  ;;  %s2015_s14 = sshll.u32 %s3172_s18, 4  ;;  %s2016_s14 = int_to_ptr.hbm [resolvable:$true] %s2015_s14 }
 0x49e   :  { %2021 = dma.vmem_to_hbm [thread:$0]  %s2014_s19, 1024, %s2016_s14, [#allocation10], %s2375_s1, %s2375_s1, %s2372_s11  }
 0x49f   :  { %v1783_v60 = vsel %vm131_vm0, %v1777_v13, 0.0 }
 0x4a0   :  { %1784 = vadd.xlane.f32.xlu2 %v1783_v60 }
 0x50b   :  { %v1782_v9 = vpop.xlane.xlu0 %1781 }
 0x50c   :  { %v1793_v63 = vmul.f32 %v3093_v8, %v1782_v9 }
 0x50e   :  { %v1795_v22 = vsub.f32 %v1776_v6, %v1793_v63 }
 0x510   :  { %v1797_v2 = vmul.f32 %v1795_v22, %v1795_v22 }
 0x512   :  { %v1799_v0 = vsel %vm131_vm0, %v1797_v2, 0.0 }
 0x513   :  { %v1785_v37 = vpop.xlane.xlu2 %1784  ;;  %1800 = vadd.xlane.f32.xlu1 %v1799_v0 }
 0x514   :  { %v1794_v54 = vmul.f32 %v3093_v8, %v1785_v37 }
 0x516   :  { %v1796_v28 = vsub.f32 %v1777_v13, %v1794_v54 }
 0x518   :  { %v1798_v29 = vmul.f32 %v1796_v28, %v1796_v28 }
 0x51a   :  { %v1802_v44 = vsel %vm131_vm0, %v1798_v29, 0.0 }
 0x51b   :  { %1803 = vadd.xlane.f32.xlu0 %v1802_v44 }
 0x586   :  { %v1801_v46 = vpop.xlane.xlu1 %1800 }
 0x587   :  { %v1805_v14 = vmul.f32 %v1801_v46, %v3093_v8 }
 0x589   :  { %v1807_v10 = vadd.f32 1e-05, %v1805_v14 }
 0x58b   :  { %2222 = vrsqrt.f32 %v1807_v10  ;;  %vm1815_vm12 = vweird.f32 %v1807_v10 }
 0x58e   :  { %v1804_v15 = vpop.xlane.xlu0 %1803 }
 0x58f   :  { %v1806_v17 = vmul.f32 %v1804_v15, %v3093_v8 }
 0x591   :  { %v2223_v57 = vpop.eup %2222  ;;  %v1808_v18 = vadd.f32 1e-05, %v1806_v17 }
 0x592   :  { %v1810_v20 = vmul.f32 %v2223_v57, %v1807_v10  ;;  %vm1816_vm2 = vweird.f32 %v2223_v57 }
 0x593   :  { %2224 = vrsqrt.f32 %v1808_v18  ;;  %vm1817_vm13 = vmor %vm1815_vm12, %vm1816_vm2  ;;  %vm1825_vm15 = vweird.f32 %v1808_v18 }
 0x594   :  { %v1811_v1 = vmul.f32 %v2223_v57, %v1810_v20 }
 0x596   :  { %v1812_v21 = vmul.f32 0.5, %v1811_v1 }
 0x598   :  { %v1813_v24 = vsub.f32 1.5, %v1812_v21 }
 0x599   :  { %v2225_v62 = vpop.eup %2224 }
 0x59a   :  { %v1814_v40 = vmul.f32 %v2223_v57, %v1813_v24  ;;  %v1820_v53 = vmul.f32 %v2225_v62, %v1808_v18  ;;  %vm1826_vm14 = vweird.f32 %v2225_v62 }
 0x59b   :  { %vm1827_vm3 = vmor %vm1825_vm15, %vm1826_vm14 }
 0x59c   :  { %v1821_v48 = vmul.f32 %v2225_v62, %v1820_v53  ;;  %v1818_v61 = vsel %vm1817_vm13, %v2223_v57, %v1814_v40 }
 0x59d   :  { %v1829_v47 = vmul.f32 %v1818_v61, %v1795_v22 }
 0x59e   :  { %v1822_v52 = vmul.f32 0.5, %v1821_v48 }
 0x59f   :  { %v1834_v12 = vmul.f32 %v2182_v34, %v1829_v47 }
 0x5a0   :  { %v1823_v23 = vsub.f32 1.5, %v1822_v52 }
 0x5a1   :  { %v1839_v25 = vadd.f32 %v2183_v16, %v1834_v12 }
 0x5a2   :  { %v1824_v31 = vmul.f32 %v2225_v62, %v1823_v23 }
 0x5a4   :  { %v1828_v26 = vsel %vm1827_vm3, %v2225_v62, %v1824_v31  ;;  %v2186_v62 = vld [vmem:[%s3169_s15] ss:$0 sm:$0xff]  ;;  %s2376_s15 = smov [#allocation8]  }
 0x5a5   :  { %v1830_v4 = vmul.f32 %v1828_v26, %v1796_v28  ;;  %s2000_s23 = sshll.u32 %s2376_s15, 4  ;;  %s2001_s23 = int_to_ptr.vmem [resolvable:$true] %s2000_s23 }
 0x5a7   :  { %v1835_v55 = vmul.f32 %v2182_v34, %v1830_v4 }
 0x5a9   :  { %v1840_v30 = vadd.f32 %v2183_v16, %v1835_v55 }
 0x5ab   :  { %v1841_v5 = vpack.c.bf16 %v1840_v30, %v1839_v25 }
 0x5ad   :  { %2094 = vmatmul.msk.bf16.vlgmr.msrb.gmra.mxu0 %vm131_vm0, %v1841_v5 }
 0x62a   :  { %v1874_v51 = vpop.f32.mrf.mxu0 }
 0x62b   :  { %v1875_v38 = vadd.f32 %v2184_v36, %v1874_v51 }
 0x62d   :  { %v1879_v6 = vmax.f32 %v1875_v38, 0.0 }
 0x632   :  { %v1876_v43 = vpop.f32.mrf.mxu0 }
 0x633   :  { %v1877_v41 = vadd.f32 %v2184_v36, %v1876_v43 }
 0x635   :  { %v1880_v42 = vmax.f32 %v1877_v41, 0.0 }
 0x637   :  { %v1881_v50 = vpack.c.bf16 %v1880_v42, %v1879_v6 }
 0x639   :  { %2111 = vmatmul.msk.bf16.vlgmr.msrb.gmra.mxu1 %vm1918_vm4, %v1881_v50 }
 0x6b6   :  { %v1931_v19 = vpop.f32.mrf.mxu1 }
 0x6b7   :  { %v1932_v13 = vadd.f32 %v2185_v58, %v1931_v19 }
 0x6b9   :  { %v1936_v60 = vadd.f32 %v1932_v13, %v1839_v25 }
 0x6bb   :  { %v1940_v39 = vsel %vm131_vm0, %v1936_v60, 0.0 }
 0x6bc   :  { %1941 = vadd.xlane.f32.xlu2 %v1940_v39 }
 0x6be   :  { %v1933_v49 = vpop.f32.mrf.mxu1 }
 0x6bf   :  { %v1934_v7 = vadd.f32 %v2185_v58, %v1933_v49 }
 0x6c1   :  { %v1937_v56 = vadd.f32 %v1934_v7, %v1840_v30 }
 0x6c3   :  { %v1943_v3 = vsel %vm131_vm0, %v1937_v56, 0.0 }
 0x6c4   :  { %1944 = vadd.xlane.f32.xlu0 %v1943_v3 }
 0x72f   :  { %v1942_v45 = vpop.xlane.xlu2 %1941 }
 0x730   :  { %v1946_v9 = vmul.f32 %v1942_v45, %v3093_v8 }
 0x732   :  { %v1948_v63 = vsub.f32 %v1936_v60, %v1946_v9 }
 0x734   :  { %v1950_v22 = vmul.f32 %v1948_v63, %v1948_v63 }
 0x736   :  { %v1952_v2 = vsel %vm131_vm0, %v1950_v22, 0.0 }
 0x737   :  { %v1945_v0 = vpop.xlane.xlu0 %1944  ;;  %1953 = vadd.xlane.f32.xlu1 %v1952_v2 }
 0x738   :  { %v1947_v37 = vmul.f32 %v1945_v0, %v3093_v8 }
 0x73a   :  { %v1949_v54 = vsub.f32 %v1937_v56, %v1947_v37 }
 0x73c   :  { %v1951_v28 = vmul.f32 %v1949_v54, %v1949_v54 }
 0x73e   :  { %v1955_v29 = vsel %vm131_vm0, %v1951_v28, 0.0 }
 0x73f   :  { %1956 = vadd.xlane.f32.xlu2 %v1955_v29 }
 0x7aa   :  { %v1954_v44 = vpop.xlane.xlu1 %1953 }
 0x7ab   :  { %v1958_v46 = vmul.f32 %v1954_v44, %v3093_v8 }
 0x7ad   :  { %v1960_v14 = vadd.f32 1e-05, %v1958_v46 }
 0x7af   :  { %2226 = vrsqrt.f32 %v1960_v14  ;;  %vm1968_vm6 = vweird.f32 %v1960_v14 }
 0x7b2   :  { %v1957_v10 = vpop.xlane.xlu2 %1956 }
 0x7b3   :  { %v1959_v59 = vmul.f32 %v1957_v10, %v3093_v8  ;;  %v2187_v8 = vld [vmem:[%s3170_s16] ss:$0 sm:$0xff] }
 0x7b5   :  { %v2227_v27 = vpop.eup %2226  ;;  %v1961_v15 = vadd.f32 1e-05, %v1959_v59 }
 0x7b6   :  { %v1963_v17 = vmul.f32 %v2227_v27, %v1960_v14  ;;  %vm1969_vm5 = vweird.f32 %v2227_v27 }
 0x7b7   :  { %2228 = vrsqrt.f32 %v1961_v15  ;;  %vm1970_vm7 = vmor %vm1968_vm6, %vm1969_vm5  ;;  %vm1978_vm9 = vweird.f32 %v1961_v15 }
 0x7b8   :  { %v1964_v57 = vmul.f32 %v2227_v27, %v1963_v17 }
 0x7ba   :  { %v1965_v18 = vmul.f32 0.5, %v1964_v57 }
 0x7bc   :  { %v1966_v20 = vsub.f32 1.5, %v1965_v18 }
 0x7bd   :  { %v2229_v1 = vpop.eup %2228 }
 0x7be   :  { %v1967_v21 = vmul.f32 %v2227_v27, %v1966_v20  ;;  %v1973_v24 = vmul.f32 %v2229_v1, %v1961_v15  ;;  %vm1979_vm8 = vweird.f32 %v2229_v1 }
 0x7bf   :  { %vm1980_vm10 = vmor %vm1978_vm9, %vm1979_vm8 }
 0x7c0   :  { %v1971_v40 = vsel %vm1970_vm7, %v2227_v27, %v1967_v21  ;;  %v1974_v53 = vmul.f32 %v2229_v1, %v1973_v24 }
 0x7c1   :  { %v1982_v48 = vmul.f32 %v1971_v40, %v1948_v63 }
 0x7c2   :  { %v1975_v61 = vmul.f32 0.5, %v1974_v53 }
 0x7c3   :  { %v1987_v52 = vmul.f32 %v2186_v62, %v1982_v48 }
 0x7c4   :  { %v1976_v23 = vsub.f32 1.5, %v1975_v61 }
 0x7c5   :  { %v1992_v34 = vadd.f32 %v2187_v8, %v1987_v52 }
 0x7c6   :  { %v1977_v47 = vmul.f32 %v2229_v1, %v1976_v23 }
 0x7c7   :  { %1994 = vst.msk [vmem:[#allocation8] sm:$0xff] %vm131_vm0, %v1992_v34 }
 0x7c8   :  { %v1981_v31 = vsel %vm1980_vm10, %v2229_v1, %v1977_v47 }
 0x7c9   :  { %v1983_v26 = vmul.f32 %v1981_v31, %v1949_v54 }
 0x7cb   :  { %v1988_v16 = vmul.f32 %v2186_v62, %v1983_v26 }
 0x7cd   :  { %v1993_v12 = vadd.f32 %v2187_v8, %v1988_v16 }
 0x7cf   :  { %1995 = vst.msk [vmem:[#allocation8 + $0x8] sm:$0xff] %vm131_vm0, %v1993_v12 }
 0x7d0   :  { %2008 = dma.vmem_to_hbm [thread:$0]  %s2001_s23, 256, %s2003_s24, [#allocation4], %s2375_s1, %s2375_s1, %s2372_s11  }
 0x7d1   :  { %2356 = dma.done.wait [#allocation4], 256  }
 0x7d2   :  { %2357 = vsyncadd [#allocation4], 4294967040 }
 0x7d3   :  { %2358 = dma.done.wait [#allocation10], 1024  }
 0x7d4   :  { %2359 = vsyncadd [#allocation10], 4294966272 }
 0x7d5   :  { %2030 = vsyncpa [#allocation3], 1 }
 0x7d6   :  { %2031 = vsyncpa [#allocation6], 1 }
 0x7d7   :  { %2032 = vsyncpa [#allocation4], 1 }
 0x7d8   :  { %2033 = vsyncpa [#allocation10], 1 }

// kernel: tpu_custom_call.1
= control target key start
LH: loop header
LB: loop body
LE: loop exit
PB: predicated region body
PF: predicated region fallthrough
CT: control target
= control target key end

     0   :  { %s3154_s0 = inlined_call_operand.vmem [shape: f32[2,8,32], index: 0, kind: input, shape index: {}]   ;;  %s3155_s1 = inlined_call_operand.vmem [shape: bf16[32,32], index: 1, kind: input, shape index: {}]   ;;  %s3156_s2 = inlined_call_operand.vmem [shape: f32[1,32], index: 2, kind: input, shape index: {}]   ;;  %s3157_s3 = inlined_call_operand.vmem [shape: bf16[32,32], index: 3, kind: input, shape index: {}]   ;;  %s3158_s4 = inlined_call_operand.vmem [shape: f32[1,32], index: 4, kind: input, shape index: {}]   ;;  %s3159_s5 = inlined_call_operand.hbm [shape: bf16[32,32], index: 5, kind: input, shape index: {}]   ;;  %s3160_s6 = inlined_call_operand.vmem [shape: f32[1,32], index: 6, kind: input, shape index: {}]   ;;  %s3161_s7 = inlined_call_operand.hbm [shape: bf16[32,32], index: 7, kind: input, shape index: {}]   ;;  %s3162_s8 = inlined_call_operand.vmem [shape: f32[1,32], index: 8, kind: input, shape index: {}]   ;;  %s3163_s9 = inlined_call_operand.vmem [shape: f32[1,32], index: 9, kind: input, shape index: {}]   ;;  %s3164_s10 = inlined_call_operand.vmem [shape: f32[1,32], index: 10, kind: input, shape index: {}]   ;;  %s3165_s11 = inlined_call_operand.hbm [shape: bf16[32,64], index: 11, kind: input, shape index: {}]   ;;  %s3166_s12 = inlined_call_operand.vmem [shape: f32[1,64], index: 12, kind: input, shape index: {}]   ;;  %s3167_s13 = inlined_call_operand.vmem [shape: bf16[64,32], index: 13, kind: input, shape index: {}]   ;;  %s3168_s14 = inlined_call_operand.vmem [shape: f32[1,32], index: 14, kind: input, shape index: {}]   ;;  %s3169_s15 = inlined_call_operand.vmem [shape: f32[1,32], index: 15, kind: input, shape index: {}]   ;;  %s3170_s16 = inlined_call_operand.vmem [shape: f32[1,32], index: 16, kind: input, shape index: {}]   ;;  %s3171_s17 = inlined_call_operand.hbm [shape: f32[2,8,32], index: 17, kind: output, shape index: {0}]   ;;  %s3172_s18 = inlined_call_operand.hbm [shape: f32[2,4,8,8], index: 18, kind: output, shape index: {1}]  }
   0x1   :  { %3175 = sst [smem:[#allocation15_spill]] %s3154_s0 }
   0x2   :  { %3176 = sst [smem:[#allocation16_spill]] %s3155_s1 }
   0x3   :  { %3177 = sst [smem:[#allocation17_spill]] %s3156_s2 }
   0x4   :  { %24 = vsyncpa [#allocation3], 0 }
   0x5   :  { %25 = vsyncpa [#allocation6], 0 }
   0x6   :  { %26 = vsyncpa [#allocation4], 0 }
   0x7   :  { %27 = vsyncpa [#allocation10], 0  ;;  %s57_s29 = sshll.u32 %s3161_s7, 4  ;;  %s2360_s30 = smov [#allocation5]   ;;  %s58_s29 = int_to_ptr.hbm [resolvable:$true] %s57_s29 }
   0x8   :  { %s59_s0 = sshll.u32 %s2360_s30, 4  ;;  %s42_s20 = sshll.u32 %s3159_s5, 4  ;;  %s60_s0 = int_to_ptr.vmem [resolvable:$true] %s59_s0  ;;  %s43_s20 = int_to_ptr.hbm [resolvable:$true] %s42_s20 }
   0x9   :  { %s2361_s21 = smov 64   ;;  %s2362_s22 = smov 4  }
   0xa   :  { %65 = dma.hbm_to_vmem [thread:$0]  %s58_s29, 256, %s60_s0, [#allocation6], %s2361_s21, %s2361_s21, %s2362_s22  }
   0xb   :  { %s2363_s2 = smov [#allocation2]   ;;  %s76_s26 = sshll.u32 %s3165_s11, 4  ;;  %s77_s26 = int_to_ptr.hbm [resolvable:$true] %s76_s26 }
   0xc   :  { %s44_s23 = sshll.u32 %s2363_s2, 4  ;;  %s2364_s7 = smov [#allocation7]   ;;  %s45_s23 = int_to_ptr.vmem [resolvable:$true] %s44_s23 }
   0xd   :  { %50 = dma.hbm_to_vmem [thread:$0]  %s43_s20, 256, %s45_s23, [#allocation3], %s2361_s21, %s2361_s21, %s2362_s22  }
   0xe   :  { %s78_s27 = sshll.u32 %s2364_s7, 4  ;;  %s79_s27 = int_to_ptr.vmem [resolvable:$true] %s78_s27 }
   0xf   :  { %84 = dma.hbm_to_vmem [thread:$0]  %s77_s26, 256, %s79_s27, [#allocation6], %s2361_s21, %s2361_s21, %s2362_s22  }
  0x10   :  { %2352 = dma.done.wait [#allocation3], 256  }
  0x11   :  { %2353 = vsyncadd [#allocation3], 4294967040 }
  0x12   :  { %2354 = dma.done.wait [#allocation6], 512  }
  0x13   :  { %2355 = vsyncadd [#allocation6], 4294966784  ;;  %s3178_s29 = sld [smem:[#allocation16_spill]]  ;;  %v2115_v1 = vld [vmem:[%s3157_s3 + $0x8] sm:$0xff]  ;;  %v2114_v3 = vld [vmem:[%s3157_s3] sm:$0xff]  ;;  %vm131_vm0 = vcmask 261120  }
  0x14   :  { %s3179_s2 = sld [smem:[#allocation15_spill]]  ;;  %175 = vmatpush.bf16.msra.mxu1 %v2115_v1  ;;  %v2179_v8 = vld [vmem:[%s3158_s4] ss:$0 sm:$0xff]  ;;  %s2365_s5 = smov 104   ;;  %v2117_v21 = vld [vmem:[#allocation2 + $0x8] sm:$0xff]  ;;  %vm240_vm1 = vcmask 1047556  }
  0x15   :  { %s3180_s26 = sld [smem:[#allocation17_spill]]  ;;  %s2366_s28 = smov 120   ;;  %209 = vmatpush.bf16.msra.mxu2 %v2117_v21  ;;  %v2368_v24 = vmov 1983009808   ;;  %v2116_v26 = vld [vmem:[#allocation2] sm:$0xff]  ;;  %vm964_vm2 = vcmask 64512  }
  0x16   :  { %s2367_s4 = smov 112   ;;  %v245_v25 = vunpack.c.l.s4 %v2368_v24  ;;  %v2369_v33 = vmov 1934713408   ;;  %vm1336_vm3 = vcmask 1043456   ;;  %s2371_s0 = smov 16  }
  0x17   :  { %v269_v34 = vunpack.c.l.s4 %v2369_v33  ;;  %s2372_s11 = smov 8   ;;  %s2375_s1 = smov 128  }
  0x18   :  { %176 = vmatpush.bf16.msra.mxu1 %v2114_v3  ;;  %v2535_v27 = vunpack.c.0.s8 %v245_v25  ;;  %s2002_s24 = sshll.u32 %s3171_s17, 4  ;;  %s2003_s24 = int_to_ptr.hbm [resolvable:$true] %s2002_s24 }
  0x19   :  { %v2113_v0 = vld [vmem:[%s3178_s29 + $0x8] sm:$0xff]  ;;  %v2112_v2 = vld [vmem:[%s3178_s29] sm:$0xff]  ;;  %210 = vmatpush.bf16.msra.mxu2 %v2116_v26  ;;  %v2551_v52 = vunpack.c.0.s8 %v269_v34 }
  0x1a   :  { %v108_v4 = vld [vmem:[%s3179_s2] sm:$0xff]  ;;  %141 = vmatpush.bf16.msra.mxu0 %v2113_v0  ;;  %v109_v5 = vld [vmem:[%s3179_s2 + $0x8] sm:$0xff] }
  0x1b   :  { %v110_v6 = vpack.c.bf16 %v109_v5, %v108_v4  ;;  %v2178_v7 = vld [vmem:[%s3180_s26] ss:$0 sm:$0xff] }
  0x1d   :  { %2051 = vmatmul.msk.bf16.vlgmr.msra.gmra.mxu1 %vm131_vm0, %v110_v6  ;;  %2060 = vmatmul.msk.bf16.vlgmr.msra.gmra.mxu2 %vm131_vm0, %v110_v6 }
  0x1e   :  { %142 = vmatpush.bf16.msra.mxu0 %v2112_v2 }
  0x21   :  { %2042 = vmatmul.msk.bf16.vlgmr.msra.gmra.mxu0 %vm131_vm0, %v110_v6 }
  0x9a   :  { %v178_v10 = vpop.f32.mrf.mxu1 }
  0x9b   :  { %v2507_v12 = vadd.f32 %v2179_v8, %v178_v10 }
  0x9d   :  { %482 = vrot.lane.b32.xlu1 %v2507_v12, %s2365_s5  ;;  %v490_v44 = vrot.slane %v2507_v12, 4 }
  0x9e   :  { %v144_v9 = vpop.f32.mrf.mxu0 }
  0x9f   :  { %v145_v11 = vadd.f32 %v2178_v7, %v144_v9 }
  0xa1   :  { %v217_v13 = vmul.f32 0.35355338, %v145_v11 }
  0xa2   :  { %v180_v15 = vpop.f32.mrf.mxu1 }
  0xa3   :  { %233 = vrot.lane.b32.xlu2 %v217_v13, %s2365_s5  ;;  %v2143_v14 = vpack.i.bf16 %v217_v13, %v2507_v12  ;;  %v2514_v16 = vadd.f32 %v2179_v8, %v180_v15  ;;  %v242_v35 = vrot.slane %v217_v13, 4 }
  0xa5   :  { %2144 = vrot.lane.b32.xlu0 %v2143_v14, %s2366_s28  ;;  %227 = vrot.lane.b32.xlu1 %v217_v13, %s2367_s4  ;;  %v546_v45 = vrot.slane %v2514_v16, 4 }
  0xa6   :  { %v146_v17 = vpop.f32.mrf.mxu0 }
  0xa7   :  { %v147_v18 = vadd.f32 %v2178_v7, %v146_v17 }
  0xa9   :  { %v2521_v19 = vmul.f32 0.35355338, %v147_v18 }
  0xab   :  { %472 = vrot.lane.b32.xlu2 %v2514_v16, %s2366_s28  ;;  %v298_v53 = vrot.slane %v2521_v19, 4 }
  0xad   :  { %476 = vrot.lane.b32.xlu0 %v2507_v12, %s2367_s4  ;;  %484 = vrot.lane.b32.xlu1 %v2514_v16, %s2365_s5 }
  0xb3   :  { %223 = vrot.lane.b32.xlu2 %v2521_v19, %s2366_s28 }
  0xb5   :  { %478 = vrot.lane.b32.xlu0 %v2514_v16, %s2367_s4  ;;  %235 = vrot.lane.b32.xlu1 %v2521_v19, %s2365_s5 }
  0xbd   :  { %229 = vrot.lane.b32.xlu0 %v2521_v19, %s2367_s4 }
  0xfd   :  { %v234_v20 = vpop.permute.xlu2 %233 }
  0xfe   :  { %v252_v29 = vrot.slane %v234_v20, 4 }
 0x105   :  { %v2533_v22 = vpop.permute.xlu2 %472 }
 0x106   :  { %v558_v54 = vrot.slane %v2533_v22, 4 }
 0x10d   :  { %v2540_v40 = vpop.permute.xlu2 %223 }
 0x10e   :  { %v310_v55 = vrot.slane %v2540_v40, 4 }
 0x10f   :  { %v483_v23 = vpop.permute.xlu1 %482 }
 0x110   :  { %v500_v30 = vrot.slane %v483_v23, 4 }
 0x117   :  { %v2145_v28 = vpop.permute.xlu0 %2144  ;;  %v228_v43 = vpop.permute.xlu1 %227 }
 0x118   :  { %v2147_v31 = vunpack.i.h.bf16 %v2145_v28  ;;  %v2146_v32 = vunpack.i.l.bf16 %v2145_v28  ;;  %v239_v48 = vrot.slane %v228_v43, 4  ;;  %v243_v49 = vsel %vm240_vm1, %v228_v43, %v242_v35 }
 0x119   :  { %v251_v57 = vperm.slane %v243_v49, %v2535_v27 }
 0x11a   :  { %v253_v36 = vsel %vm240_vm1, %v252_v29, %v2147_v31  ;;  %v254_v37 = vrot.slane %v2147_v31, 4  ;;  %v501_v38 = vsel %vm240_vm1, %v500_v30, %v2146_v32  ;;  %v502_v39 = vrot.slane %v2146_v32, 4 }
 0x11b   :  { %v259_v41 = vperm.slane %v253_v36, %v2535_v27  ;;  %v507_v42 = vperm.slane %v501_v38, %v2535_v27  ;;  %v241_v56 = vsel %vm240_vm1, %v239_v48, %v217_v13  ;;  %v278_v0 = vrot.slane %v251_v57, 4 }
 0x11c   :  { %v255_v46 = vsel %vm240_vm1, %v234_v20, %v254_v37  ;;  %v503_v47 = vsel %vm240_vm1, %v483_v23, %v502_v39  ;;  %v247_v61 = vperm.slane %v241_v56, %v2535_v27 }
 0x11d   :  { %v263_v50 = vperm.slane %v255_v46, %v2535_v27  ;;  %v511_v51 = vperm.slane %v503_v47, %v2535_v27  ;;  %v264_v58 = vrot.slane %v259_v41, 4  ;;  %v512_v60 = vrot.slane %v507_v42, 4 }
 0x11e   :  { %v266_v4 = vrot.slane %v247_v61, 4 }
 0x11f   :  { %v276_v59 = vrot.slane %v263_v50, 4  ;;  %v477_v62 = vpop.permute.xlu0 %476  ;;  %v524_v63 = vrot.slane %v511_v51, 4  ;;  %v265_v3 = vsel %vm240_vm1, %v264_v58, %v247_v61  ;;  %v279_v8 = vsel %vm240_vm1, %v263_v50, %v278_v0  ;;  %v485_v17 = vpop.permute.xlu1 %484 }
 0x120   :  { %v488_v1 = vrot.slane %v477_v62, 4  ;;  %v491_v2 = vsel %vm240_vm1, %v477_v62, %v490_v44  ;;  %v271_v7 = vperm.slane %v265_v3, %v2551_v52  ;;  %v267_v11 = vsel %vm240_vm1, %v259_v41, %v266_v4 }
 0x121   :  { %v277_v5 = vsel %vm240_vm1, %v276_v59, %v251_v57  ;;  %v499_v6 = vperm.slane %v491_v2, %v2535_v27  ;;  %v287_v13 = vperm.slane %v279_v8, %v2551_v52  ;;  %v275_v18 = vperm.slane %v267_v11, %v2551_v52 }
 0x122   :  { %v283_v9 = vperm.slane %v277_v5, %v2551_v52  ;;  %v489_v10 = vsel %vm240_vm1, %v488_v1, %v2507_v12  ;;  %v288_v20 = vrot.slane %v271_v7, 4  ;;  %v556_v58 = vrot.slane %v485_v17, 4 }
 0x123   :  { %v495_v14 = vperm.slane %v489_v10, %v2535_v27  ;;  %v525_v15 = vsel %vm240_vm1, %v524_v63, %v499_v6  ;;  %v526_v23 = vrot.slane %v499_v6, 4  ;;  %v294_v24 = vrot.slane %v287_v13, 4 }
 0x124   :  { %v292_v21 = vrot.slane %v283_v9, 4  ;;  %v531_v12 = vperm.slane %v525_v15, %v2551_v52  ;;  %v2576_v28 = vsel %vm240_vm1, 0.0, %v288_v20  ;;  %v290_v29 = vrot.slane %v275_v18, 4 }
 0x125   :  { %v513_v25 = vsel %vm240_vm1, %v512_v60, %v495_v14  ;;  %v514_v26 = vrot.slane %v495_v14, 4  ;;  %v295_v32 = vsel %vm240_vm1, 0.0, %v294_v24  ;;  %v363_v33 = vsel %vm240_vm1, %v294_v24, %v283_v9 }
 0x126   :  { %v293_v30 = vsel %vm240_vm1, 0.0, %v292_v21  ;;  %v2580_v31 = vperm.slane %v513_v25, %v2551_v52  ;;  %v527_v35 = vsel %vm240_vm1, %v511_v51, %v526_v23  ;;  %v2587_v37 = vsel %vm240_vm1, 0.0, %v290_v29 }
 0x127   :  { %v515_v34 = vsel %vm240_vm1, %v507_v42, %v514_v26  ;;  %v479_v36 = vpop.permute.xlu0 %478  ;;  %v352_v38 = vsel %vm240_vm1, %v290_v29, %v271_v7  ;;  %v2591_v39 = vperm.slane %v363_v33, %v2535_v27  ;;  %v368_v41 = vrot.slane %v295_v32, 4  ;;  %v236_v63 = vpop.permute.xlu1 %235 }
 0x128   :  { %v2594_v43 = vperm.slane %v352_v38, %v2535_v27  ;;  %v357_v44 = vrot.slane %v2587_v37, 4  ;;  %v523_v46 = vperm.slane %v515_v34, %v2551_v52  ;;  %v535_v42 = vperm.slane %v527_v35, %v2551_v52 }
 0x129   :  { %v369_v47 = vsel %vm240_vm1, %v368_v41, %v293_v30  ;;  %v388_v48 = vrot.slane %v2591_v39, 4  ;;  %v536_v49 = vrot.slane %v2580_v31, 4  ;;  %v540_v50 = vrot.slane %v531_v12, 4 }
 0x12a   :  { %v2603_v51 = vperm.slane %v369_v47, %v2535_v27  ;;  %v538_v56 = vrot.slane %v523_v46, 4  ;;  %v542_v57 = vrot.slane %v535_v42, 4  ;;  %v559_v60 = vsel %vm240_vm1, %v485_v17, %v558_v54 }
 0x12b   :  { %v541_v59 = vsel %vm240_vm1, 0.0, %v540_v50  ;;  %v544_v61 = vrot.slane %v479_v36, 4  ;;  %v547_v62 = vsel %vm240_vm1, %v479_v36, %v546_v45  ;;  %v557_v3 = vsel %vm240_vm1, %v556_v58, %v2533_v22 }
 0x12c   :  { %v2611_v0 = vsel %vm240_vm1, 0.0, %v538_v56  ;;  %v543_v1 = vsel %vm240_vm1, 0.0, %v542_v57  ;;  %v611_v2 = vsel %vm240_vm1, %v542_v57, %v531_v12  ;;  %v563_v6 = vperm.slane %v557_v3, %v2535_v27 }
 0x12d   :  { %v605_v4 = vrot.slane %v2611_v0, 4  ;;  %v2619_v54 = vperm.slane %v611_v2, %v2535_v27  ;;  %v616_v5 = vrot.slane %v543_v1, 4  ;;  %v567_v45 = vperm.slane %v559_v60, %v2535_v27 }
 0x12e   :  { %v545_v7 = vsel %vm240_vm1, %v544_v61, %v2514_v16  ;;  %v555_v8 = vperm.slane %v547_v62, %v2535_v27  ;;  %v308_v9 = vrot.slane %v236_v63, 4  ;;  %v568_v22 = vrot.slane %v563_v6, 4 }
 0x12f   :  { %v230_v10 = vpop.permute.xlu0 %229  ;;  %v617_v11 = vsel %vm240_vm1, %v616_v5, %v541_v59  ;;  %v551_v13 = vperm.slane %v545_v7, %v2535_v27  ;;  %v311_v14 = vsel %vm240_vm1, %v236_v63, %v310_v55  ;;  %v580_v15 = vrot.slane %v567_v45, 4 }
 0x130   :  { %v582_v17 = vrot.slane %v555_v8, 4  ;;  %v309_v18 = vsel %vm240_vm1, %v308_v9, %v2540_v40  ;;  %v319_v16 = vperm.slane %v311_v14, %v2535_v27  ;;  %v296_v24 = vrot.slane %v230_v10, 4 }
 0x131   :  { %v569_v20 = vsel %vm240_vm1, %v568_v22, %v551_v13  ;;  %v570_v21 = vrot.slane %v551_v13, 4  ;;  %v315_v23 = vperm.slane %v309_v18, %v2535_v27  ;;  %v581_v26 = vsel %vm240_vm1, %v580_v15, %v555_v8 }
 0x132   :  { %v575_v25 = vperm.slane %v569_v20, %v2551_v52  ;;  %v583_v12 = vsel %vm240_vm1, %v567_v45, %v582_v17  ;;  %v332_v55 = vrot.slane %v319_v16, 4  ;;  %v587_v30 = vperm.slane %v581_v26, %v2551_v52 }
 0x133   :  { %v571_v29 = vsel %vm240_vm1, %v563_v6, %v570_v21  ;;  %v591_v40 = vperm.slane %v583_v12, %v2551_v52  ;;  %v320_v32 = vrot.slane %v315_v23, 4  ;;  %v297_v35 = vsel %vm240_vm1, %v296_v24, %v2521_v19 }
 0x134   :  { %v579_v33 = vperm.slane %v571_v29, %v2551_v52  ;;  %v592_v34 = vrot.slane %v575_v25, 4  ;;  %v299_v36 = vsel %vm240_vm1, %v230_v10, %v298_v53  ;;  %v596_v38 = vrot.slane %v587_v30, 4 }
 0x135   :  { %v598_v41 = vrot.slane %v591_v40, 4  ;;  %v303_v46 = vperm.slane %v297_v35, %v2535_v27  ;;  %v307_v42 = vperm.slane %v299_v36, %v2535_v27  ;;  %v537_v57 = vsel %vm240_vm1, 0.0, %v536_v49 }
 0x136   :  { %v2651_v47 = vsel %vm240_vm1, 0.0, %v592_v34  ;;  %v594_v50 = vrot.slane %v579_v33, 4  ;;  %v600_v58 = vsel %vm240_vm1, %v538_v56, %v2580_v31  ;;  %v597_v59 = vsel %vm240_vm1, 0.0, %v596_v38 }
 0x137   :  { %v599_v19 = vsel %vm240_vm1, 0.0, %v598_v41  ;;  %v665_v53 = vsel %vm240_vm1, %v598_v41, %v587_v30  ;;  %v321_v60 = vsel %vm240_vm1, %v320_v32, %v303_v46  ;;  %v322_v56 = vrot.slane %v303_v46, 4 }
 0x138   :  { %v2661_v61 = vsel %vm240_vm1, 0.0, %v594_v50  ;;  %v2664_v62 = vsel %vm240_vm1, %v594_v50, %v575_v25  ;;  %v2667_v63 = vperm.slane %v665_v53, %v2535_v27  ;;  %v670_v49 = vrot.slane %v599_v19, 4 }
 0x139   :  { %v659_v31 = vrot.slane %v2661_v61, 4  ;;  %v327_v1 = vperm.slane %v321_v60, %v2551_v52  ;;  %v333_v2 = vsel %vm240_vm1, %v332_v55, %v307_v42  ;;  %v334_v6 = vrot.slane %v307_v42, 4 }
 0x13a   :  { %v671_v3 = vsel %vm240_vm1, %v670_v49, %v597_v59  ;;  %v690_v5 = vrot.slane %v2667_v63, 4  ;;  %v339_v45 = vperm.slane %v333_v2, %v2551_v52  ;;  %v323_v8 = vsel %vm240_vm1, %v315_v23, %v322_v56 }
 0x13b   :  { %v2676_v7 = vperm.slane %v671_v3, %v2535_v27  ;;  %v344_v9 = vrot.slane %v327_v1, 4  ;;  %v604_v10 = vperm.slane %v600_v58, %v2535_v27  ;;  %v331_v22 = vperm.slane %v323_v8, %v2551_v52 }
 0x13c   :  { %v335_v13 = vsel %vm240_vm1, %v319_v16, %v334_v6  ;;  %v348_v14 = vrot.slane %v339_v45, 4  ;;  %v606_v15 = vsel %vm240_vm1, %v605_v4, %v537_v57  ;;  %v621_v21 = vperm.slane %v617_v11, %v2535_v27 }
 0x13d   :  { %v343_v17 = vperm.slane %v335_v13, %v2551_v52  ;;  %v345_v18 = vsel %vm240_vm1, 0.0, %v344_v9  ;;  %v610_v20 = vperm.slane %v606_v15, %v2535_v27  ;;  %v346_v23 = vrot.slane %v331_v22, 4 }
 0x13e   :  { %v349_v24 = vsel %vm240_vm1, 0.0, %v348_v14  ;;  %v624_v25 = vrot.slane %v604_v10, 4  ;;  %v636_v26 = vrot.slane %v2619_v54, 4  ;;  %v634_v0 = vrot.slane %v621_v21, 4 }
 0x13f   :  { %v350_v16 = vrot.slane %v343_v17, 4  ;;  %v622_v12 = vrot.slane %v610_v20, 4  ;;  %v347_v4 = vsel %vm240_vm1, 0.0, %v346_v23  ;;  %v406_v55 = vsel %vm240_vm1, %v346_v23, %v327_v1 }
 0x140   :  { %v625_v29 = vsel %vm240_vm1, %v610_v20, %v624_v25  ;;  %v637_v30 = vsel %vm240_vm1, %v621_v21, %v636_v26  ;;  %v2697_v40 = vperm.slane %v406_v55, %v2535_v27  ;;  %v411_v32 = vrot.slane %v347_v4, 4 }
 0x141   :  { %v351_v11 = vsel %vm240_vm1, 0.0, %v350_v16  ;;  %v417_v33 = vsel %vm240_vm1, %v350_v16, %v339_v45  ;;  %v633_v36 = vperm.slane %v625_v29, %v2551_v52  ;;  %v645_v38 = vperm.slane %v637_v30, %v2551_v52 }
 0x142   :  { %v2701_v34 = vperm.slane %v417_v33, %v2535_v27  ;;  %v422_v35 = vrot.slane %v351_v11, 4  ;;  %v412_v41 = vsel %vm240_vm1, %v411_v32, %v345_v18  ;;  %v430_v46 = vrot.slane %v2697_v40, 4 }
 0x143   :  { %v623_v42 = vsel %vm240_vm1, %v622_v12, %v604_v10  ;;  %v635_v50 = vsel %vm240_vm1, %v634_v0, %v2619_v54  ;;  %v2711_v57 = vperm.slane %v412_v41, %v2535_v27  ;;  %v650_v19 = vrot.slane %v645_v38, 4 }
 0x144   :  { %v423_v58 = vsel %vm240_vm1, %v422_v35, %v349_v24  ;;  %v442_v59 = vrot.slane %v2701_v34, 4  ;;  %v629_v60 = vperm.slane %v623_v42, %v2551_v52  ;;  %v641_v49 = vperm.slane %v635_v50, %v2551_v52 }
 0x145   :  { %v2716_v53 = vperm.slane %v423_v58, %v2535_v27  ;;  %v652_v56 = vrot.slane %v633_v36, 4  ;;  %v651_v1 = vsel %vm240_vm1, %v650_v19, %v633_v36  ;;  %v358_v54 = vsel %vm240_vm1, %v357_v44, %v2576_v28 }
 0x146   :  { %v376_v2 = vrot.slane %v2594_v43, 4  ;;  %v389_v3 = vsel %vm240_vm1, %v2603_v51, %v388_v48  ;;  %v710_v45 = vpack.c.bf16 %v651_v1, %v651_v1  ;;  %v646_v8 = vrot.slane %v641_v49, 4 }
 0x147   :  { %v440_v6 = vrot.slane %v2716_v53, 4  ;;  %v653_v9 = vsel %vm240_vm1, %v645_v38, %v652_v56  ;;  %v648_v22 = vrot.slane %v629_v60, 4  ;;  %v362_v13 = vperm.slane %v358_v54, %v2535_v27 }
 0x148   :  { %v711_v10 = vpack.c.bf16 %v653_v9, %v653_v9  ;;  %v397_v37 = vperm.slane %v389_v3, %v2551_v52  ;;  %v1007_v28 = vsel %vm964_vm2, %v710_v45, 0  ;;  %v647_v44 = vsel %vm240_vm1, %v646_v8, %v629_v60 }
 0x149   :  { %v658_v14 = vperm.slane %v2664_v62, %v2535_v27  ;;  %v660_v48 = vsel %vm240_vm1, %v659_v31, %v2651_v47  ;;  %1016 = vmatpush.bf16.xpose.msrb.mxu1 %v1007_v28  ;;  %v708_v15 = vpack.c.bf16 %v647_v44, %v647_v44  ;;  %v649_v18 = vsel %vm240_vm1, %v641_v49, %v648_v22 }
 0x14a   :  { %v1026_v17 = vsel %vm964_vm2, %v711_v10, 0  ;;  %v377_v20 = vsel %vm240_vm1, %v362_v13, %v376_v2  ;;  %v709_v21 = vpack.c.bf16 %v649_v18, %v649_v18  ;;  %v402_v24 = vrot.slane %v397_v37, 4 }
 0x14b   :  { %1035 = vmatpush.bf16.xpose.msrb.mxu2 %v1026_v17  ;;  %v385_v23 = vperm.slane %v377_v20, %v2551_v52  ;;  %v664_v62 = vperm.slane %v660_v48, %v2535_v27  ;;  %v969_v25 = vsel %vm964_vm2, %v708_v15, 0  ;;  %v678_v61 = vrot.slane %v658_v14, 4 }
 0x14c   :  { %v691_v47 = vsel %vm240_vm1, %v2676_v7, %v690_v5  ;;  %v374_v31 = vrot.slane %v362_v13, 4  ;;  %978 = vmatpush.bf16.xpose.msra.mxu3 %v969_v25  ;;  %v988_v26 = vsel %vm964_vm2, %v709_v21, 0  ;;  %v386_v0 = vrot.slane %v2603_v51, 4 }
 0x14d   :  { %v403_v16 = vsel %vm240_vm1, %v402_v24, %v385_v23  ;;  %v699_v12 = vperm.slane %v691_v47, %v2551_v52  ;;  %997 = vmatpush.bf16.xpose.msrb.mxu0 %v988_v26  ;;  %v679_v55 = vsel %vm240_vm1, %v664_v62, %v678_v61  ;;  %v404_v30 = vrot.slane %v385_v23, 4 }
 0x14e   :  { %v462_v4 = vpack.c.bf16 %v403_v16, %v403_v16  ;;  %v375_v29 = vsel %vm240_vm1, %v374_v31, %v2594_v43  ;;  %v687_v5 = vperm.slane %v679_v55, %v2551_v52  ;;  %v387_v33 = vsel %vm240_vm1, %v386_v0, %v2591_v39  ;;  %v212_v16 = vpop.f32.mrf.mxu2 }
 0x14f   :  { %v704_v11 = vrot.slane %v699_v12, 4  ;;  %v381_v32 = vperm.slane %v375_v29, %v2551_v52  ;;  %v393_v35 = vperm.slane %v387_v33, %v2551_v52  ;;  %v405_v51 = vsel %vm240_vm1, %v397_v37, %v404_v30 }
 0x150   :  { %v676_v36 = vrot.slane %v664_v62, 4  ;;  %v688_v38 = vrot.slane %v2676_v7, 4  ;;  %2063 = vmatmul.msk.bf16.vlgmr.msrb.gmra.mxu1 %vm964_vm2, %v462_v4  ;;  %v463_v42 = vpack.c.bf16 %v405_v51, %v405_v51  ;;  %v706_v50 = vrot.slane %v687_v5, 4 }
 0x151   :  { %v705_v43 = vsel %vm240_vm1, %v704_v11, %v687_v5  ;;  %v400_v41 = vrot.slane %v381_v32, 4  ;;  %v398_v19 = vrot.slane %v393_v35, 4  ;;  %v431_v10 = vsel %vm240_vm1, %v2711_v57, %v430_v46 }
 0x152   :  { %v714_v58 = vpack.c.bf16 %v705_v43, %v705_v43  ;;  %v677_v60 = vsel %vm240_vm1, %v676_v36, %v658_v14  ;;  %v689_v39 = vsel %vm240_vm1, %v688_v38, %v2667_v63  ;;  %2064 = vmatmul.msk.bf16.vlgmr.msrb.gmra.mxu2 %vm964_vm2, %v463_v42  ;;  %v707_v56 = vsel %vm240_vm1, %v699_v12, %v706_v50 }
 0x153   :  { %v683_v49 = vperm.slane %v677_v60, %v2551_v52  ;;  %v695_v7 = vperm.slane %v689_v39, %v2551_v52  ;;  %v401_v1 = vsel %vm240_vm1, %v393_v35, %v400_v41  ;;  %v399_v2 = vsel %vm240_vm1, %v398_v19, %v381_v32 }
 0x154   :  { %v1083_v54 = vsel %vm964_vm2, %v714_v58, 0  ;;  %v715_v3 = vpack.c.bf16 %v707_v56, %v707_v56  ;;  %v461_v45 = vpack.c.bf16 %v401_v1, %v401_v1  ;;  %v460_v8 = vpack.c.bf16 %v399_v2, %v399_v2  ;;  %v2180_v56 = vld [vmem:[%s3160_s6] ss:$0 sm:$0xff]  ;;  %s2370_s6 = smov 24  }
 0x155   :  { %1092 = vmatpush.bf16.xpose.msra.mxu1 %v1083_v54  ;;  %v700_v9 = vrot.slane %v695_v7, 4  ;;  %v702_v63 = vrot.slane %v683_v49, 4  ;;  %v439_v13 = vperm.slane %v431_v10, %v2551_v52  ;;  %v443_v37 = vsel %vm240_vm1, %v2716_v53, %v442_v59 }
 0x156   :  { %v1102_v22 = vsel %vm964_vm2, %v715_v3, 0  ;;  %2062 = vmatmul.msk.bf16.vlgmr.msrb.gmra.mxu0 %vm964_vm2, %v461_v45  ;;  %v428_v28 = vrot.slane %v2711_v57, 4  ;;  %2061 = vmatmul.msk.bf16.vlgmr.msra.gmra.mxu3 %vm964_vm2, %v460_v8  ;;  %v451_v14 = vperm.slane %v443_v37, %v2551_v52  ;;  %v441_v59 = vsel %vm240_vm1, %v440_v6, %v2701_v34  ;;  %v214_v12 = vpop.f32.mrf.mxu2 }
 0x157   :  { %v701_v44 = vsel %vm240_vm1, %v700_v9, %v683_v49  ;;  %1111 = vmatpush.bf16.xpose.msra.mxu2 %v1102_v22  ;;  %v703_v46 = vsel %vm240_vm1, %v695_v7, %v702_v63  ;;  %v447_v23 = vperm.slane %v441_v59, %v2551_v52  ;;  %v458_v24 = vrot.slane %v439_v13, 4 }
 0x158   :  { %v712_v48 = vpack.c.bf16 %v701_v44, %v701_v44  ;;  %v713_v15 = vpack.c.bf16 %v703_v46, %v703_v46  ;;  %v429_v17 = vsel %vm240_vm1, %v428_v28, %v2697_v40  ;;  %v456_v57 = vrot.slane %v451_v14, 4 }
 0x159   :  { %v435_v18 = vperm.slane %v429_v17, %v2551_v52  ;;  %v452_v25 = vrot.slane %v447_v23, 4  ;;  %v459_v53 = vsel %vm240_vm1, %v451_v14, %v458_v24  ;;  %v2826_v54 = vadd.f32 %v2180_v56, %v212_v16 }
 0x15a   :  { %v1045_v20 = vsel %vm964_vm2, %v712_v48, 0  ;;  %v1064_v21 = vsel %vm964_vm2, %v713_v15, 0  ;;  %v457_v62 = vsel %vm240_vm1, %v456_v57, %v439_v13  ;;  %v467_v34 = vpack.c.bf16 %v459_v53, %v459_v53 }
 0x15b   :  { %1054 = vmatpush.bf16.xpose.msrb.mxu3 %v1045_v20  ;;  %1073 = vmatpush.bf16.xpose.msra.mxu0 %v1064_v21  ;;  %v454_v40 = vrot.slane %v435_v18, 4  ;;  %v466_v61 = vpack.c.bf16 %v457_v62, %v457_v62  ;;  %v453_v47 = vsel %vm240_vm1, %v452_v25, %v435_v18  ;;  %v2828_v2 = vadd.f32 %v2180_v56, %v214_v12 }
 0x15c   :  { %v464_v26 = vpack.c.bf16 %v453_v47, %v453_v47 }
 0x15d   :  { %v455_v6 = vsel %vm240_vm1, %v447_v23, %v454_v40  ;;  %v2153_v3 = vpack.i.bf16 %v2828_v2, %v2826_v54 }
 0x15e   :  { %v465_v31 = vpack.c.bf16 %v455_v6, %v455_v6 }
 0x160   :  { %2067 = vmatmul.msk.bf16.vlgmr.msra.gmra.mxu1 %vm964_vm2, %v466_v61 }
 0x162   :  { %2068 = vmatmul.msk.bf16.vlgmr.msra.gmra.mxu2 %vm964_vm2, %v467_v34 }
 0x166   :  { %2066 = vmatmul.msk.bf16.vlgmr.msra.gmra.mxu0 %vm964_vm2, %v465_v31  ;;  %2065 = vmatmul.msk.bf16.vlgmr.msrb.gmra.mxu3 %vm964_vm2, %v464_v26 }
 0x1cd   :  { %v1018_v0 = vpop.f32.mrf.mxu1 }
 0x1ce   :  { %v1123_v4 = vsel %vm964_vm2, %v1018_v0, -inf }
 0x1cf   :  { %1124 = vmax.xlane.f32.xlu1 %v1123_v4 }
 0x1d3   :  { %v999_v55 = vpop.f32.mrf.mxu0 }
 0x1d4   :  { %v1120_v29 = vsel %vm964_vm2, %v999_v55, -inf }
 0x1d5   :  { %1121 = vmax.xlane.f32.xlu2 %v1120_v29  ;;  %v1020_v30 = vpop.f32.mrf.mxu1  ;;  %v1037_v5 = vpop.f32.mrf.mxu2 }
 0x1d6   :  { %v1126_v11 = vsel %vm964_vm2, %v1037_v5, -inf }
 0x1d7   :  { %1127 = vmax.xlane.f32.xlu0 %v1126_v11 }
 0x1d9   :  { %v980_v32 = vpop.f32.mrf.mxu3 }
 0x1da   :  { %v1117_v35 = vsel %vm964_vm2, %v980_v32, -inf }
 0x1db   :  { %v1001_v33 = vpop.f32.mrf.mxu0 }
 0x1dd   :  { %1118 = vmax.xlane.f32.xlu2 %v1117_v35  ;;  %v1039_v51 = vpop.f32.mrf.mxu2  ;;  %v1094_v36 = vpop.f32.mrf.mxu1 }
 0x1de   :  { %v1135_v38 = vsel %vm964_vm2, %v1094_v36, -inf }
 0x1df   :  { %1136 = vmax.xlane.f32.xlu1 %v1135_v38 }
 0x1e1   :  { %v982_v43 = vpop.f32.mrf.mxu3 }
 0x1e3   :  { %v2817_v41 = vpop.f32.mrf.mxu0 }
 0x1e4   :  { %v1132_v42 = vsel %vm964_vm2, %v2817_v41, -inf }
 0x1e5   :  { %1133 = vmax.xlane.f32.xlu2 %v1132_v42  ;;  %v1096_v50 = vpop.f32.mrf.mxu1  ;;  %v1113_v58 = vpop.f32.mrf.mxu2 }
 0x1e6   :  { %v1138_v19 = vsel %vm964_vm2, %v1113_v58, -inf }
 0x1e7   :  { %1139 = vmax.xlane.f32.xlu0 %v1138_v19 }
 0x1e9   :  { %v1056_v60 = vpop.f32.mrf.mxu3 }
 0x1ea   :  { %v1129_v49 = vsel %vm964_vm2, %v1056_v60, -inf }
 0x1eb   :  { %v1077_v39 = vpop.f32.mrf.mxu0 }
 0x1ed   :  { %1130 = vmax.xlane.f32.xlu2 %v1129_v49  ;;  %v1115_v7 = vpop.f32.mrf.mxu2 }
 0x1f1   :  { %v1058_v1 = vpop.f32.mrf.mxu3 }
 0x1f8   :  { %2154 = vrot.lane.b32.xlu1 %v2153_v3, %s2367_s4 }
 0x1fb   :  { %2149 = vrot.lane.b32.xlu0 %v2153_v3, %s2366_s28 }
 0x205   :  { %2159 = vrot.lane.b32.xlu2 %v2153_v3, %s2365_s5 }
 0x242   :  { %v1125_v45 = vpop.xlane.xlu1 %1124 }
 0x243   :  { %v1143_v8 = vsub.f32 %v1018_v0, %v1125_v45 }
 0x245   :  { %v1153_v9 = vmul.f32 1.442695, %v1143_v8 }
 0x247   :  { %2188 = vpow2.f32 %v1153_v9 }
 0x248   :  { %v1122_v63 = vpop.xlane.xlu2 %1121 }
 0x249   :  { %v1142_v14 = vsub.f32 %v999_v55, %v1122_v63  ;;  %v738_v55 = vrot.slane %v2826_v54, 4 }
 0x24a   :  { %v1128_v10 = vpop.xlane.xlu0 %1127 }
 0x24b   :  { %v1144_v22 = vsub.f32 %v1037_v5, %v1128_v10  ;;  %v1151_v18 = vmul.f32 1.442695, %v1142_v14  ;;  %v794_v5 = vrot.slane %v2828_v2, 4 }
 0x24d   :  { %v2835_v13 = vpop.eup %2188  ;;  %v1155_v37 = vmul.f32 1.442695, %v1144_v22 }
 0x24e   :  { %v1171_v28 = vsel %vm964_vm2, %v2835_v13, 0.0 }
 0x24f   :  { %2190 = vpow2.f32 %v1155_v37  ;;  %1172 = vadd.xlane.f32.xlu2 %v1171_v28 }
 0x250   :  { %v1119_v44 = vpop.xlane.xlu2 %1118 }
 0x251   :  { %v1141_v46 = vsub.f32 %v980_v32, %v1119_v44 }
 0x252   :  { %v1137_v15 = vpop.xlane.xlu1 %1136 }
 0x253   :  { %v1149_v48 = vmul.f32 1.442695, %v1141_v46  ;;  %v1147_v17 = vsub.f32 %v1094_v36, %v1137_v15 }
 0x255   :  { %2192 = vpow2.f32 %v1149_v48  ;;  %v2839_v59 = vpop.eup %2190  ;;  %v1161_v57 = vmul.f32 1.442695, %v1147_v17 }
 0x256   :  { %v1174_v20 = vsel %vm964_vm2, %v2839_v59, 0.0 }
 0x257   :  { %2194 = vpow2.f32 %v1161_v57  ;;  %1175 = vadd.xlane.f32.xlu1 %v1174_v20 }
 0x258   :  { %v1134_v21 = vpop.xlane.xlu2 %1133  ;;  %2196 = vpow2.f32 %v1151_v18 }
 0x259   :  { %v1146_v31 = vsub.f32 %v2817_v41, %v1134_v21 }
 0x25a   :  { %v1140_v24 = vpop.xlane.xlu0 %1139 }
 0x25b   :  { %v2843_v23 = vpop.eup %2192  ;;  %v1148_v62 = vsub.f32 %v1113_v58, %v1140_v24  ;;  %v1159_v12 = vmul.f32 1.442695, %v1146_v31 }
 0x25c   :  { %v1165_v40 = vsel %vm964_vm2, %v2843_v23, 0.0 }
 0x25d   :  { %1166 = vadd.xlane.f32.xlu0 %v1165_v40  ;;  %v2847_v25 = vpop.eup %2194  ;;  %v1163_v53 = vmul.f32 1.442695, %v1148_v62 }
 0x25e   :  { %v1183_v61 = vsel %vm964_vm2, %v2847_v25, 0.0  ;;  %v2851_v6 = vpop.eup %2196 }
 0x25f   :  { %1184 = vadd.xlane.f32.xlu2 %v1183_v61  ;;  %2198 = vpow2.f32 %v1163_v53  ;;  %v1168_v16 = vsel %vm964_vm2, %v2851_v6, 0.0 }
 0x260   :  { %v1131_v34 = vpop.xlane.xlu2 %1130 }
 0x261   :  { %v1145_v47 = vsub.f32 %v1056_v60, %v1131_v34 }
 0x263   :  { %v1157_v26 = vmul.f32 1.442695, %v1145_v47 }
 0x265   :  { %2200 = vpow2.f32 %v1157_v26  ;;  %1169 = vadd.xlane.f32.xlu0 %v1168_v16  ;;  %v2856_v0 = vpop.eup %2198 }
 0x266   :  { %2202 = vpow2.f32 %v1159_v12  ;;  %v1186_v32 = vsel %vm964_vm2, %v2856_v0, 0.0 }
 0x268   :  { %v2160_v4 = vpop.permute.xlu2 %2159 }
 0x269   :  { %v2162_v30 = vunpack.i.h.bf16 %v2160_v4  ;;  %v2161_v33 = vunpack.i.l.bf16 %v2160_v4 }
 0x26a   :  { %v2155_v11 = vpop.permute.xlu1 %2154 }
 0x26b   :  { %v2859_v29 = vpop.eup %2200  ;;  %v2157_v35 = vunpack.i.h.bf16 %v2155_v11  ;;  %v2156_v51 = vunpack.i.l.bf16 %v2155_v11  ;;  %v804_v58 = vrot.slane %v2162_v30, 4  ;;  %v748_v39 = vrot.slane %v2161_v33, 4 }
 0x26c   :  { %v1177_v36 = vsel %vm964_vm2, %v2859_v29, 0.0  ;;  %v2873_v1 = vpop.eup %2202 }
 0x26d   :  { %1187 = vadd.xlane.f32.xlu0 %v1186_v32  ;;  %1178 = vadd.xlane.f32.xlu1 %v1177_v36  ;;  %v792_v38 = vrot.slane %v2157_v35, 4  ;;  %v795_v43 = vsel %vm240_vm1, %v2157_v35, %v794_v5  ;;  %v736_v41 = vrot.slane %v2156_v51, 4  ;;  %v739_v42 = vsel %vm240_vm1, %v2156_v51, %v738_v55  ;;  %v2150_v50 = vpop.permute.xlu0 %2149 }
 0x26e   :  { %v2152_v19 = vunpack.i.h.bf16 %v2150_v50  ;;  %v2151_v60 = vunpack.i.l.bf16 %v2150_v50  ;;  %v747_v56 = vperm.slane %v739_v42, %v2535_v27  ;;  %v803_v45 = vperm.slane %v795_v43, %v2535_v27 }
 0x26f   :  { %v793_v49 = vsel %vm240_vm1, %v792_v38, %v2828_v2  ;;  %v737_v7 = vsel %vm240_vm1, %v736_v41, %v2826_v54  ;;  %v1180_v48 = vsel %vm964_vm2, %v2873_v1, 0.0 }
 0x270   :  { %v799_v3 = vperm.slane %v793_v49, %v2535_v27  ;;  %v743_v8 = vperm.slane %v737_v7, %v2535_v27  ;;  %v806_v9 = vrot.slane %v2152_v19, 4  ;;  %v749_v63 = vsel %vm240_vm1, %v748_v39, %v2151_v60 }
 0x271   :  { %v750_v10 = vrot.slane %v2151_v60, 4  ;;  %v805_v22 = vsel %vm240_vm1, %v804_v58, %v2152_v19  ;;  %v755_v54 = vperm.slane %v749_v63, %v2535_v27  ;;  %v774_v44 = vrot.slane %v747_v56, 4 }
 0x272   :  { %v818_v2 = vrot.slane %v799_v3, 4  ;;  %v762_v37 = vrot.slane %v743_v8, 4  ;;  %v811_v28 = vperm.slane %v805_v22, %v2535_v27  ;;  %v807_v14 = vsel %vm240_vm1, %v2162_v30, %v806_v9 }
 0x273   :  { %v751_v46 = vsel %vm240_vm1, %v2161_v33, %v750_v10  ;;  %v760_v17 = vrot.slane %v755_v54, 4  ;;  %v815_v18 = vperm.slane %v807_v14, %v2535_v27  ;;  %v830_v20 = vrot.slane %v803_v45, 4 }
 0x274   :  { %v759_v15 = vperm.slane %v751_v46, %v2535_v27  ;;  %v763_v57 = vsel %vm240_vm1, %v755_v54, %v762_v37  ;;  %v816_v24 = vrot.slane %v811_v28, 4  ;;  %v819_v62 = vsel %vm240_vm1, %v811_v28, %v818_v2 }
 0x275   :  { %1181 = vadd.xlane.f32.xlu1 %v1180_v48  ;;  %v771_v21 = vperm.slane %v763_v57, %v2551_v52  ;;  %v761_v40 = vsel %vm240_vm1, %v760_v17, %v743_v8  ;;  %v827_v34 = vperm.slane %v819_v62, %v2551_v52  ;;  %v828_v55 = vrot.slane %v815_v18, 4 }
 0x276   :  { %v772_v53 = vrot.slane %v759_v15, 4  ;;  %v775_v61 = vsel %vm240_vm1, %v759_v15, %v774_v44  ;;  %v767_v47 = vperm.slane %v761_v40, %v2551_v52  ;;  %v817_v16 = vsel %vm240_vm1, %v816_v24, %v799_v3 }
 0x277   :  { %v783_v31 = vperm.slane %v775_v61, %v2551_v52  ;;  %v786_v26 = vrot.slane %v771_v21, 4  ;;  %v823_v4 = vperm.slane %v817_v16, %v2551_v52  ;;  %v831_v30 = vsel %vm240_vm1, %v815_v18, %v830_v20 }
 0x278   :  { %v773_v12 = vsel %vm240_vm1, %v772_v53, %v747_v56  ;;  %v784_v11 = vrot.slane %v767_v47, 4  ;;  %v829_v35 = vsel %vm240_vm1, %v828_v55, %v803_v45  ;;  %v839_v51 = vperm.slane %v831_v30, %v2551_v52 }
 0x279   :  { %v779_v5 = vperm.slane %v773_v12, %v2551_v52  ;;  %v787_v32 = vsel %vm240_vm1, 0.0, %v786_v26  ;;  %v790_v33 = vrot.slane %v783_v31, 4  ;;  %v840_v36 = vrot.slane %v823_v4, 4 }
 0x27a   :  { %v842_v38 = vrot.slane %v827_v34, 4  ;;  %v785_v43 = vsel %vm240_vm1, 0.0, %v784_v11  ;;  %v835_v50 = vperm.slane %v829_v35, %v2551_v52  ;;  %v846_v60 = vrot.slane %v839_v51, 4 }
 0x27b   :  { %v788_v41 = vrot.slane %v779_v5, 4  ;;  %v791_v42 = vsel %vm240_vm1, 0.0, %v790_v33  ;;  %v841_v58 = vsel %vm240_vm1, 0.0, %v840_v36  ;;  %v848_v39 = vsel %vm240_vm1, %v786_v26, %v767_v47 }
 0x27c   :  { %v843_v19 = vsel %vm240_vm1, 0.0, %v842_v38  ;;  %v844_v49 = vrot.slane %v835_v50, 4  ;;  %v852_v7 = vperm.slane %v848_v39, %v2535_v27  ;;  %v853_v56 = vrot.slane %v787_v32, 4 }
 0x27d   :  { %v864_v3 = vrot.slane %v791_v42, 4  ;;  %v847_v45 = vsel %vm240_vm1, 0.0, %v846_v60  ;;  %v902_v8 = vsel %vm240_vm1, %v842_v38, %v823_v4  ;;  %v907_v9 = vrot.slane %v843_v19, 4 }
 0x27e   :  { %v789_v63 = vsel %vm240_vm1, 0.0, %v788_v41  ;;  %v906_v10 = vperm.slane %v902_v8, %v2535_v27  ;;  %v918_v22 = vrot.slane %v847_v45, 4  ;;  %v854_v2 = vsel %vm240_vm1, %v853_v56, %v785_v43 }
 0x27f   :  { %v859_v37 = vsel %vm240_vm1, %v790_v33, %v779_v5  ;;  %v858_v54 = vperm.slane %v854_v2, %v2535_v27  ;;  %v865_v44 = vsel %vm240_vm1, %v864_v3, %v789_v63  ;;  %v872_v46 = vrot.slane %v852_v7, 4 }
 0x280   :  { %v863_v28 = vperm.slane %v859_v37, %v2535_v27  ;;  %v869_v14 = vperm.slane %v865_v44, %v2535_v27  ;;  %v845_v48 = vsel %vm240_vm1, 0.0, %v844_v49  ;;  %v908_v15 = vsel %vm240_vm1, %v907_v9, %v841_v58 }
 0x281   :  { %v913_v17 = vsel %vm240_vm1, %v846_v60, %v835_v50  ;;  %v873_v57 = vsel %vm240_vm1, %v858_v54, %v872_v46  ;;  %v912_v20 = vperm.slane %v908_v15, %v2535_v27  ;;  %v919_v62 = vsel %vm240_vm1, %v918_v22, %v845_v48 }
 0x282   :  { %v884_v18 = vrot.slane %v863_v28, 4  ;;  %v917_v21 = vperm.slane %v913_v17, %v2535_v27  ;;  %v881_v24 = vperm.slane %v873_v57, %v2551_v52  ;;  %v926_v40 = vrot.slane %v906_v10, 4 }
 0x283   :  { %v870_v53 = vrot.slane %v858_v54, 4  ;;  %v923_v34 = vperm.slane %v919_v62, %v2535_v27  ;;  %v882_v31 = vrot.slane %v869_v14, 4  ;;  %v924_v41 = vrot.slane %v912_v20, 4 }
 0x284   :  { %v885_v61 = vsel %vm240_vm1, %v869_v14, %v884_v18  ;;  %v938_v47 = vrot.slane %v917_v21, 4  ;;  %v900_v16 = vrot.slane %v881_v24, 4  ;;  %v927_v12 = vsel %vm240_vm1, %v912_v20, %v926_v40 }
 0x285   :  { %v893_v26 = vperm.slane %v885_v61, %v2551_v52  ;;  %v871_v4 = vsel %vm240_vm1, %v870_v53, %v852_v7  ;;  %v935_v55 = vperm.slane %v927_v12, %v2551_v52  ;;  %v883_v11 = vsel %vm240_vm1, %v882_v31, %v863_v28 }
 0x286   :  { %v939_v30 = vsel %vm240_vm1, %v923_v34, %v938_v47  ;;  %v877_v5 = vperm.slane %v871_v4, %v2551_v52  ;;  %v889_v51 = vperm.slane %v883_v11, %v2551_v52  ;;  %v936_v19 = vrot.slane %v923_v34, 4 }
 0x287   :  { %v901_v32 = vsel %vm240_vm1, %v893_v26, %v900_v16  ;;  %v898_v33 = vrot.slane %v893_v26, 4  ;;  %v947_v35 = vperm.slane %v939_v30, %v2551_v52  ;;  %v954_v38 = vrot.slane %v935_v55, 4 }
 0x288   :  { %v959_v36 = vpack.c.bf16 %v901_v32, %v901_v32  ;;  %v896_v43 = vrot.slane %v877_v5, 4  ;;  %v894_v58 = vrot.slane %v889_v51, 4  ;;  %v925_v2 = vsel %vm240_vm1, %v924_v41, %v906_v10 }
 0x289   :  { %v899_v42 = vsel %vm240_vm1, %v898_v33, %v881_v24  ;;  %v952_v50 = vrot.slane %v947_v35, 4  ;;  %v955_v49 = vsel %vm240_vm1, %v947_v35, %v954_v38  ;;  %v931_v28 = vperm.slane %v925_v2, %v2551_v52 }
 0x28a   :  { %v1395_v60 = vsel %vm1336_vm3, %v959_v36, 0  ;;  %v958_v39 = vpack.c.bf16 %v899_v42, %v899_v42  ;;  %v897_v7 = vsel %vm240_vm1, %v889_v51, %v896_v43  ;;  %v963_v56 = vpack.c.bf16 %v955_v49, %v955_v49 }
 0x28b   :  { %1404 = vmatpush.bf16.msrb.mxu2 %v1395_v60  ;;  %v957_v3 = vpack.c.bf16 %v897_v7, %v897_v7  ;;  %v953_v45 = vsel %vm240_vm1, %v952_v50, %v935_v55  ;;  %v895_v8 = vsel %vm240_vm1, %v894_v58, %v877_v5  ;;  %v937_v44 = vsel %vm240_vm1, %v936_v19, %v917_v21 }
 0x28c   :  { %v1376_v9 = vsel %vm1336_vm3, %v958_v39, 0  ;;  %v962_v63 = vpack.c.bf16 %v953_v45, %v953_v45  ;;  %v956_v22 = vpack.c.bf16 %v895_v8, %v895_v8  ;;  %v1471_v37 = vsel %vm1336_vm3, %v963_v56, 0 }
 0x28d   :  { %1385 = vmatpush.bf16.msrb.mxu1 %v1376_v9  ;;  %v1357_v54 = vsel %vm1336_vm3, %v957_v3, 0  ;;  %v943_v48 = vperm.slane %v937_v44, %v2551_v52  ;;  %v950_v10 = vrot.slane %v931_v28, 4 }
 0x28e   :  { %1366 = vmatpush.bf16.msrb.mxu0 %v1357_v54  ;;  %v1452_v46 = vsel %vm1336_vm3, %v962_v63, 0  ;;  %v1338_v14 = vsel %vm1336_vm3, %v956_v22, 0 }
 0x28f   :  { %1480 = vmatpush.bf16.msra.mxu2 %v1471_v37  ;;  %1347 = vmatpush.bf16.msra.mxu3 %v1338_v14  ;;  %v948_v15 = vrot.slane %v943_v48, 4  ;;  %v951_v17 = vsel %vm240_vm1, %v943_v48, %v950_v10 }
 0x290   :  { %v961_v57 = vpack.c.bf16 %v951_v17, %v951_v17 }
 0x291   :  { %1461 = vmatpush.bf16.msra.mxu1 %v1452_v46  ;;  %v949_v18 = vsel %vm240_vm1, %v948_v15, %v931_v28 }
 0x292   :  { %v960_v20 = vpack.c.bf16 %v949_v18, %v949_v18  ;;  %v1433_v21 = vsel %vm1336_vm3, %v961_v57, 0 }
 0x293   :  { %1442 = vmatpush.bf16.msra.mxu0 %v1433_v21 }
 0x294   :  { %v1414_v24 = vsel %vm1336_vm3, %v960_v20, 0 }
 0x295   :  { %1423 = vmatpush.bf16.msrb.mxu3 %v1414_v24 }
 0x2c2   :  { %v1173_v62 = vpop.xlane.xlu2 %1172 }
 0x2c3   :  { %2204 = vrcp.f32 %v1173_v62  ;;  %v1230_v47 = vand.u32 2147483648, %v1173_v62  ;;  %v1228_v26 = vand.u32 2147483647, %v1173_v62  ;;  %vm1224_vm5 = vweird.f32 %v1173_v62 }
 0x2c5   :  { %v1231_v55 = vor.u32 1.1754944e-38, %v1230_v47  ;;  %vm1229_vm7 = vcmp.eq.f32.partialorder %v1228_v26, 8.507059e+37 }
 0x2c9   :  { %v2205_v40 = vpop.eup %2204 }
 0x2ca   :  { %v1220_v53 = vmul.f32 %v2205_v40, %v1173_v62  ;;  %v1176_v61 = vpop.xlane.xlu1 %1175  ;;  %vm1225_vm4 = vweird.f32 %v2205_v40 }
 0x2cb   :  { %2206 = vrcp.f32 %v1176_v61  ;;  %vm1226_vm6 = vmor %vm1224_vm5, %vm1225_vm4  ;;  %v1245_v51 = vand.u32 2147483648, %v1176_v61  ;;  %v1243_v43 = vand.u32 2147483647, %v1176_v61  ;;  %vm1239_vm9 = vweird.f32 %v1176_v61 }
 0x2cc   :  { %v1221_v34 = vsub.f32 1.0, %v1220_v53 }
 0x2cd   :  { %vm1244_vm11 = vcmp.eq.f32.partialorder %v1243_v43, 8.507059e+37 }
 0x2ce   :  { %v1222_v31 = vmul.f32 %v2205_v40, %v1221_v34 }
 0x2d0   :  { %v1167_v16 = vpop.xlane.xlu0 %1166  ;;  %v1223_v12 = vadd.f32 %v2205_v40, %v1222_v31 }
 0x2d1   :  { %2208 = vrcp.f32 %v1167_v16  ;;  %v2207_v4 = vpop.eup %2206  ;;  %v1200_v39 = vand.u32 2147483648, %v1167_v16  ;;  %v1198_v45 = vand.u32 2147483647, %v1167_v16  ;;  %vm1194_vm13 = vweird.f32 %v1167_v16 }
 0x2d2   :  { %v1227_v30 = vsel %vm1226_vm6, %v2205_v40, %v1223_v12  ;;  %v1235_v5 = vmul.f32 %v2207_v4, %v1176_v61  ;;  %v1185_v11 = vpop.xlane.xlu2 %1184  ;;  %vm1240_vm8 = vweird.f32 %v2207_v4 }
 0x2d3   :  { %v1232_v32 = vsel %vm1229_vm7, %v1231_v55, %v1227_v30  ;;  %2210 = vrcp.f32 %v1185_v11  ;;  %vm1241_vm10 = vmor %vm1239_vm9, %vm1240_vm8  ;;  %v1201_v22 = vor.u32 1.1754944e-38, %v1200_v39  ;;  %v1290_v2 = vand.u32 2147483648, %v1185_v11 }
 0x2d4   :  { %v1311_v33 = vmul.f32 %v2835_v13, %v1232_v32  ;;  %v1236_v35 = vsub.f32 1.0, %v1235_v5  ;;  %v1246_v13 = vor.u32 1.1754944e-38, %v1245_v51  ;;  %v1288_v28 = vand.u32 2147483647, %v1185_v11 }
 0x2d5   :  { %vm1199_vm3 = vcmp.eq.f32.partialorder %v1198_v45, 8.507059e+37  ;;  %vm1284_vm4 = vweird.f32 %v1185_v11  ;;  %v1291_v57 = vor.u32 1.1754944e-38, %v1290_v2 }
 0x2d6   :  { %1319 = vst.msk [vmem:[#allocation9 + $0x10] sm:$0xff] %vm964_vm2, %v1311_v33  ;;  %v1237_v38 = vmul.f32 %v2207_v4, %v1236_v35  ;;  %v1327_v41 = vpack.c.bf16 %v1311_v33, %v1311_v33  ;;  %vm1289_vm6 = vcmp.eq.f32.partialorder %v1288_v28, 8.507059e+37 }
 0x2d7   :  { %v2209_v36 = vpop.eup %2208 }
 0x2d8   :  { %v1190_v42 = vmul.f32 %v2209_v36, %v1167_v16  ;;  %v2962_v50 = vpop.xlane.xlu0 %1169  ;;  %v1238_v58 = vadd.f32 %v2207_v4, %v1237_v38  ;;  %2071 = vmatmul.msk.bf16.vlgmr.msrb.gmra.mxu1 %vm964_vm2, %v1327_v41  ;;  %vm1195_vm12 = vweird.f32 %v2209_v36 }
 0x2d9   :  { %2212 = vrcp.f32 %v2962_v50  ;;  %v2211_v19 = vpop.eup %2210  ;;  %vm1196_vm14 = vmor %vm1194_vm13, %vm1195_vm12  ;;  %v1215_v21 = vand.u32 2147483648, %v2962_v50  ;;  %v1213_v40 = vand.u32 2147483647, %v2962_v50  ;;  %vm1209_vm8 = vweird.f32 %v2962_v50 }
 0x2da   :  { %v1191_v60 = vsub.f32 1.0, %v1190_v42  ;;  %v1242_v49 = vsel %vm1241_vm10, %v2207_v4, %v1238_v58  ;;  %v1280_v7 = vmul.f32 %v2211_v19, %v1185_v11  ;;  %vm1285_vm15 = vweird.f32 %v2211_v19 }
 0x2db   :  { %v1247_v56 = vsel %vm1244_vm11, %v1246_v13, %v1242_v49  ;;  %vm1286_vm5 = vmor %vm1284_vm4, %vm1285_vm15  ;;  %v1216_v47 = vor.u32 1.1754944e-38, %v1215_v21  ;;  %vm1214_vm10 = vcmp.eq.f32.partialorder %v1213_v40, 8.507059e+37 }
 0x2dc   :  { %v1192_v3 = vmul.f32 %v2209_v36, %v1191_v60  ;;  %v1312_v8 = vmul.f32 %v2839_v59, %v1247_v56  ;;  %v1281_v9 = vsub.f32 1.0, %v1280_v7 }
 0x2de   :  { %v1193_v63 = vadd.f32 %v2209_v36, %v1192_v3  ;;  %1320 = vst.msk [vmem:[#allocation9 + $0x18] sm:$0xff] %vm964_vm2, %v1312_v8  ;;  %v1282_v54 = vmul.f32 %v2211_v19, %v1281_v9  ;;  %v1328_v44 = vpack.c.bf16 %v1312_v8, %v1312_v8 }
 0x2df   :  { %v2213_v37 = vpop.eup %2212 }
 0x2e0   :  { %v1197_v46 = vsel %vm1196_vm14, %v2209_v36, %v1193_v63  ;;  %v1205_v14 = vmul.f32 %v2213_v37, %v2962_v50  ;;  %v1188_v48 = vpop.xlane.xlu0 %1187  ;;  %v2969_v10 = vpop.xlane.xlu1 %1178  ;;  %v1283_v15 = vadd.f32 %v2211_v19, %v1282_v54  ;;  %2072 = vmatmul.msk.bf16.vlgmr.msrb.gmra.mxu2 %vm964_vm2, %v1328_v44  ;;  %vm1210_vm7 = vweird.f32 %v2213_v37 }
 0x2e1   :  { %v1202_v59 = vsel %vm1199_vm3, %v1201_v22, %v1197_v46  ;;  %2214 = vrcp.f32 %v1188_v48  ;;  %vm1211_vm9 = vmor %vm1209_vm8, %vm1210_vm7  ;;  %v1303_v11 = vand.u32 2147483647, %v1188_v48  ;;  %v1305_v32 = vand.u32 2147483648, %v1188_v48 }
 0x2e2   :  { %v1309_v17 = vmul.f32 %v2843_v23, %v1202_v59  ;;  %v1206_v18 = vsub.f32 1.0, %v1205_v14  ;;  %v1287_v20 = vsel %vm1286_vm5, %v2211_v19, %v1283_v15  ;;  %2216 = vrcp.f32 %v2969_v10 }
 0x2e3   :  { %v1292_v24 = vsel %vm1289_vm6, %v1291_v57, %v1287_v20  ;;  %vm1299_vm12 = vweird.f32 %v1188_v48  ;;  %v1260_v36 = vand.u32 2147483648, %v2969_v10  ;;  %v1258_v41 = vand.u32 2147483647, %v2969_v10 }
 0x2e4   :  { %1317 = vst.msk [vmem:[#allocation9] sm:$0xff] %vm964_vm2, %v1309_v17  ;;  %v1207_v62 = vmul.f32 %v2213_v37, %v1206_v18  ;;  %v1315_v53 = vmul.f32 %v2847_v25, %v1292_v24  ;;  %v1325_v61 = vpack.c.bf16 %v1309_v17, %v1309_v17  ;;  %v1306_v42 = vor.u32 1.1754944e-38, %v1305_v32 }
 0x2e5   :  { %vm1254_vm15 = vweird.f32 %v2969_v10  ;;  %vm1304_vm3 = vcmp.eq.f32.partialorder %v1303_v11, 8.507059e+37  ;;  %v1261_v60 = vor.u32 1.1754944e-38, %v1260_v36  ;;  %vm1259_vm5 = vcmp.eq.f32.partialorder %v1258_v41, 8.507059e+37 }
 0x2e6   :  { %v1208_v23 = vadd.f32 %v2213_v37, %v1207_v62  ;;  %1323 = vst.msk [vmem:[#allocation9 + $0x30] sm:$0xff] %vm964_vm2, %v1315_v53  ;;  %2069 = vmatmul.msk.bf16.vlgmr.msra.gmra.mxu3 %vm964_vm2, %v1325_v61  ;;  %v1331_v31 = vpack.c.bf16 %v1315_v53, %v1315_v53 }
 0x2e7   :  { %v2215_v34 = vpop.eup %2214 }
 0x2e8   :  { %v1212_v26 = vsel %vm1211_vm9, %v2213_v37, %v1208_v23  ;;  %v1295_v16 = vmul.f32 %v2215_v34, %v1188_v48  ;;  %v1182_v12 = vpop.xlane.xlu1 %1181  ;;  %v2217_v4 = vpop.eup %2216  ;;  %2075 = vmatmul.msk.bf16.vlgmr.msra.gmra.mxu1 %vm964_vm2, %v1331_v31  ;;  %vm1300_vm11 = vweird.f32 %v2215_v34 }
 0x2e9   :  { %v1217_v55 = vsel %vm1214_vm10, %v1216_v47, %v1212_v26  ;;  %2218 = vrcp.f32 %v1182_v12  ;;  %v1250_v5 = vmul.f32 %v2217_v4, %v2969_v10  ;;  %vm1255_vm13 = vweird.f32 %v2217_v4  ;;  %vm1301_vm14 = vmor %vm1299_vm12, %vm1300_vm11 }
 0x2ea   :  { %v1310_v25 = vmul.f32 %v2851_v6, %v1217_v55  ;;  %v1296_v30 = vsub.f32 1.0, %v1295_v16  ;;  %vm1256_vm4 = vmor %vm1254_vm15, %vm1255_vm13  ;;  %v1273_v3 = vand.u32 2147483647, %v1182_v12  ;;  %v1275_v45 = vand.u32 2147483648, %v1182_v12 }
 0x2eb   :  { %v1251_v35 = vsub.f32 1.0, %v1250_v5  ;;  %vm1269_vm7 = vweird.f32 %v1182_v12  ;;  %vm1732_vm10 = vcmask 130048   ;;  %vm1735_vm11 = vcmask 195584  }
 0x2ec   :  { %1318 = vst.msk [vmem:[#allocation9 + $0x8] sm:$0xff] %vm964_vm2, %v1310_v25  ;;  %v1297_v33 = vmul.f32 %v2215_v34, %v1296_v30  ;;  %v1326_v51 = vpack.c.bf16 %v1310_v25, %v1310_v25  ;;  %vm1274_vm9 = vcmp.eq.f32.partialorder %v1273_v3, 8.507059e+37 }
 0x2ed   :  { %v1252_v43 = vmul.f32 %v2217_v4, %v1251_v35 }
 0x2ee   :  { %v1298_v38 = vadd.f32 %v2215_v34, %v1297_v33  ;;  %2070 = vmatmul.msk.bf16.vlgmr.msrb.gmra.mxu0 %vm964_vm2, %v1326_v51 }
 0x2ef   :  { %v2219_v6 = vpop.eup %2218  ;;  %v1253_v58 = vadd.f32 %v2217_v4, %v1252_v43 }
 0x2f0   :  { %v1302_v50 = vsel %vm1301_vm14, %v2215_v34, %v1298_v38  ;;  %v1265_v19 = vmul.f32 %v2219_v6, %v1182_v12  ;;  %vm1270_vm6 = vweird.f32 %v2219_v6 }
 0x2f1   :  { %v1307_v13 = vsel %vm1304_vm3, %v1306_v42, %v1302_v50  ;;  %v1257_v49 = vsel %vm1256_vm4, %v2217_v4, %v1253_v58  ;;  %vm1271_vm8 = vmor %vm1269_vm7, %vm1270_vm6  ;;  %vm1918_vm4 = vcmask 523264  }
 0x2f2   :  { %v1316_v39 = vmul.f32 %v2856_v0, %v1307_v13  ;;  %v1266_v7 = vsub.f32 1.0, %v1265_v19  ;;  %v1262_v56 = vsel %vm1259_vm5, %v1261_v60, %v1257_v49  ;;  %v1276_v0 = vor.u32 1.1754944e-38, %v1275_v45 }
 0x2f3   :  { %v1313_v8 = vmul.f32 %v2859_v29, %v1262_v56 }
 0x2f4   :  { %1324 = vst.msk [vmem:[#allocation9 + $0x38] sm:$0xff] %vm964_vm2, %v1316_v39  ;;  %v1267_v9 = vmul.f32 %v2219_v6, %v1266_v7  ;;  %v1332_v63 = vpack.c.bf16 %v1316_v39, %v1316_v39 }
 0x2f5   :  { %1321 = vst.msk [vmem:[#allocation9 + $0x20] sm:$0xff] %vm964_vm2, %v1313_v8  ;;  %v1329_v2 = vpack.c.bf16 %v1313_v8, %v1313_v8 }
 0x2f6   :  { %v1268_v22 = vadd.f32 %v2219_v6, %v1267_v9  ;;  %2076 = vmatmul.msk.bf16.vlgmr.msra.gmra.mxu2 %vm964_vm2, %v1332_v63 }
 0x2f7   :  { %2073 = vmatmul.msk.bf16.vlgmr.msrb.gmra.mxu3 %vm964_vm2, %v1329_v2 }
 0x2f8   :  { %v1272_v37 = vsel %vm1271_vm8, %v2219_v6, %v1268_v22 }
 0x2f9   :  { %v1277_v54 = vsel %vm1274_vm9, %v1276_v0, %v1272_v37 }
 0x2fa   :  { %v1314_v28 = vmul.f32 %v2873_v1, %v1277_v54 }
 0x2fc   :  { %1322 = vst.msk [vmem:[#allocation9 + $0x28] sm:$0xff] %vm964_vm2, %v1314_v28  ;;  %v1330_v29 = vpack.c.bf16 %v1314_v28, %v1314_v28 }
 0x2fe   :  { %2074 = vmatmul.msk.bf16.vlgmr.msra.gmra.mxu0 %vm964_vm2, %v1330_v29 }
 0x355   :  { %v1387_v44 = vpop.f32.mrf.mxu1 }
 0x356   :  { %v1486_v10 = vrot.slane %v1387_v44, 4 }
 0x35d   :  { %v1389_v46 = vpop.f32.mrf.mxu1 }
 0x363   :  { %v1406_v14 = vpop.f32.mrf.mxu2 }
 0x364   :  { %v1498_v59 = vrot.slane %v1406_v14, 4 }
 0x365   :  { %v1463_v48 = vpop.f32.mrf.mxu1 }
 0x366   :  { %v1542_v49 = vrot.slane %v1463_v48, 4 }
 0x369   :  { %v1349_v15 = vpop.f32.mrf.mxu3 }
 0x36a   :  { %v1487_v17 = vsel %vm240_vm1, %v1486_v10, %v1349_v15  ;;  %v1488_v57 = vrot.slane %v1349_v15, 4 }
 0x36b   :  { %v1368_v18 = vpop.f32.mrf.mxu0  ;;  %v1493_v20 = vperm.slane %v1487_v17, %v2535_v27  ;;  %v1408_v24 = vpop.f32.mrf.mxu2 }
 0x36c   :  { %v1499_v1 = vsel %vm240_vm1, %v1498_v59, %v1368_v18  ;;  %v1500_v21 = vrot.slane %v1368_v18, 4  ;;  %v1489_v62 = vsel %vm240_vm1, %v1387_v44, %v1488_v57 }
 0x36d   :  { %v1505_v40 = vperm.slane %v1499_v1, %v2535_v27  ;;  %v1497_v53 = vperm.slane %v1489_v62, %v2535_v27  ;;  %v1512_v61 = vrot.slane %v1493_v20, 4  ;;  %v1465_v34 = vpop.f32.mrf.mxu1 }
 0x36e   :  { %v1501_v23 = vsel %vm240_vm1, %v1406_v14, %v1500_v21 }
 0x36f   :  { %v1509_v47 = vperm.slane %v1501_v23, %v2535_v27  ;;  %v1510_v31 = vrot.slane %v1505_v40, 4  ;;  %v1524_v26 = vrot.slane %v1497_v53, 4  ;;  %v1513_v16 = vsel %vm240_vm1, %v1505_v40, %v1512_v61 }
 0x370   :  { %v1521_v4 = vperm.slane %v1513_v16, %v2551_v52 }
 0x371   :  { %v1511_v12 = vsel %vm240_vm1, %v1510_v31, %v1493_v20  ;;  %v1522_v55 = vrot.slane %v1509_v47, 4  ;;  %v1525_v30 = vsel %vm240_vm1, %v1509_v47, %v1524_v26  ;;  %v1351_v5 = vpop.f32.mrf.mxu3 }
 0x372   :  { %v1517_v25 = vperm.slane %v1511_v12, %v2551_v52  ;;  %v1533_v32 = vperm.slane %v1525_v30, %v2551_v52  ;;  %v1536_v33 = vrot.slane %v1521_v4, 4 }
 0x373   :  { %v1523_v11 = vsel %vm240_vm1, %v1522_v55, %v1497_v53  ;;  %v1370_v35 = vpop.f32.mrf.mxu0 }
 0x374   :  { %v1529_v51 = vperm.slane %v1523_v11, %v2551_v52  ;;  %v1534_v36 = vrot.slane %v1517_v25, 4  ;;  %v1537_v38 = vsel %vm240_vm1, 0.0, %v1536_v33  ;;  %v1540_v43 = vrot.slane %v1533_v32, 4 }
 0x375   :  { %v1603_v42 = vrot.slane %v1537_v38, 4  ;;  %v1598_v58 = vsel %vm240_vm1, %v1536_v33, %v1517_v25 }
 0x376   :  { %v1535_v41 = vsel %vm240_vm1, 0.0, %v1534_v36  ;;  %v1538_v6 = vrot.slane %v1529_v51, 4  ;;  %v1541_v50 = vsel %vm240_vm1, 0.0, %v1540_v43  ;;  %v1609_v13 = vsel %vm240_vm1, %v1540_v43, %v1529_v51 }
 0x377   :  { %v1604_v19 = vsel %vm240_vm1, %v1603_v42, %v1535_v41  ;;  %v1614_v60 = vrot.slane %v1541_v50, 4  ;;  %v1602_v56 = vperm.slane %v1598_v58, %v2535_v27  ;;  %v1613_v22 = vperm.slane %v1609_v13, %v2535_v27 }
 0x378   :  { %v1539_v39 = vsel %vm240_vm1, 0.0, %v1538_v6  ;;  %v1608_v3 = vperm.slane %v1604_v19, %v2535_v27 }
 0x379   :  { %v1482_v7 = vpop.f32.mrf.mxu2  ;;  %v1615_v8 = vsel %vm240_vm1, %v1614_v60, %v1539_v39  ;;  %v1622_v46 = vrot.slane %v1602_v56, 4  ;;  %v1634_v20 = vrot.slane %v1613_v22, 4 }
 0x37a   :  { %v1554_v45 = vrot.slane %v1482_v7, 4  ;;  %v1425_v9 = vpop.f32.mrf.mxu3  ;;  %v1619_v2 = vperm.slane %v1615_v8, %v2535_v27  ;;  %v1620_v59 = vrot.slane %v1608_v3, 4 }
 0x37b   :  { %v1444_v63 = vpop.f32.mrf.mxu0  ;;  %v1543_v0 = vsel %vm240_vm1, %v1542_v49, %v1425_v9  ;;  %v1544_v37 = vrot.slane %v1425_v9, 4  ;;  %v1623_v23 = vsel %vm240_vm1, %v1608_v3, %v1622_v46 }
 0x37c   :  { %v1555_v54 = vsel %vm240_vm1, %v1554_v45, %v1444_v63  ;;  %v1556_v28 = vrot.slane %v1444_v63, 4  ;;  %v1549_v29 = vperm.slane %v1543_v0, %v2535_v27  ;;  %v1632_v1 = vrot.slane %v1619_v2, 4 }
 0x37d   :  { %v1561_v44 = vperm.slane %v1555_v54, %v2535_v27  ;;  %v1545_v14 = vsel %vm240_vm1, %v1463_v48, %v1544_v37  ;;  %v1621_v16 = vsel %vm240_vm1, %v1620_v59, %v1602_v56  ;;  %v1631_v5 = vperm.slane %v1623_v23, %v2551_v52  ;;  %v2118_v23 = vld [vmem:[#allocation5] sm:$0xff] }
 0x37e   :  { %v1557_v10 = vsel %vm240_vm1, %v1482_v7, %v1556_v28  ;;  %v1553_v15 = vperm.slane %v1545_v14, %v2535_v27  ;;  %v1568_v17 = vrot.slane %v1549_v29, 4  ;;  %v1633_v12 = vsel %vm240_vm1, %v1632_v1, %v1613_v22 }
 0x37f   :  { %v1565_v57 = vperm.slane %v1557_v10, %v2535_v27  ;;  %v1566_v18 = vrot.slane %v1561_v44, 4  ;;  %v1635_v11 = vsel %vm240_vm1, %v1619_v2, %v1634_v20  ;;  %v1639_v32 = vperm.slane %v1633_v12, %v2551_v52 }
 0x380   :  { %v1580_v21 = vrot.slane %v1553_v15, 4  ;;  %v1569_v62 = vsel %vm240_vm1, %v1561_v44, %v1568_v17  ;;  %v1627_v41 = vperm.slane %v1621_v16, %v2551_v52  ;;  %v1643_v3 = vperm.slane %v1635_v11, %v2551_v52 }
 0x381   :  { %v1567_v24 = vsel %vm240_vm1, %v1566_v18, %v1549_v29  ;;  %v1578_v40 = vrot.slane %v1565_v57, 4  ;;  %v1484_v53 = vpop.f32.mrf.mxu2  ;;  %v1577_v61 = vperm.slane %v1569_v62, %v2551_v52  ;;  %v1644_v6 = vrot.slane %v1639_v32, 4 }
 0x382   :  { %v1573_v48 = vperm.slane %v1567_v24, %v2551_v52  ;;  %v1581_v47 = vsel %vm240_vm1, %v1565_v57, %v1580_v21  ;;  %v1427_v31 = vpop.f32.mrf.mxu3  ;;  %v1650_v9 = vrot.slane %v1631_v5, 4  ;;  %v1648_v54 = vrot.slane %v1643_v3, 4 }
 0x383   :  { %v1579_v34 = vsel %vm240_vm1, %v1578_v40, %v1553_v15  ;;  %v1446_v26 = vpop.f32.mrf.mxu0  ;;  %v1589_v55 = vperm.slane %v1581_v47, %v2551_v52  ;;  %v1592_v30 = vrot.slane %v1577_v61, 4  ;;  %v1645_v49 = vsel %vm240_vm1, %v1644_v6, %v1627_v41 }
 0x384   :  { %v1585_v4 = vperm.slane %v1579_v34, %v2551_v52  ;;  %v1590_v25 = vrot.slane %v1573_v48, 4  ;;  %v1646_v14 = vrot.slane %v1627_v41, 4  ;;  %v1651_v59 = vsel %vm240_vm1, %v1643_v3, %v1650_v9  ;;  %v2230_v41 = vld [vmem:[%s3179_s2] sm:$0xff] }
 0x385   :  { %v1593_v35 = vsel %vm240_vm1, 0.0, %v1592_v30  ;;  %v1596_v36 = vrot.slane %v1589_v55, 4  ;;  %v1652_v38 = vsel %vm240_vm1, %v1592_v30, %v1573_v48  ;;  %v1649_v1 = vsel %vm240_vm1, %v1648_v54, %v1631_v5 }
 0x386   :  { %v1591_v33 = vsel %vm240_vm1, 0.0, %v1590_v25  ;;  %v1594_v51 = vrot.slane %v1585_v4, 4  ;;  %v1657_v43 = vrot.slane %v1593_v35, 4  ;;  %v1656_v50 = vperm.slane %v1652_v38, %v2535_v27 }
 0x387   :  { %v1597_v42 = vsel %vm240_vm1, 0.0, %v1596_v36  ;;  %v1663_v58 = vsel %vm240_vm1, %v1596_v36, %v1585_v4  ;;  %v1647_v24 = vsel %vm240_vm1, %v1639_v32, %v1646_v14  ;;  %v2181_v36 = vld [vmem:[%s3162_s8] ss:$0 sm:$0xff] }
 0x388   :  { %v1595_v19 = vsel %vm240_vm1, 0.0, %v1594_v51  ;;  %v1658_v13 = vsel %vm240_vm1, %v1657_v43, %v1591_v33  ;;  %v1668_v60 = vrot.slane %v1597_v42, 4  ;;  %v1667_v39 = vperm.slane %v1663_v58, %v2535_v27 }
 0x389   :  { %v1662_v7 = vperm.slane %v1658_v13, %v2535_v27  ;;  %v1676_v56 = vrot.slane %v1656_v50, 4 }
 0x38a   :  { %v1669_v45 = vsel %vm240_vm1, %v1668_v60, %v1595_v19  ;;  %v1688_v8 = vrot.slane %v1667_v39, 4  ;;  %v2231_v19 = vld [vmem:[%s3179_s2 + $0x8] sm:$0xff] }
 0x38b   :  { %v1673_v63 = vperm.slane %v1669_v45, %v2535_v27  ;;  %v1677_v22 = vsel %vm240_vm1, %v1662_v7, %v1676_v56  ;;  %v1674_v2 = vrot.slane %v1662_v7, 4 }
 0x38c   :  { %v1685_v0 = vperm.slane %v1677_v22, %v2551_v52 }
 0x38d   :  { %v1689_v37 = vsel %vm240_vm1, %v1673_v63, %v1688_v8  ;;  %v1675_v28 = vsel %vm240_vm1, %v1674_v2, %v1656_v50  ;;  %v1686_v29 = vrot.slane %v1673_v63, 4 }
 0x38e   :  { %v1697_v44 = vperm.slane %v1689_v37, %v2551_v52  ;;  %v1704_v46 = vrot.slane %v1685_v0, 4  ;;  %v1681_v10 = vperm.slane %v1675_v28, %v2551_v52 }
 0x38f   :  { %v1687_v27 = vsel %vm240_vm1, %v1686_v29, %v1667_v39  ;;  %v2373_v39 = vmov 32.0  }
 0x390   :  { %v1705_v15 = vsel %vm240_vm1, %v1697_v44, %v1704_v46  ;;  %v1702_v17 = vrot.slane %v1697_v44, 4  ;;  %v1693_v57 = vperm.slane %v1687_v27, %v2551_v52  ;;  %v1700_v18 = vrot.slane %v1681_v10, 4  ;;  %v2119_v52 = vld [vmem:[#allocation5 + $0x8] sm:$0xff]  ;;  %v2120_v27 = vld [vmem:[#allocation7] sm:$0xff] }
 0x391   :  { %v2173_v20 = vpack.i.bf16 %v1705_v15, %v1651_v59  ;;  %1768 = vmatpush.bf16.msra.mxu3 %v2119_v52  ;;  %2220 = vrcp.f32 %v2373_v39  ;;  %v2121_v59 = vld [vmem:[#allocation7 + $0x8] sm:$0xff] }
 0x392   :  { %v1703_v21 = vsel %vm240_vm1, %v1702_v17, %v1685_v0  ;;  %v1698_v62 = vrot.slane %v1693_v57, 4  ;;  %v1701_v40 = vsel %vm240_vm1, %v1693_v57, %v1700_v18  ;;  %1871 = vmatpush.bf16.msrb.mxu0 %v2121_v59 }
 0x393   :  { %2174 = vrot.lane.b32.xlu1 %v2173_v20, %s2370_s6  ;;  %v2168_v53 = vpack.i.bf16 %v1703_v21, %v1649_v1  ;;  %v2163_v48 = vpack.i.bf16 %v1701_v40, %v1647_v24 }
 0x394   :  { %v1699_v61 = vsel %vm240_vm1, %v1698_v62, %v1681_v10 }
 0x395   :  { %2169 = vrot.lane.b32.xlu2 %v2168_v53, %s2371_s0  ;;  %2164 = vrot.lane.b32.xlu0 %v2163_v48, %s2372_s11  ;;  %s2374_s0 = smov [#allocation9]  }
 0x396   :  { %1769 = vmatpush.bf16.msra.mxu3 %v2118_v23  ;;  %1872 = vmatpush.bf16.msrb.mxu0 %v2120_v27  ;;  %s2013_s19 = sshll.u32 %s2374_s0, 4  ;;  %s2014_s19 = int_to_ptr.vmem [resolvable:$true] %s2013_s19 }
 0x3ef   :  { %v2170_v34 = vpop.permute.xlu2 %2169 }
 0x3f0   :  { %v2172_v12 = vunpack.i.h.bf16 %v2170_v34  ;;  %v2171_v4 = vunpack.i.l.bf16 %v2170_v34  ;;  %v2182_v34 = vld [vmem:[%s3163_s9] ss:$0 sm:$0xff] }
 0x405   :  { %v2175_v47 = vpop.permute.xlu1 %2174 }
 0x406   :  { %v2177_v55 = vunpack.i.h.bf16 %v2175_v47  ;;  %v2176_v25 = vunpack.i.l.bf16 %v2175_v47 }
 0x407   :  { %v2165_v31 = vpop.permute.xlu0 %2164 }
 0x408   :  { %v2167_v26 = vunpack.i.h.bf16 %v2165_v31  ;;  %v2166_v16 = vunpack.i.l.bf16 %v2165_v31 }
 0x40a   :  { %v1730_v30 = vsel %vm964_vm2, %v1645_v49, %v2166_v16  ;;  %v1731_v5 = vsel %vm964_vm2, %v1699_v61, %v2167_v26  ;;  %v2221_v49 = vpop.eup %2220  ;;  %v2183_v16 = vld [vmem:[%s3164_s10] ss:$0 sm:$0xff] }
 0x40b   :  { %v1733_v11 = vsel %vm1732_vm10, %v1730_v30, %v2171_v4  ;;  %v1734_v32 = vsel %vm1732_vm10, %v1731_v5, %v2172_v12  ;;  %v1787_v7 = vmul.f32 32.0, %v2221_v49  ;;  %vm1791_vm1 = vweird.f32 %v2221_v49 }
 0x40c   :  { %v1736_v33 = vsel %vm1735_vm11, %v1733_v11, %v2176_v25  ;;  %v1737_v35 = vsel %vm1735_vm11, %v1734_v32, %v2177_v55  ;;  %v2125_v11 = vld [vmem:[%s3167_s13 + $0x18] sm:$0xff]  ;;  %v2124_v32 = vld [vmem:[%s3167_s13 + $0x10] sm:$0xff] }
 0x40d   :  { %v1738_v51 = vpack.c.bf16 %v1737_v35, %v1736_v33  ;;  %v1788_v56 = vsub.f32 1.0, %v1787_v7  ;;  %1926 = vmatpush.bf16.msrb.mxu1 %v2125_v11  ;;  %v2123_v33 = vld [vmem:[%s3167_s13 + $0x8] sm:$0xff]  ;;  %v2122_v35 = vld [vmem:[%s3167_s13] sm:$0xff] }
 0x40f   :  { %2085 = vmatmul.msk.bf16.vlgmr.msra.gmra.mxu3 %vm131_vm0, %v1738_v51  ;;  %v1789_v3 = vmul.f32 %v2221_v49, %v1788_v56 }
 0x411   :  { %v1790_v45 = vadd.f32 %v2221_v49, %v1789_v3  ;;  %1927 = vmatpush.bf16.msrb.mxu1 %v2124_v32 }
 0x413   :  { %v3093_v8 = vsel %vm1791_vm1, %v2221_v49, %v1790_v45 }
 0x415   :  { %1928 = vmatpush.bf16.msrb.mxu1 %v2123_v33 }
 0x419   :  { %1929 = vmatpush.bf16.msrb.mxu1 %v2122_v35 }
 0x492   :  { %v1771_v38 = vpop.f32.mrf.mxu3 }
 0x493   :  { %v1772_v43 = vadd.f32 %v2181_v36, %v1771_v38 }
 0x495   :  { %v1776_v6 = vadd.f32 %v2230_v41, %v1772_v43 }
 0x497   :  { %v1780_v42 = vsel %vm131_vm0, %v1776_v6, 0.0 }
 0x498   :  { %1781 = vadd.xlane.f32.xlu0 %v1780_v42 }
 0x49a   :  { %v1773_v50 = vpop.f32.mrf.mxu3 }
 0x49b   :  { %v1774_v58 = vadd.f32 %v2181_v36, %v1773_v50  ;;  %v2184_v36 = vld [vmem:[%s3166_s12] ss:$0 sm:$0xff] }
 0x49d   :  { %v1777_v13 = vadd.f32 %v2231_v19, %v1774_v58  ;;  %v2185_v58 = vld [vmem:[%s3168_s14] ss:$0 sm:$0xff]  ;;  %s2015_s14 = sshll.u32 %s3172_s18, 4  ;;  %s2016_s14 = int_to_ptr.hbm [resolvable:$true] %s2015_s14 }
 0x49e   :  { %2021 = dma.vmem_to_hbm [thread:$0]  %s2014_s19, 1024, %s2016_s14, [#allocation10], %s2375_s1, %s2375_s1, %s2372_s11  }
 0x49f   :  { %v1783_v60 = vsel %vm131_vm0, %v1777_v13, 0.0 }
 0x4a0   :  { %1784 = vadd.xlane.f32.xlu2 %v1783_v60 }
 0x50b   :  { %v1782_v9 = vpop.xlane.xlu0 %1781 }
 0x50c   :  { %v1793_v63 = vmul.f32 %v3093_v8, %v1782_v9 }
 0x50e   :  { %v1795_v22 = vsub.f32 %v1776_v6, %v1793_v63 }
 0x510   :  { %v1797_v2 = vmul.f32 %v1795_v22, %v1795_v22 }
 0x512   :  { %v1799_v0 = vsel %vm131_vm0, %v1797_v2, 0.0 }
 0x513   :  { %v1785_v37 = vpop.xlane.xlu2 %1784  ;;  %1800 = vadd.xlane.f32.xlu1 %v1799_v0 }
 0x514   :  { %v1794_v54 = vmul.f32 %v3093_v8, %v1785_v37 }
 0x516   :  { %v1796_v28 = vsub.f32 %v1777_v13, %v1794_v54 }
 0x518   :  { %v1798_v29 = vmul.f32 %v1796_v28, %v1796_v28 }
 0x51a   :  { %v1802_v44 = vsel %vm131_vm0, %v1798_v29, 0.0 }
 0x51b   :  { %1803 = vadd.xlane.f32.xlu0 %v1802_v44 }
 0x586   :  { %v1801_v46 = vpop.xlane.xlu1 %1800 }
 0x587   :  { %v1805_v14 = vmul.f32 %v1801_v46, %v3093_v8 }
 0x589   :  { %v1807_v10 = vadd.f32 1e-05, %v1805_v14 }
 0x58b   :  { %2222 = vrsqrt.f32 %v1807_v10  ;;  %vm1815_vm12 = vweird.f32 %v1807_v10 }
 0x58e   :  { %v1804_v15 = vpop.xlane.xlu0 %1803 }
 0x58f   :  { %v1806_v17 = vmul.f32 %v1804_v15, %v3093_v8 }
 0x591   :  { %v2223_v57 = vpop.eup %2222  ;;  %v1808_v18 = vadd.f32 1e-05, %v1806_v17 }
 0x592   :  { %v1810_v20 = vmul.f32 %v2223_v57, %v1807_v10  ;;  %vm1816_vm2 = vweird.f32 %v2223_v57 }
 0x593   :  { %2224 = vrsqrt.f32 %v1808_v18  ;;  %vm1817_vm13 = vmor %vm1815_vm12, %vm1816_vm2  ;;  %vm1825_vm15 = vweird.f32 %v1808_v18 }
 0x594   :  { %v1811_v1 = vmul.f32 %v2223_v57, %v1810_v20 }
 0x596   :  { %v1812_v21 = vmul.f32 0.5, %v1811_v1 }
 0x598   :  { %v1813_v24 = vsub.f32 1.5, %v1812_v21 }
 0x599   :  { %v2225_v62 = vpop.eup %2224 }
 0x59a   :  { %v1814_v40 = vmul.f32 %v2223_v57, %v1813_v24  ;;  %v1820_v53 = vmul.f32 %v2225_v62, %v1808_v18  ;;  %vm1826_vm14 = vweird.f32 %v2225_v62 }
 0x59b   :  { %vm1827_vm3 = vmor %vm1825_vm15, %vm1826_vm14 }
 0x59c   :  { %v1821_v48 = vmul.f32 %v2225_v62, %v1820_v53  ;;  %v1818_v61 = vsel %vm1817_vm13, %v2223_v57, %v1814_v40 }
 0x59d   :  { %v1829_v47 = vmul.f32 %v1818_v61, %v1795_v22 }
 0x59e   :  { %v1822_v52 = vmul.f32 0.5, %v1821_v48 }
 0x59f   :  { %v1834_v12 = vmul.f32 %v2182_v34, %v1829_v47 }
 0x5a0   :  { %v1823_v23 = vsub.f32 1.5, %v1822_v52 }
 0x5a1   :  { %v1839_v25 = vadd.f32 %v2183_v16, %v1834_v12 }
 0x5a2   :  { %v1824_v31 = vmul.f32 %v2225_v62, %v1823_v23 }
 0x5a4   :  { %v1828_v26 = vsel %vm1827_vm3, %v2225_v62, %v1824_v31  ;;  %v2186_v62 = vld [vmem:[%s3169_s15] ss:$0 sm:$0xff]  ;;  %s2376_s15 = smov [#allocation8]  }
 0x5a5   :  { %v1830_v4 = vmul.f32 %v1828_v26, %v1796_v28  ;;  %s2000_s23 = sshll.u32 %s2376_s15, 4  ;;  %s2001_s23 = int_to_ptr.vmem [resolvable:$true] %s2000_s23 }
 0x5a7   :  { %v1835_v55 = vmul.f32 %v2182_v34, %v1830_v4 }
 0x5a9   :  { %v1840_v30 = vadd.f32 %v2183_v16, %v1835_v55 }
 0x5ab   :  { %v1841_v5 = vpack.c.bf16 %v1840_v30, %v1839_v25 }
 0x5ad   :  { %2094 = vmatmul.msk.bf16.vlgmr.msrb.gmra.mxu0 %vm131_vm0, %v1841_v5 }
 0x62a   :  { %v1874_v51 = vpop.f32.mrf.mxu0 }
 0x62b   :  { %v1875_v38 = vadd.f32 %v2184_v36, %v1874_v51 }
 0x62d   :  { %v1879_v6 = vmax.f32 %v1875_v38, 0.0 }
 0x632   :  { %v1876_v43 = vpop.f32.mrf.mxu0 }
 0x633   :  { %v1877_v41 = vadd.f32 %v2184_v36, %v1876_v43 }
 0x635   :  { %v1880_v42 = vmax.f32 %v1877_v41, 0.0 }
 0x637   :  { %v1881_v50 = vpack.c.bf16 %v1880_v42, %v1879_v6 }
 0x639   :  { %2111 = vmatmul.msk.bf16.vlgmr.msrb.gmra.mxu1 %vm1918_vm4, %v1881_v50 }
 0x6b6   :  { %v1931_v19 = vpop.f32.mrf.mxu1 }
 0x6b7   :  { %v1932_v13 = vadd.f32 %v2185_v58, %v1931_v19 }
 0x6b9   :  { %v1936_v60 = vadd.f32 %v1932_v13, %v1839_v25 }
 0x6bb   :  { %v1940_v39 = vsel %vm131_vm0, %v1936_v60, 0.0 }
 0x6bc   :  { %1941 = vadd.xlane.f32.xlu2 %v1940_v39 }
 0x6be   :  { %v1933_v49 = vpop.f32.mrf.mxu1 }
 0x6bf   :  { %v1934_v7 = vadd.f32 %v2185_v58, %v1933_v49 }
 0x6c1   :  { %v1937_v56 = vadd.f32 %v1934_v7, %v1840_v30 }
 0x6c3   :  { %v1943_v3 = vsel %vm131_vm0, %v1937_v56, 0.0 }
 0x6c4   :  { %1944 = vadd.xlane.f32.xlu0 %v1943_v3 }
 0x72f   :  { %v1942_v45 = vpop.xlane.xlu2 %1941 }
 0x730   :  { %v1946_v9 = vmul.f32 %v1942_v45, %v3093_v8 }
 0x732   :  { %v1948_v63 = vsub.f32 %v1936_v60, %v1946_v9 }
 0x734   :  { %v1950_v22 = vmul.f32 %v1948_v63, %v1948_v63 }
 0x736   :  { %v1952_v2 = vsel %vm131_vm0, %v1950_v22, 0.0 }
 0x737   :  { %v1945_v0 = vpop.xlane.xlu0 %1944  ;;  %1953 = vadd.xlane.f32.xlu1 %v1952_v2 }
 0x738   :  { %v1947_v37 = vmul.f32 %v1945_v0, %v3093_v8 }
 0x73a   :  { %v1949_v54 = vsub.f32 %v1937_v56, %v1947_v37 }
 0x73c   :  { %v1951_v28 = vmul.f32 %v1949_v54, %v1949_v54 }
 0x73e   :  { %v1955_v29 = vsel %vm131_vm0, %v1951_v28, 0.0 }
 0x73f   :  { %1956 = vadd.xlane.f32.xlu2 %v1955_v29 }
 0x7aa   :  { %v1954_v44 = vpop.xlane.xlu1 %1953 }
 0x7ab   :  { %v1958_v46 = vmul.f32 %v1954_v44, %v3093_v8 }
 0x7ad   :  { %v1960_v14 = vadd.f32 1e-05, %v1958_v46 }
 0x7af   :  { %2226 = vrsqrt.f32 %v1960_v14  ;;  %vm1968_vm6 = vweird.f32 %v1960_v14 }
 0x7b2   :  { %v1957_v10 = vpop.xlane.xlu2 %1956 }
 0x7b3   :  { %v1959_v59 = vmul.f32 %v1957_v10, %v3093_v8  ;;  %v2187_v8 = vld [vmem:[%s3170_s16] ss:$0 sm:$0xff] }
 0x7b5   :  { %v2227_v27 = vpop.eup %2226  ;;  %v1961_v15 = vadd.f32 1e-05, %v1959_v59 }
 0x7b6   :  { %v1963_v17 = vmul.f32 %v2227_v27, %v1960_v14  ;;  %vm1969_vm5 = vweird.f32 %v2227_v27 }
 0x7b7   :  { %2228 = vrsqrt.f32 %v1961_v15  ;;  %vm1970_vm7 = vmor %vm1968_vm6, %vm1969_vm5  ;;  %vm1978_vm9 = vweird.f32 %v1961_v15 }
 0x7b8   :  { %v1964_v57 = vmul.f32 %v2227_v27, %v1963_v17 }
 0x7ba   :  { %v1965_v18 = vmul.f32 0.5, %v1964_v57 }
 0x7bc   :  { %v1966_v20 = vsub.f32 1.5, %v1965_v18 }
 0x7bd   :  { %v2229_v1 = vpop.eup %2228 }
 0x7be   :  { %v1967_v21 = vmul.f32 %v2227_v27, %v1966_v20  ;;  %v1973_v24 = vmul.f32 %v2229_v1, %v1961_v15  ;;  %vm1979_vm8 = vweird.f32 %v2229_v1 }
 0x7bf   :  { %vm1980_vm10 = vmor %vm1978_vm9, %vm1979_vm8 }
 0x7c0   :  { %v1971_v40 = vsel %vm1970_vm7, %v2227_v27, %v1967_v21  ;;  %v1974_v53 = vmul.f32 %v2229_v1, %v1973_v24 }
 0x7c1   :  { %v1982_v48 = vmul.f32 %v1971_v40, %v1948_v63 }
 0x7c2   :  { %v1975_v61 = vmul.f32 0.5, %v1974_v53 }
 0x7c3   :  { %v1987_v52 = vmul.f32 %v2186_v62, %v1982_v48 }
 0x7c4   :  { %v1976_v23 = vsub.f32 1.5, %v1975_v61 }
 0x7c5   :  { %v1992_v34 = vadd.f32 %v2187_v8, %v1987_v52 }
 0x7c6   :  { %v1977_v47 = vmul.f32 %v2229_v1, %v1976_v23 }
 0x7c7   :  { %1994 = vst.msk [vmem:[#allocation8] sm:$0xff] %vm131_vm0, %v1992_v34 }
 0x7c8   :  { %v1981_v31 = vsel %vm1980_vm10, %v2229_v1, %v1977_v47 }
 0x7c9   :  { %v1983_v26 = vmul.f32 %v1981_v31, %v1949_v54 }
 0x7cb   :  { %v1988_v16 = vmul.f32 %v2186_v62, %v1983_v26 }
 0x7cd   :  { %v1993_v12 = vadd.f32 %v2187_v8, %v1988_v16 }
 0x7cf   :  { %1995 = vst.msk [vmem:[#allocation8 + $0x8] sm:$0xff] %vm131_vm0, %v1993_v12 }
 0x7d0   :  { %2008 = dma.vmem_to_hbm [thread:$0]  %s2001_s23, 256, %s2003_s24, [#allocation4], %s2375_s1, %s2375_s1, %s2372_s11  }
 0x7d1   :  { %2356 = dma.done.wait [#allocation4], 256  }
 0x7d2   :  { %2357 = vsyncadd [#allocation4], 4294967040 }
 0x7d3   :  { %2358 = dma.done.wait [#allocation10], 1024  }
 0x7d4   :  { %2359 = vsyncadd [#allocation10], 4294966272 }
 0x7d5   :  { %2030 = vsyncpa [#allocation3], 1 }
 0x7d6   :  { %2031 = vsyncpa [#allocation6], 1 }
 0x7d7   :  { %2032 = vsyncpa [#allocation4], 1 }
 0x7d8   :  { %2033 = vsyncpa [#allocation10], 1 }

</bundles_post_ra>
